<compile_context>
chip_gen: v6e
topology: v6e:2x2x1
jax: 0.10.0
libtpu: 0.0.40
codegen_flags: <defaults>
</compile_context>

<pallas_src>
import functools

import jax
import jax.numpy as jnp
import numpy as np
from jax.experimental import pallas as pl
from jax.experimental.pallas import tpu as pltpu

H = 128            # LSTM hidden size
NUM_LSTM_LAYERS = 4
C_IN = 9           # conv input channels
C_PAD = 16         # input channels zero-padded to one bf16 sublane tile
BN_EPS = 1e-5
TB_MAX = 2048      # maximum batch-tile rows


def _round_up(n, m):
    return (n + m - 1) // m * m


def _device_kind():
    try:
        return jax.devices()[0].device_kind.lower()
    except Exception:
        return ""


def _cores_per_chip():
    kind = _device_kind()
    if any(t in kind for t in ("v4", "v5p", "v7", "7x")):
        return 2
    return 1


def _default_gate_dtype():
    kind = _device_kind()
    if any(t in kind for t in ("v6", "v7", "7x")):
        return jnp.bfloat16   # v6e/v7x EUP/VPU support bf16 transcendentals
    return jnp.float32        # v5e and older: keep gate math in f32


def _choose_batch_tiling(B):
    """Pick (TB, B_pad): batch-tile rows (multiple of 128) and padded batch."""
    B128 = _round_up(max(B, 1), 128)
    # Enough tiles to respect TB_MAX and keep remainder padding small.
    n_tiles = -(-B128 // TB_MAX)
    # On 2-TC chips keep >=2 "parallel" grid steps so both TensorCores get
    # work (costs only ~0.35 us of extra grid overhead on 1-TC chips).
    if _cores_per_chip() >= 2 and B128 >= 2 * 128:
        n_tiles = max(n_tiles, 2)
    TB = min(TB_MAX, _round_up(-(-B128 // n_tiles), 128))
    B_pad = _round_up(B128, TB)
    return TB, B_pad


# --------------------------------------------------------------------------
# Pallas kernel
# --------------------------------------------------------------------------
def cnn_lstm_kernel(
    x_ref,
    w1_ref, b1_ref,
    w2_ref, b2_ref,
    w3_ref, b3_ref,
    wih0_ref, bl0_ref,
    wih1_ref, bl1_ref,
    wih2_ref, bl2_ref,
    wih3_ref, bl3_ref,
    fcw_ref, fcb_ref,
    out_ref,
    *, gate_dtype,
):
    # Conv1d(k=3, pad=1) on a length-1 sequence == linear with the center tap.
    # x arrives as a (TB, 16) tile (9 real channels + 7 zero lanes, padded in
    # the wrapper); conv1's weight carries matching zero rows, so the whole
    # 9 -> 128 projection is a single small-K MXU pass — no VMEM scratch, no
    # per-step zero store, no f32->bf16 round trip.
    h = x_ref[...].astype(jnp.bfloat16)                        # (TB, 16)

    def conv_block(h, w_ref, b_ref):
        # Linear (center tap) + bias + ReLU; the following eval-mode BN is
        # folded into the *next* layer's weights/bias in prepare_params().
        acc = jnp.dot(h, w_ref[...], preferred_element_type=jnp.float32)
        acc = acc + b_ref[...]
        return jnp.maximum(acc, 0.0).astype(jnp.bfloat16)

    h = conv_block(h, w1_ref, b1_ref)   # (TB, 128)
    h = conv_block(h, w2_ref, b2_ref)   # (TB, 256)
    h = conv_block(h, w3_ref, b3_ref)   # (TB, 512)

    def lstm_cell(h, wih_ref, b_ref):
        # seq_len == 1, h0 == c0 == 0: W_hh @ h_prev == 0 (only b_hh, folded
        # into b_ref, contributes) and the forget gate multiplies c0 == 0, so
        # its columns were dropped.  Reduced gate layout: [i, g, o] (3H cols).
        # Gate activations run in bf16 on v6e/v7x (bf16 EUP) and f32 on v5e.
        gates = jnp.dot(h, wih_ref[...], preferred_element_type=jnp.float32)
        gates = (gates + b_ref[...]).astype(gate_dtype)
        i = jax.nn.sigmoid(gates[:, 0 * H:1 * H])
        g = jnp.tanh(gates[:, 1 * H:2 * H])
        o = jax.nn.sigmoid(gates[:, 2 * H:3 * H])
        return (o * jnp.tanh(i * g)).astype(jnp.bfloat16)

    h = lstm_cell(h, wih0_ref, bl0_ref)
    h = lstm_cell(h, wih1_ref, bl1_ref)
    h = lstm_cell(h, wih2_ref, bl2_ref)
    h = lstm_cell(h, wih3_ref, bl3_ref)

    # Final Linear(128 -> 1), computed as (1,128) @ (TB,128)^T so the tile
    # output is a lane-dense (1, TB) row (4 B/row HBM writeback).
    y = jax.lax.dot_general(
        fcw_ref[...], h,
        dimension_numbers=(((1,), (1,)), ((), ())),
        preferred_element_type=jnp.float32,
    )
    out_ref[...] = y + fcb_ref[0]


# --------------------------------------------------------------------------
# One-time parameter preparation (hoisted out of the forward path)
# --------------------------------------------------------------------------
def prepare_params(p):
    def bn_scale_shift(prefix):
        scale = p[prefix + "_gamma"] / jnp.sqrt(p[prefix + "_var"] + BN_EPS)
        shift = p[prefix + "_beta"] - p[prefix + "_mean"] * scale
        return scale, shift

    s1, t1 = bn_scale_shift("bn1")
    s2, t2 = bn_scale_shift("bn2")
    s3, t3 = bn_scale_shift("bn3")

    # Conv center taps, transposed to (C_in, C_out).
    w1 = p["conv1_w"][:, :, 1].T        # (9, 128)
    w2 = p["conv2_w"][:, :, 1].T        # (128, 256)
    w3 = p["conv3_w"][:, :, 1].T        # (256, 512)

    # Pad conv1's 9 input rows to 16 (matches the wrapper's 9 -> 16 zero pad).
    w1p = jnp.zeros((C_PAD, H), jnp.float32).at[:C_IN, :].set(w1)
    b1 = p["conv1_b"]

    # Fold BN1 into conv2 and BN2 into conv3: relu_out*s + t followed by @W
    # equals relu_out @ (s[:,None]*W) + (t @ W).
    w2f = s1[:, None] * w2
    b2f = t1 @ w2 + p["conv2_b"]
    w3f = s2[:, None] * w3
    b3f = t2 @ w3 + p["conv3_b"]

    def drop_forget_cols(w_t):          # (in, 4H) -> (in, 3H): keep i, g, o
        return jnp.concatenate([w_t[:, 0:H], w_t[:, 2 * H:4 * H]], axis=1)

    def drop_forget_vec(b):
        return jnp.concatenate([b[0:H], b[2 * H:4 * H]], axis=0)

    lstm_ws, lstm_bs = [], []
    for l in range(NUM_LSTM_LAYERS):
        w_t = drop_forget_cols(p[f"lstm{l}_wih"].T)                 # (in, 3H)
        b = drop_forget_vec(p[f"lstm{l}_bih"] + p[f"lstm{l}_bhh"])  # (3H,)
        if l == 0:                       # fold BN3 into lstm layer 0 input
            b = t3 @ w_t + b
            w_t = s3[:, None] * w_t
        lstm_ws.append(w_t)
        lstm_bs.append(b)

    bf = jnp.bfloat16
    ops = [
        w1p.astype(bf), b1[None, :].astype(jnp.float32),
        w2f.astype(bf), b2f[None, :].astype(jnp.float32),
        w3f.astype(bf), b3f[None, :].astype(jnp.float32),
    ]
    for l in range(NUM_LSTM_LAYERS):
        ops += [lstm_ws[l].astype(bf), lstm_bs[l][None, :].astype(jnp.float32)]
    ops += [p["fc_w"].astype(bf)]                 # (1, 128)
    ops += [p["fc_b"].astype(jnp.float32)]        # (1,) scalar bias -> SMEM
    return tuple(ops)


# --------------------------------------------------------------------------
# Forward wrapper: batch grid + pallas_call
# --------------------------------------------------------------------------
def cnn_lstm_forward(x, x1, prep, *, gate_dtype=None):
    """x: (B, 9) float32; x1 is ignored, exactly as in the PyTorch forward."""
    del x1
    B = x.shape[0]
    if gate_dtype is None:
        gate_dtype = _default_gate_dtype()
    TB, B_pad = _choose_batch_tiling(B)
    grid = (B_pad // TB,)

    # Pad channels 9 -> 16 and batch -> B_pad (remainder tile handled by
    # adaptive TB; padded rows are sliced off after the kernel).
    x_p = jnp.zeros((B_pad, C_PAD), jnp.float32).at[:B, :C_IN].set(
        x.astype(jnp.float32))

    weight_ops = prep[:-1]       # all VMEM-resident weights / biases
    fcb = prep[-1]               # (1,) scalar bias -> SMEM

    def const_spec(arr):
        return pl.BlockSpec(arr.shape, lambda i: (0,) * arr.ndim)

    in_specs = [pl.BlockSpec((TB, C_PAD), lambda i: (i, 0))]
    in_specs += [const_spec(a) for a in weight_ops]
    in_specs += [pl.BlockSpec(memory_space=pltpu.MemorySpace.SMEM)]

    out = pl.pallas_call(
        functools.partial(cnn_lstm_kernel, gate_dtype=gate_dtype),
        out_shape=jax.ShapeDtypeStruct((1, B_pad), jnp.float32),
        grid_spec=pltpu.PrefetchScalarGridSpec(
            num_scalar_prefetch=0,
            grid=grid,
            in_specs=in_specs,
            out_specs=pl.BlockSpec((1, TB), lambda i: (0, i)),
        ),
        compiler_params=pltpu.CompilerParams(
            dimension_semantics=("parallel",),
            vmem_limit_bytes=48 * 1024 * 1024,
        ),
    )(x_p, *weight_ops, fcb)

    return out[0, :B][:, None]   # (B, 1) == self.fc(x[:, -1, :])


# --------------------------------------------------------------------------
# Parameter construction (deterministic, mirrors nn.Module __init__ shapes)
# --------------------------------------------------------------------------
def make_params(key):
    keys = iter(jax.random.split(key, 32))

    def normal(shape, fan_in):
        return (jax.random.normal(next(keys), shape, dtype=jnp.float32)
                / np.sqrt(float(fan_in))).astype(jnp.float32)

    p = {}
    p["conv1_w"] = normal((128, 9, 3), 9 * 3)
    p["conv1_b"] = normal((128,), 9 * 3)
    p["conv2_w"] = normal((256, 128, 3), 128 * 3)
    p["conv2_b"] = normal((256,), 128 * 3)
    p["conv3_w"] = normal((512, 256, 3), 256 * 3)
    p["conv3_b"] = normal((512,), 256 * 3)

    for name, c in (("bn1", 128), ("bn2", 256), ("bn3", 512)):
        p[name + "_gamma"] = (1.0 + 0.1 * jax.random.normal(next(keys), (c,))).astype(jnp.float32)
        p[name + "_beta"] = (0.1 * jax.random.normal(next(keys), (c,))).astype(jnp.float32)
        p[name + "_mean"] = jnp.zeros((c,), jnp.float32)
        p[name + "_var"] = jnp.ones((c,), jnp.float32)

    in_sizes = (512, H, H, H)
    for l, in_sz in enumerate(in_sizes):
        p[f"lstm{l}_wih"] = normal((4 * H, in_sz), in_sz)
        p[f"lstm{l}_whh"] = normal((4 * H, H), H)  # unused: seq_len==1, h0==0
        p[f"lstm{l}_bih"] = normal((4 * H,), H)
        p[f"lstm{l}_bhh"] = normal((4 * H,), H)

    p["fc_w"] = normal((1, H), H)
    p["fc_b"] = normal((1,), H)
    return p


# --------------------------------------------------------------------------
# Pure-JAX f32 reference (same eval-mode semantics) for a correctness check
# --------------------------------------------------------------------------
def reference_forward(x, x1, p):
    del x1

    def conv_block(v, w, b, gamma, beta, mean, var):
        y = v @ w[:, :, 1].T + b
        y = jnp.maximum(y, 0.0)
        return gamma * (y - mean) / jnp.sqrt(var + BN_EPS) + beta

    h = conv_block(x, p["conv1_w"], p["conv1_b"],
                   p["bn1_gamma"], p["bn1_beta"], p["bn1_mean"], p["bn1_var"])
    h = conv_block(h, p["conv2_w"], p["conv2_b"],
                   p["bn2_gamma"], p["bn2_beta"], p["bn2_mean"], p["bn2_var"])
    h = conv_block(h, p["conv3_w"], p["conv3_b"],
                   p["bn3_gamma"], p["bn3_beta"], p["bn3_mean"], p["bn3_var"])
    for l in range(NUM_LSTM_LAYERS):
        gates = h @ p[f"lstm{l}_wih"].T + p[f"lstm{l}_bih"] + p[f"lstm{l}_bhh"]
        i, f, g, o = jnp.split(gates, 4, axis=-1)
        c = jax.nn.sigmoid(i) * jnp.tanh(g)          # f * c0 == 0
        h = jax.nn.sigmoid(o) * jnp.tanh(c)
    return h @ p["fc_w"].T + p["fc_b"]


if __name__ == "__main__":
    key = jax.random.PRNGKey(0)
    kx, kx1, kp = jax.random.split(key, 3)

    params = make_params(kp)
    prep = prepare_params(params)          # one-time weight prep (hoisted)
    fwd = jax.jit(cnn_lstm_forward)

    # Small shape consistent with the module's forward (features == 9).
    B = 2
    x = jax.random.normal(kx, (B, C_IN), dtype=jnp.float32)
    x1 = jax.random.normal(kx1, (B, C_IN), dtype=jnp.float32)  # unused by forward()
    out = jax.block_until_ready(fwd(x, x1, prep))
    ref = reference_forward(x, x1, params)
    assert out.shape == (B, 1), out.shape
    # bf16 matmuls (and bf16 gates on v6e/v7x) with f32 accumulation.
    np.testing.assert_allclose(np.asarray(out), np.asarray(ref), rtol=5e-2, atol=5e-2)

    # Larger, non-multiple-of-128 batch: exercises the adaptive batch tiling,
    # remainder padding, and the 2-grid-step megacore path on 2-TC chips.
    B2 = 1234
    x2 = jax.random.normal(kx, (B2, C_IN), dtype=jnp.float32)
    out2 = jax.block_until_ready(fwd(x2, x2, prep))
    ref2 = reference_forward(x2, x2, params)
    assert out2.shape == (B2, 1), out2.shape
    np.testing.assert_allclose(np.asarray(out2), np.asarray(ref2), rtol=1e-1, atol=1e-1)

    print("KERNEL_OK")
</pallas_src>

<mosaic_0001>
module attributes {stable_mosaic.version = 11 : i64} {
  func.func @cnn_lstm_kernel(%arg0: i32, %arg1: memref<128x16xf32, #tpu.memory_space<vmem>>, %arg2: memref<16x128xbf16, #tpu.memory_space<vmem>>, %arg3: memref<1x128xf32, #tpu.memory_space<vmem>>, %arg4: memref<128x256xbf16, #tpu.memory_space<vmem>>, %arg5: memref<1x256xf32, #tpu.memory_space<vmem>>, %arg6: memref<256x512xbf16, #tpu.memory_space<vmem>>, %arg7: memref<1x512xf32, #tpu.memory_space<vmem>>, %arg8: memref<512x384xbf16, #tpu.memory_space<vmem>>, %arg9: memref<1x384xf32, #tpu.memory_space<vmem>>, %arg10: memref<128x384xbf16, #tpu.memory_space<vmem>>, %arg11: memref<1x384xf32, #tpu.memory_space<vmem>>, %arg12: memref<128x384xbf16, #tpu.memory_space<vmem>>, %arg13: memref<1x384xf32, #tpu.memory_space<vmem>>, %arg14: memref<128x384xbf16, #tpu.memory_space<vmem>>, %arg15: memref<1x384xf32, #tpu.memory_space<vmem>>, %arg16: memref<1x128xbf16, #tpu.memory_space<vmem>>, %arg17: memref<1xf32, #tpu.memory_space<smem>>, %arg18: memref<1x128xf32, #tpu.memory_space<vmem>>) attributes {dimension_semantics = [#tpu.dimension_semantics<parallel>], iteration_bounds = array<i64: 1>, scalar_prefetch = 0 : i64, scratch_operands = 0 : i64, tpu.core_type = #tpu.core_type<tc>, window_params = [{transform_indices = @transform_0, window_bounds = array<i64: 128, 16>}, {pipeline_mode = #tpu.pipeline_mode<synchronous>, transform_indices = @transform_1, window_bounds = array<i64: 16, 128>}, {pipeline_mode = #tpu.pipeline_mode<synchronous>, transform_indices = @transform_2, window_bounds = array<i64: 1, 128>}, {pipeline_mode = #tpu.pipeline_mode<synchronous>, transform_indices = @transform_3, window_bounds = array<i64: 128, 256>}, {pipeline_mode = #tpu.pipeline_mode<synchronous>, transform_indices = @transform_4, window_bounds = array<i64: 1, 256>}, {pipeline_mode = #tpu.pipeline_mode<synchronous>, transform_indices = @transform_5, window_bounds = array<i64: 256, 512>}, {pipeline_mode = #tpu.pipeline_mode<synchronous>, transform_indices = @transform_6, window_bounds = array<i64: 1, 512>}, {pipeline_mode = #tpu.pipeline_mode<synchronous>, transform_indices = @transform_7, window_bounds = array<i64: 512, 384>}, {pipeline_mode = #tpu.pipeline_mode<synchronous>, transform_indices = @transform_8, window_bounds = array<i64: 1, 384>}, {pipeline_mode = #tpu.pipeline_mode<synchronous>, transform_indices = @transform_9, window_bounds = array<i64: 128, 384>}, {pipeline_mode = #tpu.pipeline_mode<synchronous>, transform_indices = @transform_10, window_bounds = array<i64: 1, 384>}, {pipeline_mode = #tpu.pipeline_mode<synchronous>, transform_indices = @transform_11, window_bounds = array<i64: 128, 384>}, {pipeline_mode = #tpu.pipeline_mode<synchronous>, transform_indices = @transform_12, window_bounds = array<i64: 1, 384>}, {pipeline_mode = #tpu.pipeline_mode<synchronous>, transform_indices = @transform_13, window_bounds = array<i64: 128, 384>}, {pipeline_mode = #tpu.pipeline_mode<synchronous>, transform_indices = @transform_14, window_bounds = array<i64: 1, 384>}, {pipeline_mode = #tpu.pipeline_mode<synchronous>, transform_indices = @transform_15, window_bounds = array<i64: 1, 128>}, {transform_indices = @transform_16, window_bounds = array<i64: 1>}, {transform_indices = @transform_17, window_bounds = array<i64: 1, 128>}]} {
    %c0 = arith.constant 0 : index
    %c0_0 = arith.constant 0 : index
    %0 = vector.load %arg1[%c0, %c0_0] : memref<128x16xf32, #tpu.memory_space<vmem>>, vector<128x16xf32>
    %1 = arith.truncf %0 : vector<128x16xf32> to vector<128x16xbf16>
    %c0_1 = arith.constant 0 : index
    %c0_2 = arith.constant 0 : index
    %2 = vector.load %arg2[%c0_1, %c0_2] : memref<16x128xbf16, #tpu.memory_space<vmem>>, vector<16x128xbf16>
    %cst = arith.constant dense<0.000000e+00> : vector<128x128xf32>
    %3 = tpu.matmul %1, %2, %cst {dimension_numbers = #tpu.dot_dimension_numbers<[1], [0], [0], [1], [0, 0, 1, 1], [], []>} : vector<128x16xbf16>, vector<16x128xbf16>, vector<128x128xf32> -> vector<128x128xf32>
    %c0_3 = arith.constant 0 : index
    %c0_4 = arith.constant 0 : index
    %4 = vector.load %arg3[%c0_3, %c0_4] : memref<1x128xf32, #tpu.memory_space<vmem>>, vector<1x128xf32>
    %5 = vector.broadcast %4 : vector<1x128xf32> to vector<128x128xf32>
    %6 = arith.addf %3, %5 : vector<128x128xf32>
    %cst_5 = arith.constant 0.000000e+00 : f32
    %7 = vector.broadcast %cst_5 : f32 to vector<128x128xf32>
    %8 = arith.maximumf %6, %7 : vector<128x128xf32>
    %9 = arith.truncf %8 : vector<128x128xf32> to vector<128x128xbf16>
    %c0_6 = arith.constant 0 : index
    %c0_7 = arith.constant 0 : index
    %10 = vector.load %arg4[%c0_6, %c0_7] : memref<128x256xbf16, #tpu.memory_space<vmem>>, vector<128x256xbf16>
    %cst_8 = arith.constant dense<0.000000e+00> : vector<128x256xf32>
    %11 = tpu.matmul %9, %10, %cst_8 {dimension_numbers = #tpu.dot_dimension_numbers<[1], [0], [0], [1], [0, 0, 1, 1], [], []>} : vector<128x128xbf16>, vector<128x256xbf16>, vector<128x256xf32> -> vector<128x256xf32>
    %c0_9 = arith.constant 0 : index
    %c0_10 = arith.constant 0 : index
    %12 = vector.load %arg5[%c0_9, %c0_10] : memref<1x256xf32, #tpu.memory_space<vmem>>, vector<1x256xf32>
    %13 = vector.broadcast %12 : vector<1x256xf32> to vector<128x256xf32>
    %14 = arith.addf %11, %13 : vector<128x256xf32>
    %cst_11 = arith.constant 0.000000e+00 : f32
    %15 = vector.broadcast %cst_11 : f32 to vector<128x256xf32>
    %16 = arith.maximumf %14, %15 : vector<128x256xf32>
    %17 = arith.truncf %16 : vector<128x256xf32> to vector<128x256xbf16>
    %c0_12 = arith.constant 0 : index
    %c0_13 = arith.constant 0 : index
    %18 = vector.load %arg6[%c0_12, %c0_13] : memref<256x512xbf16, #tpu.memory_space<vmem>>, vector<256x512xbf16>
    %cst_14 = arith.constant dense<0.000000e+00> : vector<128x512xf32>
    %19 = tpu.matmul %17, %18, %cst_14 {dimension_numbers = #tpu.dot_dimension_numbers<[1], [0], [0], [1], [0, 0, 1, 1], [], []>} : vector<128x256xbf16>, vector<256x512xbf16>, vector<128x512xf32> -> vector<128x512xf32>
    %c0_15 = arith.constant 0 : index
    %c0_16 = arith.constant 0 : index
    %20 = vector.load %arg7[%c0_15, %c0_16] : memref<1x512xf32, #tpu.memory_space<vmem>>, vector<1x512xf32>
    %21 = vector.broadcast %20 : vector<1x512xf32> to vector<128x512xf32>
    %22 = arith.addf %19, %21 : vector<128x512xf32>
    %cst_17 = arith.constant 0.000000e+00 : f32
    %23 = vector.broadcast %cst_17 : f32 to vector<128x512xf32>
    %24 = arith.maximumf %22, %23 : vector<128x512xf32>
    %25 = arith.truncf %24 : vector<128x512xf32> to vector<128x512xbf16>
    %c0_18 = arith.constant 0 : index
    %c0_19 = arith.constant 0 : index
    %26 = vector.load %arg8[%c0_18, %c0_19] : memref<512x384xbf16, #tpu.memory_space<vmem>>, vector<512x384xbf16>
    %cst_20 = arith.constant dense<0.000000e+00> : vector<128x384xf32>
    %27 = tpu.matmul %25, %26, %cst_20 {dimension_numbers = #tpu.dot_dimension_numbers<[1], [0], [0], [1], [0, 0, 1, 1], [], []>} : vector<128x512xbf16>, vector<512x384xbf16>, vector<128x384xf32> -> vector<128x384xf32>
    %c0_21 = arith.constant 0 : index
    %c0_22 = arith.constant 0 : index
    %28 = vector.load %arg9[%c0_21, %c0_22] : memref<1x384xf32, #tpu.memory_space<vmem>>, vector<1x384xf32>
    %29 = vector.broadcast %28 : vector<1x384xf32> to vector<128x384xf32>
    %30 = arith.addf %27, %29 : vector<128x384xf32>
    %31 = vector.extract_strided_slice %30 {offsets = [0, 0], sizes = [128, 128], strides = [1, 1]} : vector<128x384xf32> to vector<128x128xf32>
    %32 = arith.negf %31 : vector<128x128xf32>
    %33 = math.exp %32 : vector<128x128xf32>
    %cst_23 = arith.constant 1.000000e+00 : f32
    %34 = vector.broadcast %cst_23 : f32 to vector<128x128xf32>
    %35 = arith.addf %34, %33 : vector<128x128xf32>
    %36 = arith.divf %34, %35 : vector<128x128xf32>
    %37 = vector.extract_strided_slice %30 {offsets = [0, 128], sizes = [128, 128], strides = [1, 1]} : vector<128x384xf32> to vector<128x128xf32>
    %38 = math.tanh %37 : vector<128x128xf32>
    %39 = vector.extract_strided_slice %30 {offsets = [0, 256], sizes = [128, 128], strides = [1, 1]} : vector<128x384xf32> to vector<128x128xf32>
    %40 = arith.negf %39 : vector<128x128xf32>
    %41 = math.exp %40 : vector<128x128xf32>
    %cst_24 = arith.constant 1.000000e+00 : f32
    %42 = vector.broadcast %cst_24 : f32 to vector<128x128xf32>
    %43 = arith.addf %42, %41 : vector<128x128xf32>
    %44 = arith.divf %42, %43 : vector<128x128xf32>
    %45 = arith.mulf %36, %38 : vector<128x128xf32>
    %46 = math.tanh %45 : vector<128x128xf32>
    %47 = arith.mulf %44, %46 : vector<128x128xf32>
    %48 = arith.truncf %47 : vector<128x128xf32> to vector<128x128xbf16>
    %c0_25 = arith.constant 0 : index
    %c0_26 = arith.constant 0 : index
    %49 = vector.load %arg10[%c0_25, %c0_26] : memref<128x384xbf16, #tpu.memory_space<vmem>>, vector<128x384xbf16>
    %cst_27 = arith.constant dense<0.000000e+00> : vector<128x384xf32>
    %50 = tpu.matmul %48, %49, %cst_27 {dimension_numbers = #tpu.dot_dimension_numbers<[1], [0], [0], [1], [0, 0, 1, 1], [], []>} : vector<128x128xbf16>, vector<128x384xbf16>, vector<128x384xf32> -> vector<128x384xf32>
    %c0_28 = arith.constant 0 : index
    %c0_29 = arith.constant 0 : index
    %51 = vector.load %arg11[%c0_28, %c0_29] : memref<1x384xf32, #tpu.memory_space<vmem>>, vector<1x384xf32>
    %52 = vector.broadcast %51 : vector<1x384xf32> to vector<128x384xf32>
    %53 = arith.addf %50, %52 : vector<128x384xf32>
    %54 = vector.extract_strided_slice %53 {offsets = [0, 0], sizes = [128, 128], strides = [1, 1]} : vector<128x384xf32> to vector<128x128xf32>
    %55 = arith.negf %54 : vector<128x128xf32>
    %56 = math.exp %55 : vector<128x128xf32>
    %cst_30 = arith.constant 1.000000e+00 : f32
    %57 = vector.broadcast %cst_30 : f32 to vector<128x128xf32>
    %58 = arith.addf %57, %56 : vector<128x128xf32>
    %59 = arith.divf %57, %58 : vector<128x128xf32>
    %60 = vector.extract_strided_slice %53 {offsets = [0, 128], sizes = [128, 128], strides = [1, 1]} : vector<128x384xf32> to vector<128x128xf32>
    %61 = math.tanh %60 : vector<128x128xf32>
    %62 = vector.extract_strided_slice %53 {offsets = [0, 256], sizes = [128, 128], strides = [1, 1]} : vector<128x384xf32> to vector<128x128xf32>
    %63 = arith.negf %62 : vector<128x128xf32>
    %64 = math.exp %63 : vector<128x128xf32>
    %cst_31 = arith.constant 1.000000e+00 : f32
    %65 = vector.broadcast %cst_31 : f32 to vector<128x128xf32>
    %66 = arith.addf %65, %64 : vector<128x128xf32>
    %67 = arith.divf %65, %66 : vector<128x128xf32>
    %68 = arith.mulf %59, %61 : vector<128x128xf32>
    %69 = math.tanh %68 : vector<128x128xf32>
    %70 = arith.mulf %67, %69 : vector<128x128xf32>
    %71 = arith.truncf %70 : vector<128x128xf32> to vector<128x128xbf16>
    %c0_32 = arith.constant 0 : index
    %c0_33 = arith.constant 0 : index
    %72 = vector.load %arg12[%c0_32, %c0_33] : memref<128x384xbf16, #tpu.memory_space<vmem>>, vector<128x384xbf16>
    %cst_34 = arith.constant dense<0.000000e+00> : vector<128x384xf32>
    %73 = tpu.matmul %71, %72, %cst_34 {dimension_numbers = #tpu.dot_dimension_numbers<[1], [0], [0], [1], [0, 0, 1, 1], [], []>} : vector<128x128xbf16>, vector<128x384xbf16>, vector<128x384xf32> -> vector<128x384xf32>
    %c0_35 = arith.constant 0 : index
    %c0_36 = arith.constant 0 : index
    %74 = vector.load %arg13[%c0_35, %c0_36] : memref<1x384xf32, #tpu.memory_space<vmem>>, vector<1x384xf32>
    %75 = vector.broadcast %74 : vector<1x384xf32> to vector<128x384xf32>
    %76 = arith.addf %73, %75 : vector<128x384xf32>
    %77 = vector.extract_strided_slice %76 {offsets = [0, 0], sizes = [128, 128], strides = [1, 1]} : vector<128x384xf32> to vector<128x128xf32>
    %78 = arith.negf %77 : vector<128x128xf32>
    %79 = math.exp %78 : vector<128x128xf32>
    %cst_37 = arith.constant 1.000000e+00 : f32
    %80 = vector.broadcast %cst_37 : f32 to vector<128x128xf32>
    %81 = arith.addf %80, %79 : vector<128x128xf32>
    %82 = arith.divf %80, %81 : vector<128x128xf32>
    %83 = vector.extract_strided_slice %76 {offsets = [0, 128], sizes = [128, 128], strides = [1, 1]} : vector<128x384xf32> to vector<128x128xf32>
    %84 = math.tanh %83 : vector<128x128xf32>
    %85 = vector.extract_strided_slice %76 {offsets = [0, 256], sizes = [128, 128], strides = [1, 1]} : vector<128x384xf32> to vector<128x128xf32>
    %86 = arith.negf %85 : vector<128x128xf32>
    %87 = math.exp %86 : vector<128x128xf32>
    %cst_38 = arith.constant 1.000000e+00 : f32
    %88 = vector.broadcast %cst_38 : f32 to vector<128x128xf32>
    %89 = arith.addf %88, %87 : vector<128x128xf32>
    %90 = arith.divf %88, %89 : vector<128x128xf32>
    %91 = arith.mulf %82, %84 : vector<128x128xf32>
    %92 = math.tanh %91 : vector<128x128xf32>
    %93 = arith.mulf %90, %92 : vector<128x128xf32>
    %94 = arith.truncf %93 : vector<128x128xf32> to vector<128x128xbf16>
    %c0_39 = arith.constant 0 : index
    %c0_40 = arith.constant 0 : index
    %95 = vector.load %arg14[%c0_39, %c0_40] : memref<128x384xbf16, #tpu.memory_space<vmem>>, vector<128x384xbf16>
    %cst_41 = arith.constant dense<0.000000e+00> : vector<128x384xf32>
    %96 = tpu.matmul %94, %95, %cst_41 {dimension_numbers = #tpu.dot_dimension_numbers<[1], [0], [0], [1], [0, 0, 1, 1], [], []>} : vector<128x128xbf16>, vector<128x384xbf16>, vector<128x384xf32> -> vector<128x384xf32>
    %c0_42 = arith.constant 0 : index
    %c0_43 = arith.constant 0 : index
    %97 = vector.load %arg15[%c0_42, %c0_43] : memref<1x384xf32, #tpu.memory_space<vmem>>, vector<1x384xf32>
    %98 = vector.broadcast %97 : vector<1x384xf32> to vector<128x384xf32>
    %99 = arith.addf %96, %98 : vector<128x384xf32>
    %100 = vector.extract_strided_slice %99 {offsets = [0, 0], sizes = [128, 128], strides = [1, 1]} : vector<128x384xf32> to vector<128x128xf32>
    %101 = arith.negf %100 : vector<128x128xf32>
    %102 = math.exp %101 : vector<128x128xf32>
    %cst_44 = arith.constant 1.000000e+00 : f32
    %103 = vector.broadcast %cst_44 : f32 to vector<128x128xf32>
    %104 = arith.addf %103, %102 : vector<128x128xf32>
    %105 = arith.divf %103, %104 : vector<128x128xf32>
    %106 = vector.extract_strided_slice %99 {offsets = [0, 128], sizes = [128, 128], strides = [1, 1]} : vector<128x384xf32> to vector<128x128xf32>
    %107 = math.tanh %106 : vector<128x128xf32>
    %108 = vector.extract_strided_slice %99 {offsets = [0, 256], sizes = [128, 128], strides = [1, 1]} : vector<128x384xf32> to vector<128x128xf32>
    %109 = arith.negf %108 : vector<128x128xf32>
    %110 = math.exp %109 : vector<128x128xf32>
    %cst_45 = arith.constant 1.000000e+00 : f32
    %111 = vector.broadcast %cst_45 : f32 to vector<128x128xf32>
    %112 = arith.addf %111, %110 : vector<128x128xf32>
    %113 = arith.divf %111, %112 : vector<128x128xf32>
    %114 = arith.mulf %105, %107 : vector<128x128xf32>
    %115 = math.tanh %114 : vector<128x128xf32>
    %116 = arith.mulf %113, %115 : vector<128x128xf32>
    %117 = arith.truncf %116 : vector<128x128xf32> to vector<128x128xbf16>
    %c0_46 = arith.constant 0 : index
    %c0_47 = arith.constant 0 : index
    %118 = vector.load %arg16[%c0_46, %c0_47] : memref<1x128xbf16, #tpu.memory_space<vmem>>, vector<1x128xbf16>
    %cst_48 = arith.constant dense<0.000000e+00> : vector<1x128xf32>
    %119 = tpu.matmul %118, %117, %cst_48 {dimension_numbers = #tpu.dot_dimension_numbers<[1], [1], [0], [0], [0, 0, 1, 0], [], []>} : vector<1x128xbf16>, vector<128x128xbf16>, vector<1x128xf32> -> vector<1x128xf32>
    %c0_49 = arith.constant 0 : index
    %120 = memref.load %arg17[%c0_49] : memref<1xf32, #tpu.memory_space<smem>>
    %121 = vector.broadcast %120 : f32 to vector<1x128xf32>
    %122 = arith.addf %119, %121 : vector<1x128xf32>
    %c0_50 = arith.constant 0 : index
    %c0_51 = arith.constant 0 : index
    %123 = vector.load %arg18[%c0_50, %c0_51] : memref<1x128xf32, #tpu.memory_space<vmem>>, vector<1x128xf32>
    tpu.vector_store %arg18[%c0_50, %c0_51], %122 {strides = array<i32>} : memref<1x128xf32, #tpu.memory_space<vmem>>, vector<1x128xf32>,
    return
  }
  func.func @transform_0(%arg0: i32) -> (i32, i32) {
    %c0_i32 = arith.constant 0 : i32
    %c0_i32_0 = arith.constant 0 : i32
    return %arg0, %c0_i32 : i32, i32
  }
  func.func @transform_1(%arg0: i32) -> (i32, i32) {
    %c0_i32 = arith.constant 0 : i32
    %c0_i32_0 = arith.constant 0 : i32
    %c0_i32_1 = arith.constant 0 : i32
    return %c0_i32, %c0_i32_0 : i32, i32
  }
  func.func @transform_2(%arg0: i32) -> (i32, i32) {
    %c0_i32 = arith.constant 0 : i32
    %c0_i32_0 = arith.constant 0 : i32
    %c0_i32_1 = arith.constant 0 : i32
    return %c0_i32, %c0_i32_0 : i32, i32
  }
  func.func @transform_3(%arg0: i32) -> (i32, i32) {
    %c0_i32 = arith.constant 0 : i32
    %c0_i32_0 = arith.constant 0 : i32
    %c0_i32_1 = arith.constant 0 : i32
    return %c0_i32, %c0_i32_0 : i32, i32
  }
  func.func @transform_4(%arg0: i32) -> (i32, i32) {
    %c0_i32 = arith.constant 0 : i32
    %c0_i32_0 = arith.constant 0 : i32
    %c0_i32_1 = arith.constant 0 : i32
    return %c0_i32, %c0_i32_0 : i32, i32
  }
  func.func @transform_5(%arg0: i32) -> (i32, i32) {
    %c0_i32 = arith.constant 0 : i32
    %c0_i32_0 = arith.constant 0 : i32
    %c0_i32_1 = arith.constant 0 : i32
    return %c0_i32, %c0_i32_0 : i32, i32
  }
  func.func @transform_6(%arg0: i32) -> (i32, i32) {
    %c0_i32 = arith.constant 0 : i32
    %c0_i32_0 = arith.constant 0 : i32
    %c0_i32_1 = arith.constant 0 : i32
    return %c0_i32, %c0_i32_0 : i32, i32
  }
  func.func @transform_7(%arg0: i32) -> (i32, i32) {
    %c0_i32 = arith.constant 0 : i32
    %c0_i32_0 = arith.constant 0 : i32
    %c0_i32_1 = arith.constant 0 : i32
    return %c0_i32, %c0_i32_0 : i32, i32
  }
  func.func @transform_8(%arg0: i32) -> (i32, i32) {
    %c0_i32 = arith.constant 0 : i32
    %c0_i32_0 = arith.constant 0 : i32
    %c0_i32_1 = arith.constant 0 : i32
    return %c0_i32, %c0_i32_0 : i32, i32
  }
  func.func @transform_9(%arg0: i32) -> (i32, i32) {
    %c0_i32 = arith.constant 0 : i32
    %c0_i32_0 = arith.constant 0 : i32
    %c0_i32_1 = arith.constant 0 : i32
    return %c0_i32, %c0_i32_0 : i32, i32
  }
  func.func @transform_10(%arg0: i32) -> (i32, i32) {
    %c0_i32 = arith.constant 0 : i32
    %c0_i32_0 = arith.constant 0 : i32
    %c0_i32_1 = arith.constant 0 : i32
    return %c0_i32, %c0_i32_0 : i32, i32
  }
  func.func @transform_11(%arg0: i32) -> (i32, i32) {
    %c0_i32 = arith.constant 0 : i32
    %c0_i32_0 = arith.constant 0 : i32
    %c0_i32_1 = arith.constant 0 : i32
    return %c0_i32, %c0_i32_0 : i32, i32
  }
  func.func @transform_12(%arg0: i32) -> (i32, i32) {
    %c0_i32 = arith.constant 0 : i32
    %c0_i32_0 = arith.constant 0 : i32
    %c0_i32_1 = arith.constant 0 : i32
    return %c0_i32, %c0_i32_0 : i32, i32
  }
  func.func @transform_13(%arg0: i32) -> (i32, i32) {
    %c0_i32 = arith.constant 0 : i32
    %c0_i32_0 = arith.constant 0 : i32
    %c0_i32_1 = arith.constant 0 : i32
    return %c0_i32, %c0_i32_0 : i32, i32
  }
  func.func @transform_14(%arg0: i32) -> (i32, i32) {
    %c0_i32 = arith.constant 0 : i32
    %c0_i32_0 = arith.constant 0 : i32
    %c0_i32_1 = arith.constant 0 : i32
    return %c0_i32, %c0_i32_0 : i32, i32
  }
  func.func @transform_15(%arg0: i32) -> (i32, i32) {
    %c0_i32 = arith.constant 0 : i32
    %c0_i32_0 = arith.constant 0 : i32
    %c0_i32_1 = arith.constant 0 : i32
    return %c0_i32, %c0_i32_0 : i32, i32
  }
  func.func @transform_16(%arg0: i32) -> i32 {
    %c0_i32 = arith.constant 0 : i32
    %c0_i32_0 = arith.constant 0 : i32
    return %c0_i32 : i32
  }
  func.func @transform_17(%arg0: i32) -> (i32, i32) {
    %c0_i32 = arith.constant 0 : i32
    %c0_i32_0 = arith.constant 0 : i32
    return %c0_i32, %arg0 : i32, i32
  }
}

</mosaic_0001>

<bundles_post_ra>
// kernel: cnn_lstm_forward.1
= control target key start
LH: loop header
LB: loop body
LE: loop exit
PB: predicated region body
PF: predicated region fallthrough
CT: control target
= control target key end

     0   :  { %s7750_s0 = inlined_call_operand.vmem [shape: f32[128,16], index: 0, kind: input, shape index: {}]   ;;  %s7751_s1 = inlined_call_operand.vmem [shape: bf16[16,128], index: 1, kind: input, shape index: {}]   ;;  %s7752_s2 = inlined_call_operand.hbm [shape: f32[1,128], index: 2, kind: input, shape index: {}]   ;;  %s7753_s3 = inlined_call_operand.vmem [shape: bf16[128,256], index: 3, kind: input, shape index: {}]   ;;  %s7754_s4 = inlined_call_operand.hbm [shape: f32[1,256], index: 4, kind: input, shape index: {}]   ;;  %s7755_s5 = inlined_call_operand.hbm [shape: bf16[256,512], index: 5, kind: input, shape index: {}]   ;;  %s7756_s6 = inlined_call_operand.vmem [shape: f32[1,512], index: 6, kind: input, shape index: {}]   ;;  %s7757_s7 = inlined_call_operand.hbm [shape: bf16[512,384], index: 7, kind: input, shape index: {}]   ;;  %s7758_s8 = inlined_call_operand.vmem [shape: f32[1,384], index: 8, kind: input, shape index: {}]   ;;  %s7759_s9 = inlined_call_operand.hbm [shape: bf16[128,384], index: 9, kind: input, shape index: {}]   ;;  %s7760_s10 = inlined_call_operand.vmem [shape: f32[1,384], index: 10, kind: input, shape index: {}]   ;;  %s7761_s11 = inlined_call_operand.hbm [shape: bf16[128,384], index: 11, kind: input, shape index: {}]   ;;  %s7762_s12 = inlined_call_operand.vmem [shape: f32[1,384], index: 12, kind: input, shape index: {}]   ;;  %s7763_s13 = inlined_call_operand.hbm [shape: bf16[128,384], index: 13, kind: input, shape index: {}]   ;;  %s7764_s14 = inlined_call_operand.vmem [shape: f32[1,384], index: 14, kind: input, shape index: {}]   ;;  %s7765_s15 = inlined_call_operand.vmem [shape: bf16[1,128], index: 15, kind: input, shape index: {}]   ;;  %s7766_s16 = inlined_call_operand.<no memory space> [shape: f32[1], index: 16, kind: input, shape index: {}]   ;;  %s7767_s17 = inlined_call_operand.vmem [shape: f32[1,128], index: 17, kind: output, shape index: {}]  }
   0x1   :  { %7769 = sst [smem:[#allocation18_spill]] %s7750_s0 }
   0x2   :  { %7770 = sst [smem:[#allocation19_spill]] %s7751_s1 }
   0x3   :  { %23 = vsyncpa [#allocation4], 0 }
   0x4   :  { %24 = vsyncpa [#allocation6], 0 }
   0x5   :  { %25 = vsyncpa [#allocation9], 0 }
   0x6   :  { %26 = vsyncpa [#allocation12], 0  ;;  %s6666_s24 = smov [#allocation5]   ;;  %s6667_s26 = smov [#allocation8]  }
   0x7   :  { %s49_s25 = sshll.u32 %s6666_s24, 4  ;;  %s72_s27 = sshll.u32 %s6667_s26, 4  ;;  %s50_s25 = int_to_ptr.vmem [resolvable:$true] %s49_s25  ;;  %s73_s27 = int_to_ptr.vmem [resolvable:$true] %s72_s27 }
   0x8   :  { %s6526_s28 = scalar_lea.vmem %s50_s25, 32  ;;  %p6531_p1 = scmp.lt.s32.totalorder %s50_s25, %s50_s25 }
   0x9   :  { %p6527_p0 = scmp.ne.s32.totalorder %s50_s25, %s6526_s28  ;;  %p6532_p2 = scmp.lt.s32.totalorder %s6526_s28, %s6526_s28 }
   0xb   :  { %p6533_p3 = por %p6532_p2, %p6531_p1 }
   0xd   :  { %p6534_p4 = pnand %p6533_p3, %p6527_p0 }
   0xf   :  { %6537 = shalt.err (!%p6534_p4)
}
  0x10   :  { %52 = dma.hbm_to_vmem [thread:$0]  %s7754_s4, 32, %s50_s25, [#allocation6]  }
  0x11   :  { %s6546_s30 = scalar_lea.vmem %s73_s27, 12288  ;;  %p6551_p6 = scmp.lt.s32.totalorder %s73_s27, %s73_s27 }
  0x12   :  { %p6547_p5 = scmp.ne.s32.totalorder %s73_s27, %s6546_s30  ;;  %p6552_p7 = scmp.lt.s32.totalorder %s6546_s30, %s6546_s30 }
  0x14   :  { %p6553_p8 = por %p6552_p7, %p6551_p6 }
  0x16   :  { %p6554_p9 = pnand %p6553_p8, %p6547_p5 }
  0x18   :  { %6557 = shalt.err (!%p6554_p9)
}
  0x19   :  { %s6668_s18 = smov 192   ;;  %s6669_s19 = smov 12  }
  0x1a   :  { %78 = dma.hbm_to_vmem [thread:$0]  %s7757_s7, 12288, %s73_s27, [#allocation9], %s6668_s18, %s6668_s18, %s6669_s19  }
  0x1b   :  { %s6670_s21 = smov [#allocation11]   ;;  %s6671_s23 = smov [#allocation3]  }
  0x1c   :  { %s100_s22 = sshll.u32 %s6670_s21, 4  ;;  %s37_s4 = sshll.u32 %s6671_s23, 4  ;;  %s101_s22 = int_to_ptr.vmem [resolvable:$true] %s100_s22  ;;  %s38_s4 = int_to_ptr.vmem [resolvable:$true] %s37_s4 }
  0x1d   :  { %s6566_s24 = scalar_lea.vmem %s101_s22, 3072  ;;  %p6571_p11 = scmp.lt.s32.totalorder %s101_s22, %s101_s22 }
  0x1e   :  { %p6567_p10 = scmp.ne.s32.totalorder %s101_s22, %s6566_s24  ;;  %p6572_p12 = scmp.lt.s32.totalorder %s6566_s24, %s6566_s24 }
  0x20   :  { %p6573_p13 = por %p6572_p12, %p6571_p11 }
  0x22   :  { %p6574_p0 = pnand %p6573_p13, %p6567_p10 }
  0x24   :  { %6577 = shalt.err (!%p6574_p0)
}
  0x25   :  { %106 = dma.hbm_to_vmem [thread:$0]  %s7761_s11, 3072, %s101_s22, [#allocation12], %s6668_s18, %s6668_s18, %s6669_s19  }
  0x26   :  { %s6586_s7 = scalar_lea.vmem %s38_s4, 16  ;;  %s6590_s27 = scalar_lea.vmem %s38_s4, 32 }
  0x27   :  { %p6587_p1 = scmp.ne.s32.totalorder %s38_s4, %s6586_s7  ;;  %p6591_p2 = scmp.lt.s32.totalorder %s38_s4, %s38_s4 }
  0x28   :  { %p6592_p3 = scmp.lt.s32.totalorder %s6590_s27, %s6586_s7 }
  0x2a   :  { %p6593_p4 = por %p6592_p3, %p6591_p2 }
  0x2c   :  { %p6594_p5 = pnand %p6593_p4, %p6587_p1 }
  0x2e   :  { %6597 = shalt.err (!%p6594_p5)
}
  0x2f   :  { %40 = dma.hbm_to_vmem [thread:$0]  %s7752_s2, 16, %s38_s4, [#allocation4]  }
  0x30   :  { %s6672_s0 = smov [#allocation7]  }
  0x31   :  { %s58_s30 = sshll.u32 %s6672_s0, 4  ;;  %s59_s30 = int_to_ptr.vmem [resolvable:$true] %s58_s30 }
  0x32   :  { %s6606_s1 = scalar_lea.vmem %s59_s30, 8192  ;;  %p6611_p7 = scmp.lt.s32.totalorder %s59_s30, %s59_s30 }
  0x33   :  { %p6607_p6 = scmp.ne.s32.totalorder %s59_s30, %s6606_s1  ;;  %p6612_p8 = scmp.lt.s32.totalorder %s6606_s1, %s6606_s1 }
  0x35   :  { %p6613_p9 = por %p6612_p8, %p6611_p7 }
  0x37   :  { %p6614_p10 = pnand %p6613_p9, %p6607_p6 }
  0x39   :  { %6617 = shalt.err (!%p6614_p10)
}
  0x3a   :  { %s6673_s11 = smov 256   ;;  %s6674_s20 = smov 16  }
  0x3b   :  { %64 = dma.hbm_to_vmem [thread:$0]  %s7755_s5, 8192, %s59_s30, [#allocation6], %s6673_s11, %s6673_s11, %s6674_s20  }
  0x3c   :  { %s6675_s23 = smov [#allocation10]   ;;  %s6676_s2 = smov [#allocation13]  }
  0x3d   :  { %s86_s24 = sshll.u32 %s6675_s23, 4  ;;  %s114_s4 = sshll.u32 %s6676_s2, 4  ;;  %s87_s24 = int_to_ptr.vmem [resolvable:$true] %s86_s24  ;;  %s115_s4 = int_to_ptr.vmem [resolvable:$true] %s114_s4 }
  0x3e   :  { %s6626_s25 = scalar_lea.vmem %s87_s24, 3072  ;;  %p6631_p12 = scmp.lt.s32.totalorder %s87_s24, %s87_s24 }
  0x3f   :  { %p6627_p11 = scmp.ne.s32.totalorder %s87_s24, %s6626_s25  ;;  %p6632_p13 = scmp.lt.s32.totalorder %s6626_s25, %s6626_s25 }
  0x41   :  { %p6633_p0 = por %p6632_p13, %p6631_p12 }
  0x43   :  { %p6634_p1 = pnand %p6633_p0, %p6627_p11 }
  0x45   :  { %6637 = shalt.err (!%p6634_p1)
}
  0x46   :  { %92 = dma.hbm_to_vmem [thread:$0]  %s7759_s9, 3072, %s87_s24, [#allocation9], %s6668_s18, %s6668_s18, %s6669_s19  }
  0x47   :  { %s6646_s5 = scalar_lea.vmem %s115_s4, 3072  ;;  %p6651_p3 = scmp.lt.s32.totalorder %s115_s4, %s115_s4 }
  0x48   :  { %p6647_p2 = scmp.ne.s32.totalorder %s115_s4, %s6646_s5  ;;  %p6652_p4 = scmp.lt.s32.totalorder %s6646_s5, %s6646_s5 }
  0x4a   :  { %p6653_p5 = por %p6652_p4, %p6651_p3 }
  0x4c   :  { %p6654_p6 = pnand %p6653_p5, %p6647_p2 }
  0x4e   :  { %6657 = shalt.err (!%p6654_p6)
}
  0x4f   :  { %120 = dma.hbm_to_vmem [thread:$0]  %s7763_s13, 3072, %s115_s4, [#allocation12], %s6668_s18, %s6668_s18, %s6669_s19  }
  0x50   :  { %6658 = dma.done.wait [#allocation4], 16  }
  0x51   :  { %6659 = vsyncadd [#allocation4], 4294967280 }
  0x52   :  { %6660 = dma.done.wait [#allocation6], 8224  }
  0x53   :  { %6661 = vsyncadd [#allocation6], 4294959072 }
  0x54   :  { %6662 = dma.done.wait [#allocation9], 15360  }
  0x55   :  { %6663 = vsyncadd [#allocation9], 4294951936 }
  0x56   :  { %6664 = dma.done.wait [#allocation12], 6144  }
  0x57   :  { %6665 = vsyncadd [#allocation12], 4294961152  ;;  %s7771_s0 = sld [smem:[#allocation19_spill]]  ;;  %vm188_vm0 = vcmask 130048   ;;  %v5406_v13 = vld [vmem:[%s7753_s3 + $0x70] ss:$8 sps:$4 sm:$0xff]  }
  0x58   :  { %s7772_s11 = sld [smem:[#allocation18_spill]]  ;;  %v5408_v14 = vld [vmem:[%s7753_s3 + $0x74] ss:$8 sps:$4 sm:$0xff]   ;;  %v5411_v16 = vld [vmem:[%s7753_s3 + $0x64] ss:$8 sps:$4 sm:$0xff]   ;;  %v6677_v41 = vmov 0  }
  0x59   :  { %v5409_v19 = vld [vmem:[%s7753_s3 + $0x60] ss:$8 sps:$4 sm:$0xff]   ;;  %v5414_v20 = vld [vmem:[%s7753_s3 + $0x54] ss:$8 sps:$4 sm:$0xff]   ;;  %v5412_v23 = vld [vmem:[%s7753_s3 + $0x50] ss:$8 sps:$4 sm:$0xff]  }
  0x5a   :  { %v5417_v26 = vld [vmem:[%s7753_s3 + $0x44] ss:$8 sps:$4 sm:$0xff]   ;;  %v5415_v27 = vld [vmem:[%s7753_s3 + $0x40] ss:$8 sps:$4 sm:$0xff]   ;;  %v5420_v29 = vld [vmem:[%s7753_s3 + $0x34] ss:$8 sps:$4 sm:$0xff]  }
  0x5b   :  { %v5418_v33 = vld [vmem:[%s7753_s3 + $0x30] ss:$8 sps:$4 sm:$0xff]   ;;  %v5423_v35 = vld [vmem:[%s7753_s3 + $0x24] ss:$8 sps:$4 sm:$0xff]   ;;  %v5421_v36 = vld [vmem:[%s7753_s3 + $0x20] ss:$8 sps:$4 sm:$0xff]  }
  0x5c   :  { %v5426_v37 = vld [vmem:[%s7753_s3 + $0x14] ss:$8 sps:$4 sm:$0xff]   ;;  %v5424_v38 = vld [vmem:[%s7753_s3 + $0x10] ss:$8 sps:$4 sm:$0xff]   ;;  %v5429_v39 = vld [vmem:[%s7753_s3 + $0x4] ss:$8 sps:$4 sm:$0xff]  }
  0x5d   :  { %v5405_v0 = vld [vmem:[%s7771_s0] sm:$0xff]   ;;  %v5430_v42 = vld [vmem:[#allocation7 + $0xe4] ss:$16 sps:$4 sm:$0xff]   ;;  %vm6679_vm1 = vmmov 0  }
  0x5e   :  { %v149_v1 = vld [vmem:[%s7772_s11] sm:$0xff]  ;;  %v150_v2 = vld [vmem:[%s7772_s11 + $0x8] sm:$0xff]  ;;  %v151_v3 = vld [vmem:[%s7772_s11 + $0x10] sm:$0xff]  ;;  %5257 = vmatprep.subr.bf16.mxu1 %v5405_v0  ;;  %1009 = vmatprep.subr.bf16.mxu0 %v5430_v42 }
  0x5f   :  { %v165_v4 = vpack.c.bf16 %v150_v2, %v149_v1  ;;  %v152_v5 = vld [vmem:[%s7772_s11 + $0x18] sm:$0xff]  ;;  %v153_v6 = vld [vmem:[%s7772_s11 + $0x20] sm:$0xff]  ;;  %v154_v7 = vld [vmem:[%s7772_s11 + $0x28] sm:$0xff]  ;;  %5258 = vmatpush3.bf16.msra.mxu1 %v5405_v0 }
  0x60   :  { %v166_v8 = vpack.c.bf16 %v152_v5, %v151_v3  ;;  %v167_v9 = vpack.c.bf16 %v154_v7, %v153_v6  ;;  %v155_v10 = vld [vmem:[%s7772_s11 + $0x30] sm:$0xff]  ;;  %v156_v11 = vld [vmem:[%s7772_s11 + $0x38] sm:$0xff]  ;;  %v157_v12 = vld [vmem:[%s7772_s11 + $0x40] sm:$0xff]  ;;  %442 = vmatprep.subr.bf16.mxu1 %v5408_v14 }
  0x61   :  { %5259 = vmatprep.mubr.msk.bf16.mxu1 %vm188_vm0, %v165_v4  ;;  %v158_v15 = vld [vmem:[%s7772_s11 + $0x48] sm:$0xff]  ;;  %v168_v17 = vpack.c.bf16 %v156_v11, %v155_v10  ;;  %v159_v21 = vld [vmem:[%s7772_s11 + $0x50] sm:$0xff]  ;;  %v160_v22 = vld [vmem:[%s7772_s11 + $0x58] sm:$0xff] }
  0x62   :  { %5260 = vmatmul.mubr.msk.bf16.vlgmr.msra.gmra.mxu1 %vm188_vm0, %v166_v8  ;;  %v169_v18 = vpack.c.bf16 %v158_v15, %v157_v12  ;;  %v161_v24 = vld [vmem:[%s7772_s11 + $0x60] sm:$0xff]  ;;  %v162_v25 = vld [vmem:[%s7772_s11 + $0x68] sm:$0xff]  ;;  %v170_v28 = vpack.c.bf16 %v160_v22, %v159_v21  ;;  %v163_v31 = vld [vmem:[%s7772_s11 + $0x70] sm:$0xff] }
  0x63   :  { %5263 = vmatprep.mubr.msk.bf16.mxu1 %vm188_vm0, %v167_v9  ;;  %443 = vmatpush1.bf16.msra.mxu1 %v5406_v13  ;;  %v171_v30 = vpack.c.bf16 %v162_v25, %v161_v24  ;;  %v164_v32 = vld [vmem:[%s7772_s11 + $0x78] sm:$0xff]  ;;  %v5427_v40 = vld [vmem:[%s7753_s3] ss:$8 sps:$4 sm:$0xff]   ;;  %v5435_v44 = vld [vmem:[#allocation7 + $0xe0] ss:$16 sps:$4 sm:$0xff]  }
  0x64   :  { %444 = vmatprep.subr.bf16.mxu1 %v5411_v16  ;;  %v172_v34 = vpack.c.bf16 %v164_v32, %v163_v31  ;;  %v5434_v43 = vld [vmem:[#allocation7 + $0xec] ss:$16 sps:$4 sm:$0xff]   ;;  %v5436_v45 = vld [vmem:[#allocation7 + $0xc4] ss:$16 sps:$4 sm:$0xff]   ;;  %1010 = vmatpush1.bf16.msra.mxu0 %v5435_v44  ;;  %v5441_v46 = vld [vmem:[#allocation7 + $0xc0] ss:$16 sps:$4 sm:$0xff]  }
  0x65   :  { %1011 = vmatprep.subr.bf16.mxu0 %v5436_v45  ;;  %v5442_v47 = vld [vmem:[#allocation7 + $0xa4] ss:$16 sps:$4 sm:$0xff]   ;;  %v5447_v48 = vld [vmem:[#allocation7 + $0xa0] ss:$16 sps:$4 sm:$0xff]   ;;  %v6911_v7 = vld [vmem:[#allocation3] ss:$0 sm:$0xff] }
  0x66   :  { %v5448_v49 = vld [vmem:[#allocation7 + $0x84] ss:$16 sps:$4 sm:$0xff]   ;;  %v5453_v50 = vld [vmem:[#allocation7 + $0x80] ss:$16 sps:$4 sm:$0xff]   ;;  %v5432_v16 = vld [vmem:[#allocation7 + $0xe8] ss:$16 sps:$4 sm:$0xff]  }
  0x67   :  { %445 = vmatpush1.bf16.msra.mxu1 %v5409_v19  ;;  %v5454_v51 = vld [vmem:[#allocation7 + $0x64] ss:$16 sps:$4 sm:$0xff]   ;;  %v5459_v52 = vld [vmem:[#allocation7 + $0x60] ss:$16 sps:$4 sm:$0xff]   ;;  %v5440_v19 = vld [vmem:[#allocation7 + $0xcc] ss:$16 sps:$4 sm:$0xff]  }
  0x68   :  { %446 = vmatprep.subr.bf16.mxu1 %v5414_v20  ;;  %1012 = vmatpush1.bf16.msra.mxu0 %v5441_v46  ;;  %v5460_v53 = vld [vmem:[#allocation7 + $0x44] ss:$16 sps:$4 sm:$0xff]   ;;  %v5465_v54 = vld [vmem:[#allocation7 + $0x40] ss:$16 sps:$4 sm:$0xff]   ;;  %v5438_v22 = vld [vmem:[#allocation7 + $0xc8] ss:$16 sps:$4 sm:$0xff]  }
  0x69   :  { %1013 = vmatprep.subr.bf16.mxu0 %v5442_v47  ;;  %v5466_v55 = vld [vmem:[#allocation7 + $0x24] ss:$16 sps:$4 sm:$0xff]   ;;  %v5471_v56 = vld [vmem:[#allocation7 + $0x20] ss:$16 sps:$4 sm:$0xff]   ;;  %v5446_v24 = vld [vmem:[#allocation7 + $0xac] ss:$16 sps:$4 sm:$0xff]  }
  0x6a   :  { %5264 = vmatmul.mubr.msk.bf16.gmra.mxu1 %vm188_vm0, %v168_v17  ;;  %v5472_v57 = vld [vmem:[#allocation7 + $0x4] ss:$16 sps:$4 sm:$0xff]   ;;  %v5477_v58 = vld [vmem:[#allocation7] ss:$16 sps:$4 sm:$0xff]   ;;  %v5452_v31 = vld [vmem:[#allocation7 + $0x8c] ss:$16 sps:$4 sm:$0xff]  }
  0x6b   :  { %5267 = vmatprep.mubr.msk.bf16.mxu1 %vm188_vm0, %v169_v18  ;;  %447 = vmatpush1.bf16.msra.mxu1 %v5412_v23  ;;  %v5478_v59 = vld [vmem:[#allocation7 + $0x1e4] ss:$16 sps:$4 sm:$0xff]   ;;  %v5483_v60 = vld [vmem:[#allocation7 + $0x1e0] ss:$16 sps:$4 sm:$0xff]   ;;  %v5462_v45 = vld [vmem:[#allocation7 + $0x48] ss:$16 sps:$4 sm:$0xff]  }
  0x6c   :  { %448 = vmatprep.subr.bf16.mxu1 %v5417_v26  ;;  %1014 = vmatpush1.bf16.msra.mxu0 %v5447_v48  ;;  %v5484_v61 = vld [vmem:[#allocation7 + $0x1c4] ss:$16 sps:$4 sm:$0xff]   ;;  %v5489_v62 = vld [vmem:[#allocation7 + $0x1c0] ss:$16 sps:$4 sm:$0xff]   ;;  %v5470_v48 = vld [vmem:[#allocation7 + $0x2c] ss:$16 sps:$4 sm:$0xff]  }
  0x6d   :  { %1015 = vmatprep.subr.bf16.mxu0 %v5448_v49  ;;  %v5490_v63 = vld [vmem:[#allocation7 + $0x1a4] ss:$16 sps:$4 sm:$0xff]   ;;  %v5495_v0 = vld [vmem:[#allocation7 + $0x1a0] ss:$16 sps:$4 sm:$0xff]  }
  0x6e   :  { %v5496_v1 = vld [vmem:[#allocation7 + $0x184] ss:$16 sps:$4 sm:$0xff]   ;;  %v5501_v2 = vld [vmem:[#allocation7 + $0x180] ss:$16 sps:$4 sm:$0xff]  }
  0x6f   :  { %449 = vmatpush1.bf16.msra.mxu1 %v5415_v27  ;;  %v5502_v3 = vld [vmem:[#allocation7 + $0x164] ss:$16 sps:$4 sm:$0xff]   ;;  %v5507_v4 = vld [vmem:[#allocation7 + $0x160] ss:$16 sps:$4 sm:$0xff]   ;;  %v5444_v27 = vld [vmem:[#allocation7 + $0xa8] ss:$16 sps:$4 sm:$0xff]  }
  0x70   :  { %450 = vmatprep.subr.bf16.mxu1 %v5420_v29  ;;  %1016 = vmatpush1.bf16.msra.mxu0 %v5453_v50  ;;  %v5468_v50 = vld [vmem:[#allocation7 + $0x28] ss:$16 sps:$4 sm:$0xff]  }
  0x71   :  { %1017 = vmatprep.subr.bf16.mxu0 %v5454_v51 }
  0x72   :  { %5268 = vmatmul.mubr.msk.bf16.gmra.mxu1 %vm188_vm0, %v170_v28 }
  0x73   :  { %5271 = vmatprep.mubr.msk.bf16.mxu1 %vm188_vm0, %v171_v30  ;;  %451 = vmatpush1.bf16.msra.mxu1 %v5418_v33  ;;  %v5450_v33 = vld [vmem:[#allocation7 + $0x88] ss:$16 sps:$4 sm:$0xff]  }
  0x74   :  { %452 = vmatprep.subr.bf16.mxu1 %v5423_v35  ;;  %1018 = vmatpush1.bf16.msra.mxu0 %v5459_v52 }
  0x75   :  { %1019 = vmatprep.subr.bf16.mxu0 %v5460_v53 }
  0x77   :  { %453 = vmatpush1.bf16.msra.mxu1 %v5421_v36  ;;  %v5458_v36 = vld [vmem:[#allocation7 + $0x6c] ss:$16 sps:$4 sm:$0xff]  }
  0x78   :  { %454 = vmatprep.subr.bf16.mxu1 %v5426_v37  ;;  %1020 = vmatpush1.bf16.msra.mxu0 %v5465_v54  ;;  %v5476_v54 = vld [vmem:[#allocation7 + $0xc] ss:$16 sps:$4 sm:$0xff]  }
  0x79   :  { %1021 = vmatprep.subr.bf16.mxu0 %v5466_v55 }
  0x7a   :  { %5272 = vmatmul.mubr.msk.bf16.gmra.mxu1 %vm188_vm0, %v172_v34 }
  0x7b   :  { %455 = vmatpush1.bf16.msra.mxu1 %v5424_v38  ;;  %474 = vmatprep.mubr.bf16.mxu1 %v6677_v41  ;;  %v5456_v38 = vld [vmem:[#allocation7 + $0x68] ss:$16 sps:$4 sm:$0xff]  }
  0x7c   :  { %456 = vmatprep.subr.bf16.mxu1 %v5429_v39  ;;  %1022 = vmatpush1.bf16.msra.mxu0 %v5471_v56  ;;  %v5474_v56 = vld [vmem:[#allocation7 + $0x8] ss:$16 sps:$4 sm:$0xff]  }
  0x7d   :  { %1023 = vmatprep.subr.bf16.mxu0 %v5472_v57 }
  0x7f   :  { %457 = vmatpush1.bf16.msra.mxu1 %v5427_v40 }
  0x80   :  { %1122 = vmatprep.subr.bf16.mxu1 %v5434_v43  ;;  %1024 = vmatpush1.bf16.msra.mxu0 %v5477_v58  ;;  %v5464_v43 = vld [vmem:[#allocation7 + $0x4c] ss:$16 sps:$4 sm:$0xff]  }
  0x81   :  { %1025 = vmatprep.subr.bf16.mxu0 %v5478_v59  ;;  %v5482_v59 = vld [vmem:[#allocation7 + $0x1ec] ss:$16 sps:$4 sm:$0xff]  }
  0x84   :  { %1026 = vmatpush2.bf16.msra.mxu0 %v5483_v60 }
  0x85   :  { %1027 = vmatprep.subr.bf16.mxu0 %v5484_v61  ;;  %v5480_v61 = vld [vmem:[#allocation7 + $0x1e8] ss:$16 sps:$4 sm:$0xff]  }
  0x88   :  { %1028 = vmatpush2.bf16.msra.mxu0 %v5489_v62 }
  0x89   :  { %1029 = vmatprep.subr.bf16.mxu0 %v5490_v63 }
  0x8c   :  { %1030 = vmatpush2.bf16.msra.mxu0 %v5495_v0 }
  0x8d   :  { %1031 = vmatprep.subr.bf16.mxu0 %v5496_v1  ;;  %v5488_v1 = vld [vmem:[#allocation7 + $0x1cc] ss:$16 sps:$4 sm:$0xff]  }
  0x90   :  { %1032 = vmatpush2.bf16.msra.mxu0 %v5501_v2 }
  0x91   :  { %1033 = vmatprep.subr.bf16.mxu0 %v5502_v3  ;;  %v5486_v3 = vld [vmem:[#allocation7 + $0x1c8] ss:$16 sps:$4 sm:$0xff]  }
  0x94   :  { %1034 = vmatpush2.bf16.msra.mxu0 %v5507_v4 }
 0x122   :  { %v5261_v5 = vpop.f32.mrf.mxu1 }
 0x123   :  { %v256_v21 = vadd.f32 %v5261_v5, %v6911_v7 }
 0x124   :  { %v247_v6 = vpop.f32.mrf.mxu1 }
 0x125   :  { %v248_v9 = vadd.f32 %v6911_v7, %v247_v6  ;;  %v312_v26 = vmax.f32 %v256_v21, 0.0  ;;  %v5494_v6 = vld [vmem:[#allocation7 + $0x1ac] ss:$16 sps:$4 sm:$0xff]  }
 0x126   :  { %v5262_v8 = vpop.f32.mrf.mxu1 }
 0x127   :  { %v310_v13 = vmax.f32 %v248_v9, 0.0  ;;  %v259_v17 = vadd.f32 %v5262_v8, %v6911_v7  ;;  %v5492_v9 = vld [vmem:[#allocation7 + $0x1a8] ss:$16 sps:$4 sm:$0xff]  }
 0x128   :  { %v250_v10 = vpop.f32.mrf.mxu1 }
 0x129   :  { %v251_v11 = vadd.f32 %v6911_v7, %v250_v10  ;;  %v313_v23 = vmax.f32 %v259_v17, 0.0  ;;  %v5506_v17 = vld [vmem:[#allocation7 + $0x16c] ss:$16 sps:$4 sm:$0xff]  }
 0x12a   :  { %v5265_v12 = vpop.f32.mrf.mxu1 }
 0x12b   :  { %v311_v14 = vmax.f32 %v251_v11, 0.0  ;;  %v327_v28 = vpack.c.bf16 %v313_v23, %v312_v26  ;;  %v272_v39 = vadd.f32 %v5265_v12, %v6911_v7  ;;  %v5512_v26 = vld [vmem:[#allocation7 + $0x14c] ss:$16 sps:$4 sm:$0xff]  }
 0x12c   :  { %v263_v15 = vpop.f32.mrf.mxu1 }
 0x12d   :  { %v326_v18 = vpack.c.bf16 %v311_v14, %v310_v13  ;;  %v264_v29 = vadd.f32 %v6911_v7, %v263_v15  ;;  %v316_v46 = vmax.f32 %v272_v39, 0.0  ;;  %v5500_v13 = vld [vmem:[#allocation7 + $0x18c] ss:$16 sps:$4 sm:$0xff]   ;;  %v5498_v14 = vld [vmem:[#allocation7 + $0x188] ss:$16 sps:$4 sm:$0xff]  }
 0x12e   :  { %v5266_v20 = vpop.f32.mrf.mxu1 }
 0x12f   :  { %475 = vmatmul.mubr.bf16.vlgmr.msra.gmra.mxu1 %v326_v18  ;;  %v314_v34 = vmax.f32 %v264_v29, 0.0  ;;  %v275_v40 = vadd.f32 %v5266_v20, %v6911_v7  ;;  %v5504_v18 = vld [vmem:[#allocation7 + $0x168] ss:$16 sps:$4 sm:$0xff]   ;;  %v5514_v29 = vld [vmem:[#allocation7 + $0x124] ss:$16 sps:$4 sm:$0xff]  }
 0x130   :  { %484 = vmatprep.mubr.bf16.mxu1 %v6677_v41  ;;  %1123 = vmatpush1.bf16.msra.mxu1 %v5432_v16  ;;  %v266_v25 = vpop.f32.mrf.mxu1 }
 0x131   :  { %1124 = vmatprep.subr.bf16.mxu1 %v5440_v19  ;;  %v267_v30 = vadd.f32 %v6911_v7, %v266_v25  ;;  %v317_v47 = vmax.f32 %v275_v40, 0.0  ;;  %v5508_v25 = vld [vmem:[#allocation7 + $0x144] ss:$16 sps:$4 sm:$0xff]  }
 0x132   :  { %v5269_v32 = vpop.f32.mrf.mxu1  ;;  %1035 = vmatprep.subr.bf16.mxu0 %v5508_v25  ;;  %v5549_v25 = vld [vmem:[#allocation8 + $0x1e4] ss:$12 sps:$4 sm:$0xff]  }
 0x133   :  { %v315_v35 = vmax.f32 %v267_v30, 0.0  ;;  %v329_v51 = vpack.c.bf16 %v317_v47, %v316_v46  ;;  %v288_v62 = vadd.f32 %v5269_v32, %v6911_v7  ;;  %v5516_v30 = vld [vmem:[#allocation7 + $0x128] ss:$16 sps:$4 sm:$0xff]   ;;  %v5520_v32 = vld [vmem:[#allocation7 + $0x104] ss:$16 sps:$4 sm:$0xff]  }
 0x134   :  { %1125 = vmatpush1.bf16.msra.mxu1 %v5438_v22  ;;  %v279_v37 = vpop.f32.mrf.mxu1 }
 0x135   :  { %1126 = vmatprep.subr.bf16.mxu1 %v5446_v24  ;;  %v328_v42 = vpack.c.bf16 %v315_v35, %v314_v34  ;;  %v280_v52 = vadd.f32 %v6911_v7, %v279_v37  ;;  %v320_v4 = vmax.f32 %v288_v62, 0.0  ;;  %v5522_v34 = vld [vmem:[#allocation7 + $0x108] ss:$16 sps:$4 sm:$0xff]   ;;  %v5525_v35 = vld [vmem:[#allocation7 + $0x100] ss:$16 sps:$4 sm:$0xff]  }
 0x136   :  { %v5270_v44 = vpop.f32.mrf.mxu1  ;;  %v5531_v37 = vld [vmem:[#allocation8 + $0x22c] ss:$12 sps:$4 sm:$0xff]   ;;  %v5529_v62 = vld [vmem:[#allocation8 + $0x228] ss:$12 sps:$4 sm:$0xff]  }
 0x137   :  { %485 = vmatmul.mubr.bf16.gmra.mxu1 %v327_v28  ;;  %v318_v57 = vmax.f32 %v280_v52, 0.0  ;;  %v291_v63 = vadd.f32 %v5270_v44, %v6911_v7  ;;  %v5513_v28 = vld [vmem:[#allocation7 + $0x140] ss:$16 sps:$4 sm:$0xff]  }
 0x138   :  { %494 = vmatprep.mubr.bf16.mxu1 %v6677_v41  ;;  %1127 = vmatpush1.bf16.msra.mxu1 %v5444_v27  ;;  %v282_v49 = vpop.f32.mrf.mxu1  ;;  %v5510_v27 = vld [vmem:[#allocation7 + $0x148] ss:$16 sps:$4 sm:$0xff]  }
 0x139   :  { %1128 = vmatprep.subr.bf16.mxu1 %v5452_v31  ;;  %v283_v53 = vadd.f32 %v6911_v7, %v282_v49  ;;  %v321_v5 = vmax.f32 %v291_v63, 0.0  ;;  %1036 = vmatpush2.bf16.msra.mxu0 %v5513_v28  ;;  %v5519_v31 = vld [vmem:[#allocation7 + $0x120] ss:$16 sps:$4 sm:$0xff]  }
 0x13a   :  { %v5273_v55 = vpop.f32.mrf.mxu1  ;;  %1037 = vmatprep.subr.bf16.mxu0 %v5514_v29 }
 0x13b   :  { %v319_v58 = vmax.f32 %v283_v53, 0.0  ;;  %v331_v10 = vpack.c.bf16 %v321_v5, %v320_v4  ;;  %v304_v19 = vadd.f32 %v5273_v55, %v6911_v7 }
 0x13c   :  { %1129 = vmatpush1.bf16.msra.mxu1 %v5450_v33  ;;  %v295_v60 = vpop.f32.mrf.mxu1  ;;  %v5524_v33 = vld [vmem:[#allocation7 + $0x10c] ss:$16 sps:$4 sm:$0xff]  }
 0x13d   :  { %1130 = vmatprep.subr.bf16.mxu1 %v5458_v36  ;;  %v330_v0 = vpack.c.bf16 %v319_v58, %v318_v57  ;;  %v296_v11 = vadd.f32 %v6911_v7, %v295_v60  ;;  %v324_v22 = vmax.f32 %v304_v19, 0.0  ;;  %1038 = vmatpush2.bf16.msra.mxu0 %v5519_v31  ;;  %v5528_v36 = vld [vmem:[#allocation8 + $0xac] ss:$12 sps:$4 sm:$0xff]  }
 0x13e   :  { %v5274_v2 = vpop.f32.mrf.mxu1  ;;  %1039 = vmatprep.subr.bf16.mxu0 %v5520_v32  ;;  %v5547_v31 = vld [vmem:[#allocation8 + $0x1e0] ss:$12 sps:$4 sm:$0xff]  }
 0x13f   :  { %495 = vmatmul.mubr.bf16.gmra.mxu1 %v328_v42  ;;  %v322_v15 = vmax.f32 %v296_v11, 0.0  ;;  %v307_v20 = vadd.f32 %v5274_v2, %v6911_v7  ;;  %v5537_v2 = vld [vmem:[#allocation8 + $0x214] ss:$12 sps:$4 sm:$0xff]  }
 0x140   :  { %504 = vmatprep.mubr.bf16.mxu1 %v6677_v41  ;;  %1131 = vmatpush1.bf16.msra.mxu1 %v5456_v38  ;;  %v298_v8 = vpop.f32.mrf.mxu1  ;;  %v352_v38 = vlaneseq }
 0x141   :  { %1132 = vmatprep.subr.bf16.mxu1 %v5464_v43  ;;  %v299_v12 = vadd.f32 %v6911_v7, %v298_v8  ;;  %v325_v23 = vmax.f32 %v307_v20, 0.0  ;;  %v5518_v7 = vld [vmem:[#allocation7 + $0x12c] ss:$16 sps:$4 sm:$0xff]   ;;  %1040 = vmatpush2.bf16.msra.mxu0 %v5525_v35  ;;  %v5538_v20 = vld [vmem:[#allocation8 + $0x78] ss:$12 sps:$4 sm:$0xff]  }
 0x142   :  { %1988 = vmatprep.subr.bf16.mxu0 %v5528_v36  ;;  %v6936_v39 = vshrl.u32 %v352_v38, 7  ;;  %v350_v43 = vld [vmem:[#allocation5] sm:$0x3]  ;;  %v5555_v35 = vld [vmem:[#allocation8 + $0x1cc] ss:$12 sps:$4 sm:$0xff]  }
 0x143   :  { %v323_v16 = vmax.f32 %v299_v12, 0.0  ;;  %v333_v24 = vpack.c.bf16 %v325_v23, %v324_v22 }
 0x144   :  { %1133 = vmatpush1.bf16.msra.mxu1 %v5462_v45  ;;  %v6939_v40 = vsub.s32 1, %v6936_v39  ;;  %v6942_v42 = vsub.s32 0, %v6936_v39 }
 0x145   :  { %1134 = vmatprep.subr.bf16.mxu1 %v5470_v48  ;;  %v332_v21 = vpack.c.bf16 %v323_v16, %v322_v15 }
 0x146   :  { %v6945_v45 = vrot.slane %v350_v43, %v6939_v40  ;;  %v6948_v46 = vrot.slane %v350_v43, %v6942_v42 }
 0x147   :  { %505 = vmatmul.mubr.bf16.gmra.mxu1 %v329_v51 }
 0x148   :  { %514 = vmatprep.mubr.bf16.mxu1 %v6677_v41  ;;  %1135 = vmatpush1.bf16.msra.mxu1 %v5468_v50 }
 0x149   :  { %1136 = vmatprep.subr.bf16.mxu1 %v5476_v54 }
 0x14c   :  { %1137 = vmatpush1.bf16.msra.mxu1 %v5474_v56 }
 0x14d   :  { %1138 = vmatprep.subr.bf16.mxu1 %v5482_v59 }
 0x14f   :  { %515 = vmatmul.mubr.bf16.gmra.mxu1 %v330_v0 }
 0x150   :  { %524 = vmatprep.mubr.bf16.mxu1 %v6677_v41  ;;  %1139 = vmatpush2.bf16.msra.mxu1 %v5480_v61  ;;  %v5526_v61 = vld [vmem:[#allocation8 + $0xa8] ss:$12 sps:$4 sm:$0xff]  }
 0x151   :  { %1140 = vmatprep.subr.bf16.mxu1 %v5488_v1  ;;  %v5534_v1 = vld [vmem:[#allocation8 + $0x94] ss:$12 sps:$4 sm:$0xff]  }
 0x154   :  { %1141 = vmatpush2.bf16.msra.mxu1 %v5486_v3 }
 0x155   :  { %1142 = vmatprep.subr.bf16.mxu1 %v5494_v6 }
 0x157   :  { %525 = vmatmul.mubr.bf16.gmra.mxu1 %v331_v10  ;;  %v5535_v10 = vld [vmem:[#allocation8 + $0x210] ss:$12 sps:$4 sm:$0xff]  }
 0x158   :  { %534 = vmatprep.mubr.bf16.mxu1 %v6677_v41  ;;  %1143 = vmatpush2.bf16.msra.mxu1 %v5492_v9  ;;  %v5532_v9 = vld [vmem:[#allocation8 + $0x90] ss:$12 sps:$4 sm:$0xff]  }
 0x159   :  { %1144 = vmatprep.subr.bf16.mxu1 %v5500_v13  ;;  %v5540_v13 = vld [vmem:[#allocation8 + $0x7c] ss:$12 sps:$4 sm:$0xff]  }
 0x15c   :  { %1145 = vmatpush2.bf16.msra.mxu1 %v5498_v14  ;;  %v5543_v14 = vld [vmem:[#allocation8 + $0x1fc] ss:$12 sps:$4 sm:$0xff]  }
 0x15d   :  { %1146 = vmatprep.subr.bf16.mxu1 %v5506_v17 }
 0x15f   :  { %535 = vmatmul.mubr.bf16.gmra.mxu1 %v332_v21  ;;  %v5541_v21 = vld [vmem:[#allocation8 + $0x1f8] ss:$12 sps:$4 sm:$0xff]  }
 0x160   :  { %544 = vmatprep.mubr.bf16.mxu1 %v6677_v41  ;;  %1147 = vmatpush2.bf16.msra.mxu1 %v5504_v18 }
 0x161   :  { %1148 = vmatprep.subr.bf16.mxu1 %v5512_v26 }
 0x164   :  { %1149 = vmatpush2.bf16.msra.mxu1 %v5510_v27 }
 0x165   :  { %1150 = vmatprep.subr.bf16.mxu1 %v5518_v7 }
 0x167   :  { %545 = vmatmul.mubr.bf16.gmra.mxu1 %v333_v24  ;;  %v5546_v24 = vld [vmem:[#allocation8 + $0x64] ss:$12 sps:$4 sm:$0xff]  }
 0x168   :  { %1151 = vmatpush2.bf16.msra.mxu1 %v5516_v30  ;;  %v5544_v30 = vld [vmem:[#allocation8 + $0x60] ss:$12 sps:$4 sm:$0xff]  }
 0x169   :  { %1152 = vmatprep.subr.bf16.mxu1 %v5524_v33 }
 0x16c   :  { %1153 = vmatpush2.bf16.msra.mxu1 %v5522_v34  ;;  %v5552_v34 = vld [vmem:[#allocation8 + $0x4c] ss:$12 sps:$4 sm:$0xff]  }
 0x16d   :  { %2101 = vmatprep.subr.bf16.mxu1 %v5531_v37 }
 0x1ef   :  { %v476_v44 = vpop.f32.mrf.mxu1 }
 0x1f0   :  { %v477_v51 = vadd.f32 %v476_v44, %v6948_v46 }
 0x1f1   :  { %v478_v47 = vpop.f32.mrf.mxu1 }
 0x1f2   :  { %v479_v49 = vadd.f32 %v478_v47, %v6945_v45  ;;  %v555_v58 = vmax.f32 %v477_v51, 0.0  ;;  %v5550_v47 = vld [vmem:[#allocation8 + $0x48] ss:$12 sps:$4 sm:$0xff]  }
 0x1f3   :  { %v480_v48 = vpop.f32.mrf.mxu1  ;;  %v5558_v51 = vld [vmem:[#allocation8 + $0x34] ss:$12 sps:$4 sm:$0xff]  }
 0x1f4   :  { %v481_v50 = vadd.f32 %v480_v48, %v6948_v46  ;;  %v556_v56 = vmax.f32 %v479_v49, 0.0  ;;  %v5553_v48 = vld [vmem:[#allocation8 + $0x1c8] ss:$12 sps:$4 sm:$0xff]  }
 0x1f5   :  { %v482_v52 = vpop.f32.mrf.mxu1 }
 0x1f6   :  { %v483_v53 = vadd.f32 %v482_v52, %v6945_v45  ;;  %v557_v54 = vmax.f32 %v481_v50, 0.0  ;;  %v5561_v52 = vld [vmem:[#allocation8 + $0x1b4] ss:$12 sps:$4 sm:$0xff]  }
 0x1f7   :  { %v486_v55 = vpop.f32.mrf.mxu1 }
 0x1f8   :  { %v558_v57 = vmax.f32 %v483_v53, 0.0  ;;  %v587_v63 = vpack.c.bf16 %v557_v54, %v555_v58  ;;  %v487_v5 = vadd.f32 %v486_v55, %v6948_v46  ;;  %v5556_v58 = vld [vmem:[#allocation8 + $0x30] ss:$12 sps:$4 sm:$0xff]  }
 0x1f9   :  { %v488_v59 = vpop.f32.mrf.mxu1 }
 0x1fa   :  { %v588_v60 = vpack.c.bf16 %v558_v57, %v556_v56  ;;  %v489_v3 = vadd.f32 %v488_v59, %v6945_v45  ;;  %v559_v17 = vmax.f32 %v487_v5, 0.0  ;;  %v5559_v59 = vld [vmem:[#allocation8 + $0x1b0] ss:$12 sps:$4 sm:$0xff]   ;;  %v5562_v5 = vld [vmem:[#allocation8 + $0x18] ss:$12 sps:$4 sm:$0xff]  }
 0x1fb   :  { %v490_v0 = vpop.f32.mrf.mxu1 }
 0x1fc   :  { %v491_v4 = vadd.f32 %v490_v0, %v6948_v46  ;;  %1041 = vmatprep.mubr.bf16.mxu0 %v588_v60  ;;  %1154 = vmatprep.mubr.bf16.mxu1 %v588_v60  ;;  %v560_v15 = vmax.f32 %v489_v3, 0.0 }
 0x1fd   :  { %v492_v6 = vpop.f32.mrf.mxu1  ;;  %1042 = vmatmul.mubr.bf16.vlgmr.msra.gmra.mxu0 %v587_v63  ;;  %1155 = vmatmul.mubr.bf16.vlgmr.msra.gmra.mxu1 %v587_v63  ;;  %v5567_v63 = vld [vmem:[#allocation8 + $0x19c] ss:$12 sps:$4 sm:$0xff]  }
 0x1fe   :  { %v493_v8 = vadd.f32 %v492_v6, %v6945_v45  ;;  %1989 = vmatpush1.bf16.msra.mxu0 %v5526_v61  ;;  %2102 = vmatpush1.bf16.msra.mxu1 %v5529_v62  ;;  %v561_v11 = vmax.f32 %v491_v4, 0.0  ;;  %v5564_v62 = vld [vmem:[#allocation8 + $0x1c] ss:$12 sps:$4 sm:$0xff]   ;;  %v5565_v6 = vld [vmem:[#allocation8 + $0x198] ss:$12 sps:$4 sm:$0xff]  }
 0x1ff   :  { %v496_v12 = vpop.f32.mrf.mxu1  ;;  %1990 = vmatprep.subr.bf16.mxu0 %v5534_v1  ;;  %2103 = vmatprep.subr.bf16.mxu1 %v5537_v2 }
 0x200   :  { %v562_v16 = vmax.f32 %v493_v8, 0.0  ;;  %v589_v22 = vpack.c.bf16 %v561_v11, %v559_v17  ;;  %v497_v28 = vadd.f32 %v496_v12, %v6948_v46  ;;  %v5573_v11 = vld [vmem:[#allocation8 + $0x184] ss:$12 sps:$4 sm:$0xff]   ;;  %v5568_v17 = vld [vmem:[#allocation8] ss:$12 sps:$4 sm:$0xff]  }
 0x201   :  { %v498_v18 = vpop.f32.mrf.mxu1 }
 0x202   :  { %v590_v19 = vpack.c.bf16 %v562_v16, %v560_v15  ;;  %1991 = vmatpush1.bf16.msra.mxu0 %v5532_v9  ;;  %2104 = vmatpush1.bf16.msra.mxu1 %v5535_v10  ;;  %v499_v26 = vadd.f32 %v498_v18, %v6945_v45  ;;  %v563_v38 = vmax.f32 %v497_v28, 0.0  ;;  %v5570_v10 = vld [vmem:[#allocation8 + $0x4] ss:$12 sps:$4 sm:$0xff]   ;;  %v5571_v18 = vld [vmem:[#allocation8 + $0x180] ss:$12 sps:$4 sm:$0xff]  }
 0x203   :  { %v500_v23 = vpop.f32.mrf.mxu1  ;;  %1992 = vmatprep.subr.bf16.mxu0 %v5540_v13  ;;  %2105 = vmatprep.subr.bf16.mxu1 %v5543_v14  ;;  %v5574_v28 = vld [vmem:[#allocation8 + $0x168] ss:$12 sps:$4 sm:$0xff]  }
 0x204   :  { %v501_v27 = vadd.f32 %v500_v23, %v6948_v46  ;;  %1051 = vmatprep.mubr.bf16.mxu0 %v590_v19  ;;  %1164 = vmatprep.mubr.bf16.mxu1 %v590_v19  ;;  %v564_v36 = vmax.f32 %v499_v26, 0.0 }
 0x205   :  { %v502_v29 = vpop.f32.mrf.mxu1  ;;  %1052 = vmatmul.mubr.bf16.gmra.mxu0 %v589_v22  ;;  %1165 = vmatmul.mubr.bf16.gmra.mxu1 %v589_v22  ;;  %v5579_v22 = vld [vmem:[#allocation8 + $0x2ec] ss:$12 sps:$4 sm:$0xff]  }
 0x206   :  { %v503_v7 = vadd.f32 %v502_v29, %v6945_v45  ;;  %1993 = vmatpush1.bf16.msra.mxu0 %v5538_v20  ;;  %2106 = vmatpush1.bf16.msra.mxu1 %v5541_v21  ;;  %v565_v32 = vmax.f32 %v501_v27, 0.0  ;;  %v5576_v21 = vld [vmem:[#allocation8 + $0x16c] ss:$12 sps:$4 sm:$0xff]   ;;  %v5577_v29 = vld [vmem:[#allocation8 + $0x2e8] ss:$12 sps:$4 sm:$0xff]  }
 0x207   :  { %v506_v33 = vpop.f32.mrf.mxu1  ;;  %1994 = vmatprep.subr.bf16.mxu0 %v5546_v24  ;;  %2107 = vmatprep.subr.bf16.mxu1 %v5549_v25 }
 0x208   :  { %v566_v37 = vmax.f32 %v503_v7, 0.0  ;;  %v591_v49 = vpack.c.bf16 %v565_v32, %v563_v38  ;;  %v507_v55 = vadd.f32 %v506_v33, %v6948_v46  ;;  %v5585_v32 = vld [vmem:[#allocation8 + $0x2d4] ss:$12 sps:$4 sm:$0xff]   ;;  %v5580_v38 = vld [vmem:[#allocation8 + $0x150] ss:$12 sps:$4 sm:$0xff]  }
 0x209   :  { %v508_v43 = vpop.f32.mrf.mxu1 }
 0x20a   :  { %v592_v44 = vpack.c.bf16 %v566_v37, %v564_v36  ;;  %1995 = vmatpush1.bf16.msra.mxu0 %v5544_v30  ;;  %2108 = vmatpush1.bf16.msra.mxu1 %v5547_v31  ;;  %v509_v53 = vadd.f32 %v508_v43, %v6945_v45  ;;  %v567_v2 = vmax.f32 %v507_v55, 0.0  ;;  %v5582_v31 = vld [vmem:[#allocation8 + $0x154] ss:$12 sps:$4 sm:$0xff]   ;;  %v5583_v43 = vld [vmem:[#allocation8 + $0x2d0] ss:$12 sps:$4 sm:$0xff]  }
 0x20b   :  { %v510_v50 = vpop.f32.mrf.mxu1  ;;  %1996 = vmatprep.subr.bf16.mxu0 %v5552_v34  ;;  %2109 = vmatprep.subr.bf16.mxu1 %v5555_v35  ;;  %v5586_v55 = vld [vmem:[#allocation8 + $0x138] ss:$12 sps:$4 sm:$0xff]  }
 0x20c   :  { %v511_v54 = vadd.f32 %v510_v50, %v6948_v46  ;;  %1061 = vmatprep.mubr.bf16.mxu0 %v592_v44  ;;  %1174 = vmatprep.mubr.bf16.mxu1 %v592_v44  ;;  %v568_v0 = vmax.f32 %v509_v53, 0.0 }
 0x20d   :  { %v512_v56 = vpop.f32.mrf.mxu1  ;;  %1062 = vmatmul.mubr.bf16.gmra.mxu0 %v591_v49  ;;  %1175 = vmatmul.mubr.bf16.gmra.mxu1 %v591_v49  ;;  %v5591_v49 = vld [vmem:[#allocation8 + $0x2bc] ss:$12 sps:$4 sm:$0xff]  }
 0x20e   :  { %v513_v57 = vadd.f32 %v512_v56, %v6945_v45  ;;  %1997 = vmatpush1.bf16.msra.mxu0 %v5550_v47  ;;  %2110 = vmatpush1.bf16.msra.mxu1 %v5553_v48  ;;  %v569_v60 = vmax.f32 %v511_v54, 0.0  ;;  %v5588_v48 = vld [vmem:[#allocation8 + $0x13c] ss:$12 sps:$4 sm:$0xff]   ;;  %v5589_v56 = vld [vmem:[#allocation8 + $0x2b8] ss:$12 sps:$4 sm:$0xff]  }
 0x20f   :  { %v516_v61 = vpop.f32.mrf.mxu1  ;;  %1998 = vmatprep.subr.bf16.mxu0 %v5558_v51  ;;  %2111 = vmatprep.subr.bf16.mxu1 %v5561_v52 }
 0x210   :  { %v570_v1 = vmax.f32 %v513_v57, 0.0  ;;  %v593_v8 = vpack.c.bf16 %v569_v60, %v567_v2  ;;  %v517_v14 = vadd.f32 %v516_v61, %v6948_v46  ;;  %v5597_v60 = vld [vmem:[#allocation8 + $0x2a4] ss:$12 sps:$4 sm:$0xff]   ;;  %v5592_v2 = vld [vmem:[#allocation8 + $0x120] ss:$12 sps:$4 sm:$0xff]  }
 0x211   :  { %v518_v3 = vpop.f32.mrf.mxu1 }
 0x212   :  { %v594_v4 = vpack.c.bf16 %v570_v1, %v568_v0  ;;  %1999 = vmatpush1.bf16.msra.mxu0 %v5556_v58  ;;  %2112 = vmatpush1.bf16.msra.mxu1 %v5559_v59  ;;  %v519_v12 = vadd.f32 %v518_v3, %v6945_v45  ;;  %v571_v25 = vmax.f32 %v517_v14, 0.0  ;;  %v5594_v59 = vld [vmem:[#allocation8 + $0x124] ss:$12 sps:$4 sm:$0xff]   ;;  %v5595_v3 = vld [vmem:[#allocation8 + $0x2a0] ss:$12 sps:$4 sm:$0xff]  }
 0x213   :  { %v520_v9 = vpop.f32.mrf.mxu1  ;;  %2000 = vmatprep.subr.bf16.mxu0 %v5564_v62  ;;  %2113 = vmatprep.subr.bf16.mxu1 %v5567_v63  ;;  %v5598_v14 = vld [vmem:[#allocation8 + $0x108] ss:$12 sps:$4 sm:$0xff]  }
 0x214   :  { %v521_v13 = vadd.f32 %v520_v9, %v6948_v46  ;;  %1071 = vmatprep.mubr.bf16.mxu0 %v594_v4  ;;  %1184 = vmatprep.mubr.bf16.mxu1 %v594_v4  ;;  %v572_v23 = vmax.f32 %v519_v12, 0.0 }
 0x215   :  { %v522_v15 = vpop.f32.mrf.mxu1  ;;  %1072 = vmatmul.mubr.bf16.gmra.mxu0 %v593_v8  ;;  %1185 = vmatmul.mubr.bf16.gmra.mxu1 %v593_v8  ;;  %v5603_v8 = vld [vmem:[#allocation8 + $0x28c] ss:$12 sps:$4 sm:$0xff]  }
 0x216   :  { %v523_v16 = vadd.f32 %v522_v15, %v6945_v45  ;;  %2001 = vmatpush1.bf16.msra.mxu0 %v5562_v5  ;;  %2114 = vmatpush1.bf16.msra.mxu1 %v5565_v6  ;;  %v573_v19 = vmax.f32 %v521_v13, 0.0  ;;  %v5600_v6 = vld [vmem:[#allocation8 + $0x10c] ss:$12 sps:$4 sm:$0xff]   ;;  %v5601_v15 = vld [vmem:[#allocation8 + $0x288] ss:$12 sps:$4 sm:$0xff]  }
 0x217   :  { %v526_v20 = vpop.f32.mrf.mxu1  ;;  %2002 = vmatprep.subr.bf16.mxu0 %v5570_v10  ;;  %2115 = vmatprep.subr.bf16.mxu1 %v5573_v11 }
 0x218   :  { %v574_v24 = vmax.f32 %v523_v16, 0.0  ;;  %v595_v7 = vpack.c.bf16 %v573_v19, %v571_v25  ;;  %v527_v35 = vadd.f32 %v526_v20, %v6948_v46 }
 0x219   :  { %v528_v26 = vpop.f32.mrf.mxu1 }
 0x21a   :  { %v596_v27 = vpack.c.bf16 %v574_v24, %v572_v23  ;;  %2003 = vmatpush1.bf16.msra.mxu0 %v5568_v17  ;;  %2116 = vmatpush1.bf16.msra.mxu1 %v5571_v18  ;;  %v529_v33 = vadd.f32 %v528_v26, %v6945_v45  ;;  %v575_v52 = vmax.f32 %v527_v35, 0.0  ;;  %v5621_v35 = vld [vmem:[#allocation8 + $0x244] ss:$12 sps:$4 sm:$0xff]  }
 0x21b   :  { %v530_v30 = vpop.f32.mrf.mxu1  ;;  %2004 = vmatprep.subr.bf16.mxu0 %v5576_v21  ;;  %2117 = vmatprep.subr.bf16.mxu1 %v5579_v22 }
 0x21c   :  { %v531_v34 = vadd.f32 %v530_v30, %v6948_v46  ;;  %1081 = vmatprep.mubr.bf16.mxu0 %v596_v27  ;;  %1194 = vmatprep.mubr.bf16.mxu1 %v596_v27  ;;  %v576_v50 = vmax.f32 %v529_v33, 0.0  ;;  %v5607_v30 = vld [vmem:[#allocation8 + $0x270] ss:$12 sps:$4 sm:$0xff]   ;;  %v5613_v33 = vld [vmem:[#allocation8 + $0x258] ss:$12 sps:$4 sm:$0xff]  }
 0x21d   :  { %v532_v36 = vpop.f32.mrf.mxu1  ;;  %1082 = vmatmul.mubr.bf16.gmra.mxu0 %v595_v7  ;;  %1195 = vmatmul.mubr.bf16.gmra.mxu1 %v595_v7  ;;  %v5609_v7 = vld [vmem:[#allocation8 + $0x274] ss:$12 sps:$4 sm:$0xff]  }
 0x21e   :  { %v533_v37 = vadd.f32 %v532_v36, %v6945_v45  ;;  %2005 = vmatpush2.bf16.msra.mxu0 %v5574_v28  ;;  %2118 = vmatpush2.bf16.msra.mxu1 %v5577_v29  ;;  %v577_v44 = vmax.f32 %v531_v34, 0.0  ;;  %v5606_v29 = vld [vmem:[#allocation8 + $0xf4] ss:$12 sps:$4 sm:$0xff]   ;;  %v5618_v34 = vld [vmem:[#allocation8 + $0xc4] ss:$12 sps:$4 sm:$0xff]  }
 0x21f   :  { %v536_v47 = vpop.f32.mrf.mxu1  ;;  %2006 = vmatprep.subr.bf16.mxu0 %v5582_v31  ;;  %2119 = vmatprep.subr.bf16.mxu1 %v5585_v32  ;;  %v5615_v31 = vld [vmem:[#allocation8 + $0x25c] ss:$12 sps:$4 sm:$0xff]   ;;  %v5610_v32 = vld [vmem:[#allocation8 + $0xd8] ss:$12 sps:$4 sm:$0xff]   ;;  %v5616_v36 = vld [vmem:[#allocation8 + $0xc0] ss:$12 sps:$4 sm:$0xff]  }
 0x220   :  { %v578_v51 = vmax.f32 %v533_v37, 0.0  ;;  %v597_v57 = vpack.c.bf16 %v577_v44, %v575_v52  ;;  %v537_v63 = vadd.f32 %v536_v47, %v6948_v46  ;;  %v5619_v37 = vld [vmem:[#allocation8 + $0x240] ss:$12 sps:$4 sm:$0xff]   ;;  %v683_v44 = vsub.s32 3, %v6936_v39 }
 0x221   :  { %v538_v53 = vpop.f32.mrf.mxu1  ;;  %v6984_v47 = vsub.s32 2, %v6936_v39 }
 0x222   :  { %v598_v54 = vpack.c.bf16 %v578_v51, %v576_v50  ;;  %2007 = vmatpush2.bf16.msra.mxu0 %v5580_v38  ;;  %2120 = vmatpush2.bf16.msra.mxu1 %v5583_v43  ;;  %v539_v61 = vadd.f32 %v538_v53, %v6945_v45  ;;  %v579_v11 = vmax.f32 %v537_v63, 0.0  ;;  %v5622_v38 = vld [vmem:[#allocation8 + $0x170] ss:$12 sps:$4 sm:$0xff]  }
 0x223   :  { %v540_v58 = vpop.f32.mrf.mxu1  ;;  %2008 = vmatprep.subr.bf16.mxu0 %v5588_v48  ;;  %2121 = vmatprep.subr.bf16.mxu1 %v5591_v49  ;;  %v5624_v43 = vld [vmem:[#allocation8 + $0x2f0] ss:$12 sps:$4 sm:$0xff]  }
 0x224   :  { %v541_v62 = vadd.f32 %v540_v58, %v6948_v46  ;;  %1091 = vmatprep.mubr.bf16.mxu0 %v598_v54  ;;  %1204 = vmatprep.mubr.bf16.mxu1 %v598_v54  ;;  %v580_v9 = vmax.f32 %v539_v61, 0.0  ;;  %v667_v48 = vld [vmem:[%s7756_s6] sm:$0xf] }
 0x225   :  { %v542_v0 = vpop.f32.mrf.mxu1  ;;  %1092 = vmatmul.mubr.bf16.gmra.mxu0 %v597_v57  ;;  %1205 = vmatmul.mubr.bf16.gmra.mxu1 %v597_v57  ;;  %v6990_v51 = vrot.slane %v667_v48, %v6939_v40  ;;  %v6992_v52 = vrot.slane %v667_v48, %v683_v44  ;;  %v6995_v53 = vrot.slane %v667_v48, %v6942_v42  ;;  %v5630_v44 = vld [vmem:[#allocation8 + $0x140] ss:$12 sps:$4 sm:$0xff]  }
 0x226   :  { %v543_v1 = vadd.f32 %v542_v0, %v6945_v45  ;;  %2009 = vmatpush2.bf16.msra.mxu0 %v5586_v55  ;;  %2122 = vmatpush2.bf16.msra.mxu1 %v5589_v56  ;;  %v581_v4 = vmax.f32 %v541_v62, 0.0  ;;  %v6998_v54 = vrot.slane %v667_v48, %v6984_v47 }
 0x227   :  { %v546_v5 = vpop.f32.mrf.mxu1  ;;  %2010 = vmatprep.subr.bf16.mxu0 %v5594_v59  ;;  %2123 = vmatprep.subr.bf16.mxu1 %v5597_v60 }
 0x228   :  { %v582_v10 = vmax.f32 %v543_v1, 0.0  ;;  %v599_v16 = vpack.c.bf16 %v581_v4, %v579_v11  ;;  %v547_v20 = vadd.f32 %v546_v5, %v6948_v46 }
 0x229   :  { %v548_v12 = vpop.f32.mrf.mxu1 }
 0x22a   :  { %v600_v13 = vpack.c.bf16 %v582_v10, %v580_v9  ;;  %2011 = vmatpush2.bf16.msra.mxu0 %v5592_v2  ;;  %2124 = vmatpush2.bf16.msra.mxu1 %v5595_v3  ;;  %v549_v18 = vadd.f32 %v548_v12, %v6945_v45  ;;  %v583_v26 = vmax.f32 %v547_v20, 0.0  ;;  %v5625_v20 = vld [vmem:[#allocation8 + $0x230] ss:$12 sps:$4 sm:$0xff]  }
 0x22b   :  { %v550_v17 = vpop.f32.mrf.mxu1  ;;  %2012 = vmatprep.subr.bf16.mxu0 %v5600_v6  ;;  %2125 = vmatprep.subr.bf16.mxu1 %v5603_v8 }
 0x22c   :  { %v551_v19 = vadd.f32 %v550_v17, %v6948_v46  ;;  %1101 = vmatprep.mubr.bf16.mxu0 %v600_v13  ;;  %1214 = vmatprep.mubr.bf16.mxu1 %v600_v13  ;;  %v584_v24 = vmax.f32 %v549_v18, 0.0  ;;  %v5604_v46 = vld [vmem:[#allocation8 + $0xf0] ss:$12 sps:$4 sm:$0xff]  }
 0x22d   :  { %v552_v21 = vpop.f32.mrf.mxu1  ;;  %1102 = vmatmul.mubr.bf16.gmra.mxu0 %v599_v16  ;;  %1215 = vmatmul.mubr.bf16.gmra.mxu1 %v599_v16 }
 0x22e   :  { %v553_v22 = vadd.f32 %v552_v21, %v6945_v45  ;;  %2013 = vmatpush2.bf16.msra.mxu0 %v5598_v14  ;;  %2126 = vmatpush2.bf16.msra.mxu1 %v5601_v15  ;;  %v585_v23 = vmax.f32 %v551_v19, 0.0  ;;  %v5612_v45 = vld [vmem:[#allocation8 + $0xdc] ss:$12 sps:$4 sm:$0xff]  }
 0x22f   :  { %2014 = vmatprep.subr.bf16.mxu0 %v5606_v29  ;;  %2127 = vmatprep.subr.bf16.mxu1 %v5609_v7  ;;  %v5623_v19 = vld [vmem:[#allocation8 + $0xb0] ss:$12 sps:$4 sm:$0xff]  }
 0x230   :  { %v586_v25 = vmax.f32 %v553_v22, 0.0  ;;  %v601_v28 = vpack.c.bf16 %v585_v23, %v583_v26  ;;  %v5626_v26 = vld [vmem:[#allocation8 + $0x158] ss:$12 sps:$4 sm:$0xff]  }
 0x232   :  { %v602_v27 = vpack.c.bf16 %v586_v25, %v584_v24  ;;  %2015 = vmatpush2.bf16.msra.mxu0 %v5604_v46  ;;  %2128 = vmatpush2.bf16.msra.mxu1 %v5607_v30 }
 0x233   :  { %2016 = vmatprep.subr.bf16.mxu0 %v5612_v45  ;;  %2129 = vmatprep.subr.bf16.mxu1 %v5615_v31 }
 0x234   :  { %1111 = vmatprep.mubr.bf16.mxu0 %v602_v27  ;;  %1224 = vmatprep.mubr.bf16.mxu1 %v602_v27  ;;  %v5628_v27 = vld [vmem:[#allocation8 + $0x2d8] ss:$12 sps:$4 sm:$0xff]  }
 0x235   :  { %1112 = vmatmul.mubr.bf16.gmra.mxu0 %v601_v28  ;;  %1225 = vmatmul.mubr.bf16.gmra.mxu1 %v601_v28 }
 0x236   :  { %2017 = vmatpush2.bf16.msra.mxu0 %v5610_v32  ;;  %2130 = vmatpush2.bf16.msra.mxu1 %v5613_v33 }
 0x237   :  { %2018 = vmatprep.subr.bf16.mxu0 %v5618_v34  ;;  %2131 = vmatprep.subr.bf16.mxu1 %v5621_v35  ;;  %v5627_v34 = vld [vmem:[#allocation8 + $0x98] ss:$12 sps:$4 sm:$0xff]  }
 0x23a   :  { %2019 = vmatpush2.bf16.msra.mxu0 %v5616_v36  ;;  %2132 = vmatpush2.bf16.msra.mxu1 %v5619_v37 }
 0x23b   :  { %5072 = vmatprep.subr.bf16.mxu0 %v5622_v38  ;;  %5136 = vmatprep.subr.bf16.mxu1 %v5624_v43  ;;  %v5629_v43 = vld [vmem:[#allocation8 + $0x218] ss:$12 sps:$4 sm:$0xff]  }
 0x2bd   :  { %v1043_v49 = vpop.f32.mrf.mxu0  ;;  %v1156_v50 = vpop.f32.mrf.mxu1 }
 0x2be   :  { %v1044_v62 = vadd.f32 %v1043_v49, %v6995_v53  ;;  %v1157_v63 = vadd.f32 %v1156_v50, %v6998_v54 }
 0x2bf   :  { %v1045_v55 = vpop.f32.mrf.mxu0  ;;  %v1158_v39 = vpop.f32.mrf.mxu1 }
 0x2c0   :  { %v1046_v58 = vadd.f32 %v1045_v55, %v6990_v51  ;;  %v1159_v59 = vadd.f32 %v1158_v39, %v6992_v52  ;;  %v1235_v13 = vmax.f32 %v1044_v62, 0.0  ;;  %v1237_v14 = vmax.f32 %v1157_v63, 0.0  ;;  %v5632_v62 = vld [vmem:[#allocation8 + $0x2c0] ss:$12 sps:$4 sm:$0xff]  }
 0x2c1   :  { %v1047_v56 = vpop.f32.mrf.mxu0  ;;  %v1160_v57 = vpop.f32.mrf.mxu1 }
 0x2c2   :  { %v1048_v60 = vadd.f32 %v1047_v56, %v6995_v53  ;;  %v1161_v61 = vadd.f32 %v1160_v57, %v6998_v54  ;;  %v1236_v9 = vmax.f32 %v1046_v58, 0.0  ;;  %v1238_v10 = vmax.f32 %v1159_v59, 0.0 }
 0x2c3   :  { %v1049_v0 = vpop.f32.mrf.mxu0  ;;  %v1162_v1 = vpop.f32.mrf.mxu1 }
 0x2c4   :  { %v1050_v2 = vadd.f32 %v1049_v0, %v6990_v51  ;;  %v1163_v3 = vadd.f32 %v1162_v1, %v6992_v52  ;;  %v1239_v4 = vmax.f32 %v1048_v60, 0.0  ;;  %v1241_v5 = vmax.f32 %v1161_v61, 0.0  ;;  %v5631_v61 = vld [vmem:[#allocation8 + $0x80] ss:$12 sps:$4 sm:$0xff]  }
 0x2c5   :  { %v1053_v6 = vpop.f32.mrf.mxu0  ;;  %v1166_v8 = vpop.f32.mrf.mxu1 }
 0x2c6   :  { %v1240_v11 = vmax.f32 %v1050_v2, 0.0  ;;  %v1242_v12 = vmax.f32 %v1163_v3, 0.0  ;;  %v7012_v21 = vpack.c.bf16 %v1239_v4, %v1235_v13  ;;  %v7014_v22 = vpack.c.bf16 %v1241_v5, %v1237_v14  ;;  %v5633_v4 = vld [vmem:[#allocation8 + $0x200] ss:$12 sps:$4 sm:$0xff]   ;;  %v5634_v5 = vld [vmem:[#allocation8 + $0x128] ss:$12 sps:$4 sm:$0xff]  }
 0x2c7   :  { %v1055_v15 = vpop.f32.mrf.mxu0  ;;  %v1168_v16 = vpop.f32.mrf.mxu1  ;;  %v1054_v46 = vadd.f32 %v1053_v6, %v6995_v53  ;;  %v1167_v30 = vadd.f32 %v1166_v8, %v6998_v54 }
 0x2c8   :  { %v7008_v17 = vpack.c.bf16 %v1240_v11, %v1236_v9  ;;  %v7010_v18 = vpack.c.bf16 %v1242_v12, %v1238_v10  ;;  %v1056_v23 = vadd.f32 %v1055_v15, %v6990_v51  ;;  %v1169_v28 = vadd.f32 %v1168_v16, %v6992_v52  ;;  %v5636_v10 = vld [vmem:[#allocation8 + $0x2a8] ss:$12 sps:$4 sm:$0xff]  }
 0x2c9   :  { %v1057_v24 = vpop.f32.mrf.mxu0  ;;  %v1170_v25 = vpop.f32.mrf.mxu1  ;;  %v1243_v39 = vmax.f32 %v1054_v46, 0.0  ;;  %v1245_v56 = vmax.f32 %v1167_v30, 0.0 }
 0x2ca   :  { %v1058_v29 = vadd.f32 %v1057_v24, %v6995_v53  ;;  %v1171_v7 = vadd.f32 %v1170_v25, %v6998_v54  ;;  %2020 = vmatprep.mubr.bf16.mxu0 %v7008_v17  ;;  %2133 = vmatprep.mubr.bf16.mxu1 %v7010_v18  ;;  %v1244_v48 = vmax.f32 %v1056_v23, 0.0  ;;  %v1246_v49 = vmax.f32 %v1169_v28, 0.0 }
 0x2cb   :  { %v1059_v45 = vpop.f32.mrf.mxu0  ;;  %v1172_v31 = vpop.f32.mrf.mxu1  ;;  %2021 = vmatmul.mubr.bf16.vlgmr.msra.gmra.mxu0 %v7012_v21  ;;  %2134 = vmatmul.mubr.bf16.vlgmr.msra.gmra.mxu1 %v7014_v22 }
 0x2cc   :  { %v1060_v32 = vadd.f32 %v1059_v45, %v6990_v51  ;;  %v1173_v33 = vadd.f32 %v1172_v31, %v6992_v52  ;;  %5073 = vmatpush3.bf16.msra.mxu0 %v5623_v19  ;;  %5137 = vmatpush3.bf16.msra.mxu1 %v5625_v20  ;;  %v1247_v35 = vmax.f32 %v1058_v29, 0.0  ;;  %v1249_v36 = vmax.f32 %v1171_v7, 0.0  ;;  %v5635_v19 = vld [vmem:[#allocation8 + $0x68] ss:$12 sps:$4 sm:$0xff]  }
 0x2cd   :  { %v1063_v37 = vpop.f32.mrf.mxu0  ;;  %v1176_v38 = vpop.f32.mrf.mxu1  ;;  %5074 = vmatprep.subr.bf16.mxu0 %v5626_v26  ;;  %5138 = vmatprep.subr.bf16.mxu1 %v5628_v27  ;;  %v5637_v26 = vld [vmem:[#allocation8 + $0x1e8] ss:$12 sps:$4 sm:$0xff]   ;;  %v5638_v27 = vld [vmem:[#allocation8 + $0x110] ss:$12 sps:$4 sm:$0xff]  }
 0x2ce   :  { %v1248_v50 = vmax.f32 %v1060_v32, 0.0  ;;  %v1250_v55 = vmax.f32 %v1173_v33, 0.0  ;;  %v7032_v63 = vpack.c.bf16 %v1247_v35, %v1243_v39  ;;  %v7034_v0 = vpack.c.bf16 %v1249_v36, %v1245_v56  ;;  %v5639_v35 = vld [vmem:[#allocation8 + $0x50] ss:$12 sps:$4 sm:$0xff]  }
 0x2cf   :  { %v1065_v57 = vpop.f32.mrf.mxu0  ;;  %v1178_v58 = vpop.f32.mrf.mxu1  ;;  %v1064_v11 = vadd.f32 %v1063_v37, %v6995_v53  ;;  %v1177_v12 = vadd.f32 %v1176_v38, %v6998_v54  ;;  %v5640_v36 = vld [vmem:[#allocation8 + $0x290] ss:$12 sps:$4 sm:$0xff]  }
 0x2d0   :  { %v7028_v59 = vpack.c.bf16 %v1248_v50, %v1244_v48  ;;  %v7030_v60 = vpack.c.bf16 %v1250_v55, %v1246_v49  ;;  %5075 = vmatpush3.bf16.msra.mxu0 %v5627_v34  ;;  %v1066_v1 = vadd.f32 %v1065_v57, %v6990_v51  ;;  %5139 = vmatpush3.bf16.msra.mxu1 %v5629_v43  ;;  %v5641_v49 = vld [vmem:[#allocation8 + $0x1d0] ss:$12 sps:$4 sm:$0xff]   ;;  %v5642_v50 = vld [vmem:[#allocation8 + $0xf8] ss:$12 sps:$4 sm:$0xff]  }
 0x2d1   :  { %v1067_v2 = vpop.f32.mrf.mxu0  ;;  %v1180_v3 = vpop.f32.mrf.mxu1  ;;  %5076 = vmatprep.subr.bf16.mxu0 %v5630_v44  ;;  %v1179_v6 = vadd.f32 %v1178_v58, %v6992_v52  ;;  %5140 = vmatprep.subr.bf16.mxu1 %v5632_v62  ;;  %v1251_v30 = vmax.f32 %v1064_v11, 0.0  ;;  %v1253_v45 = vmax.f32 %v1177_v12, 0.0  ;;  %v5644_v57 = vld [vmem:[#allocation8 + $0x278] ss:$12 sps:$4 sm:$0xff]   ;;  %v5646_v11 = vld [vmem:[#allocation8 + $0xe0] ss:$12 sps:$4 sm:$0xff]  }
 0x2d2   :  { %v1068_v8 = vadd.f32 %v1067_v2, %v6995_v53  ;;  %v1181_v9 = vadd.f32 %v1180_v3, %v6998_v54  ;;  %2030 = vmatprep.mubr.bf16.mxu0 %v7028_v59  ;;  %2143 = vmatprep.mubr.bf16.mxu1 %v7030_v60  ;;  %v1252_v28 = vmax.f32 %v1066_v1, 0.0 }
 0x2d3   :  { %v1069_v13 = vpop.f32.mrf.mxu0  ;;  %v1182_v14 = vpop.f32.mrf.mxu1  ;;  %2031 = vmatmul.mubr.bf16.gmra.mxu0 %v7032_v63  ;;  %2144 = vmatmul.mubr.bf16.gmra.mxu1 %v7034_v0  ;;  %v1254_v29 = vmax.f32 %v1179_v6, 0.0 }
 0x2d4   :  { %v1070_v15 = vadd.f32 %v1069_v13, %v6990_v51  ;;  %v1183_v16 = vadd.f32 %v1182_v14, %v6992_v52  ;;  %5077 = vmatpush3.bf16.msra.mxu0 %v5631_v61  ;;  %v1255_v20 = vmax.f32 %v1068_v8, 0.0  ;;  %v1257_v23 = vmax.f32 %v1181_v9, 0.0  ;;  %5141 = vmatpush3.bf16.msra.mxu1 %v5633_v4  ;;  %v5643_v4 = vld [vmem:[#allocation8 + $0x38] ss:$12 sps:$4 sm:$0xff]  }
 0x2d5   :  { %v1073_v24 = vpop.f32.mrf.mxu0  ;;  %v1186_v25 = vpop.f32.mrf.mxu1  ;;  %5078 = vmatprep.subr.bf16.mxu0 %v5634_v5  ;;  %5142 = vmatprep.subr.bf16.mxu1 %v5636_v10  ;;  %v5645_v10 = vld [vmem:[#allocation8 + $0x1b8] ss:$12 sps:$4 sm:$0xff]  }
 0x2d6   :  { %v1256_v7 = vmax.f32 %v1070_v15, 0.0  ;;  %v1258_v46 = vmax.f32 %v1183_v16, 0.0  ;;  %v7052_v37 = vpack.c.bf16 %v1255_v20, %v1251_v30  ;;  %v7054_v38 = vpack.c.bf16 %v1257_v23, %v1253_v45  ;;  %v5649_v45 = vld [vmem:[#allocation8 + $0x1a0] ss:$12 sps:$4 sm:$0xff]  }
 0x2d7   :  { %v1075_v31 = vpop.f32.mrf.mxu0  ;;  %v1188_v32 = vpop.f32.mrf.mxu1  ;;  %v1074_v58 = vadd.f32 %v1073_v24, %v6995_v53  ;;  %v1187_v61 = vadd.f32 %v1186_v25, %v6998_v54 }
 0x2d8   :  { %v7048_v33 = vpack.c.bf16 %v1256_v7, %v1252_v28  ;;  %v7050_v34 = vpack.c.bf16 %v1258_v46, %v1254_v29  ;;  %5079 = vmatpush3.bf16.msra.mxu0 %v5635_v19  ;;  %v1076_v43 = vadd.f32 %v1075_v31, %v6990_v51  ;;  %5143 = vmatpush3.bf16.msra.mxu1 %v5637_v26  ;;  %v5647_v26 = vld [vmem:[#allocation8 + $0x20] ss:$12 sps:$4 sm:$0xff]   ;;  %v5650_v31 = vld [vmem:[#allocation8 + $0xc8] ss:$12 sps:$4 sm:$0xff]  }
 0x2d9   :  { %v1077_v44 = vpop.f32.mrf.mxu0  ;;  %v1190_v48 = vpop.f32.mrf.mxu1  ;;  %5080 = vmatprep.subr.bf16.mxu0 %v5638_v27  ;;  %v1189_v55 = vadd.f32 %v1188_v32, %v6992_v52  ;;  %5144 = vmatprep.subr.bf16.mxu1 %v5640_v36  ;;  %v1259_v16 = vmax.f32 %v1074_v58, 0.0  ;;  %v1261_v19 = vmax.f32 %v1187_v61, 0.0  ;;  %v5648_v27 = vld [vmem:[#allocation8 + $0x260] ss:$12 sps:$4 sm:$0xff]  }
 0x2da   :  { %v1078_v39 = vadd.f32 %v1077_v44, %v6995_v53  ;;  %v1191_v56 = vadd.f32 %v1190_v48, %v6998_v54  ;;  %2040 = vmatprep.mubr.bf16.mxu0 %v7048_v33  ;;  %2153 = vmatprep.mubr.bf16.mxu1 %v7050_v34  ;;  %v1260_v12 = vmax.f32 %v1076_v43, 0.0  ;;  %v5652_v43 = vld [vmem:[#allocation8 + $0x248] ss:$12 sps:$4 sm:$0xff]  }
 0x2db   :  { %v1079_v62 = vpop.f32.mrf.mxu0  ;;  %v1192_v1 = vpop.f32.mrf.mxu1  ;;  %2041 = vmatmul.mubr.bf16.gmra.mxu0 %v7052_v37  ;;  %2154 = vmatmul.mubr.bf16.gmra.mxu1 %v7054_v38  ;;  %v1262_v13 = vmax.f32 %v1189_v55, 0.0 }
 0x2dc   :  { %v1080_v2 = vadd.f32 %v1079_v62, %v6990_v51  ;;  %v1193_v3 = vadd.f32 %v1192_v1, %v6992_v52  ;;  %5081 = vmatpush3.bf16.msra.mxu0 %v5639_v35  ;;  %v1263_v5 = vmax.f32 %v1078_v39, 0.0  ;;  %v1265_v6 = vmax.f32 %v1191_v56, 0.0  ;;  %5145 = vmatpush3.bf16.msra.mxu1 %v5641_v49  ;;  %v5651_v56 = vld [vmem:[#allocation8 + $0x8] ss:$12 sps:$4 sm:$0xff]  }
 0x2dd   :  { %v1083_v8 = vpop.f32.mrf.mxu0  ;;  %v1196_v9 = vpop.f32.mrf.mxu1  ;;  %5082 = vmatprep.subr.bf16.mxu0 %v5642_v50  ;;  %5146 = vmatprep.subr.bf16.mxu1 %v5644_v57  ;;  %v5653_v1 = vld [vmem:[#allocation8 + $0x188] ss:$12 sps:$4 sm:$0xff]  }
 0x2de   :  { %v1264_v14 = vmax.f32 %v1080_v2, 0.0  ;;  %v1266_v15 = vmax.f32 %v1193_v3, 0.0  ;;  %v7072_v28 = vpack.c.bf16 %v1263_v5, %v1259_v16  ;;  %v7074_v29 = vpack.c.bf16 %v1265_v6, %v1261_v19 }
 0x2df   :  { %v1085_v20 = vpop.f32.mrf.mxu0  ;;  %v1198_v23 = vpop.f32.mrf.mxu1  ;;  %v1084_v44 = vadd.f32 %v1083_v8, %v6995_v53  ;;  %v1197_v48 = vadd.f32 %v1196_v9, %v6998_v54 }
 0x2e0   :  { %v7068_v24 = vpack.c.bf16 %v1264_v14, %v1260_v12  ;;  %v7070_v25 = vpack.c.bf16 %v1266_v15, %v1262_v13  ;;  %5083 = vmatpush3.bf16.msra.mxu0 %v5643_v4  ;;  %v1086_v7 = vadd.f32 %v1085_v20, %v6990_v51  ;;  %5147 = vmatpush3.bf16.msra.mxu1 %v5645_v10 }
 0x2e1   :  { %v1087_v46 = vpop.f32.mrf.mxu0  ;;  %v1200_v30 = vpop.f32.mrf.mxu1  ;;  %5084 = vmatprep.subr.bf16.mxu0 %v5646_v11  ;;  %v1199_v32 = vadd.f32 %v1198_v23, %v6992_v52  ;;  %5148 = vmatprep.subr.bf16.mxu1 %v5648_v27  ;;  %v1267_v6 = vmax.f32 %v1084_v44, 0.0  ;;  %v1269_v8 = vmax.f32 %v1197_v48, 0.0 }
 0x2e2   :  { %v1088_v35 = vadd.f32 %v1087_v46, %v6995_v53  ;;  %v1201_v36 = vadd.f32 %v1200_v30, %v6998_v54  ;;  %2050 = vmatprep.mubr.bf16.mxu0 %v7068_v24  ;;  %2163 = vmatprep.mubr.bf16.mxu1 %v7070_v25  ;;  %v1268_v2 = vmax.f32 %v1086_v7, 0.0 }
 0x2e3   :  { %v1089_v49 = vpop.f32.mrf.mxu0  ;;  %v1202_v50 = vpop.f32.mrf.mxu1  ;;  %2051 = vmatmul.mubr.bf16.gmra.mxu0 %v7072_v28  ;;  %2164 = vmatmul.mubr.bf16.gmra.mxu1 %v7074_v29  ;;  %v1270_v3 = vmax.f32 %v1199_v32, 0.0 }
 0x2e4   :  { %v1090_v55 = vadd.f32 %v1089_v49, %v6990_v51  ;;  %v1203_v39 = vadd.f32 %v1202_v50, %v6992_v52  ;;  %5085 = vmatpush3.bf16.msra.mxu0 %v5647_v26  ;;  %v1271_v57 = vmax.f32 %v1088_v35, 0.0  ;;  %v1273_v58 = vmax.f32 %v1201_v36, 0.0  ;;  %5149 = vmatpush3.bf16.msra.mxu1 %v5649_v45 }
 0x2e5   :  { %v1093_v61 = vpop.f32.mrf.mxu0  ;;  %v1206_v62 = vpop.f32.mrf.mxu1  ;;  %5086 = vmatprep.subr.bf16.mxu0 %v5650_v31  ;;  %5150 = vmatprep.subr.bf16.mxu1 %v5652_v43 }
 0x2e6   :  { %v1272_v4 = vmax.f32 %v1090_v55, 0.0  ;;  %v1274_v5 = vmax.f32 %v1203_v39, 0.0  ;;  %v7092_v13 = vpack.c.bf16 %v1271_v57, %v1267_v6  ;;  %v7094_v14 = vpack.c.bf16 %v1273_v58, %v1269_v8 }
 0x2e7   :  { %v1095_v9 = vpop.f32.mrf.mxu0  ;;  %v1208_v10 = vpop.f32.mrf.mxu1  ;;  %v1094_v27 = vadd.f32 %v1093_v61, %v6995_v53  ;;  %v1207_v7 = vadd.f32 %v1206_v62, %v6998_v54 }
 0x2e8   :  { %v7088_v11 = vpack.c.bf16 %v1272_v4, %v1268_v2  ;;  %v7090_v12 = vpack.c.bf16 %v1274_v5, %v1270_v3  ;;  %5087 = vmatpush3.bf16.msra.mxu0 %v5651_v56  ;;  %v1096_v15 = vadd.f32 %v1095_v9, %v6990_v51  ;;  %5151 = vmatpush3.bf16.msra.mxu1 %v5653_v1 }
 0x2e9   :  { %v1097_v16 = vpop.f32.mrf.mxu0  ;;  %v1210_v19 = vpop.f32.mrf.mxu1  ;;  %v1209_v20 = vadd.f32 %v1208_v10, %v6992_v52  ;;  %v1275_v55 = vmax.f32 %v1094_v27, 0.0  ;;  %v1277_v39 = vmax.f32 %v1207_v7, 0.0 }
 0x2ea   :  { %v1098_v23 = vadd.f32 %v1097_v16, %v6995_v53  ;;  %v1211_v26 = vadd.f32 %v1210_v19, %v6998_v54  ;;  %2060 = vmatprep.mubr.bf16.mxu0 %v7088_v11  ;;  %2173 = vmatprep.mubr.bf16.mxu1 %v7090_v12  ;;  %v1276_v44 = vmax.f32 %v1096_v15, 0.0 }
 0x2eb   :  { %v1099_v46 = vpop.f32.mrf.mxu0  ;;  %v1212_v30 = vpop.f32.mrf.mxu1  ;;  %2061 = vmatmul.mubr.bf16.gmra.mxu0 %v7092_v13  ;;  %2174 = vmatmul.mubr.bf16.gmra.mxu1 %v7094_v14  ;;  %v1278_v48 = vmax.f32 %v1209_v20, 0.0 }
 0x2ec   :  { %v1100_v45 = vadd.f32 %v1099_v46, %v6990_v51  ;;  %v1213_v31 = vadd.f32 %v1212_v30, %v6992_v52  ;;  %v1279_v32 = vmax.f32 %v1098_v23, 0.0  ;;  %v1281_v35 = vmax.f32 %v1211_v26, 0.0 }
 0x2ed   :  { %v1103_v36 = vpop.f32.mrf.mxu0  ;;  %v1216_v43 = vpop.f32.mrf.mxu1 }
 0x2ee   :  { %v1280_v49 = vmax.f32 %v1100_v45, 0.0  ;;  %v1282_v50 = vmax.f32 %v1213_v31, 0.0  ;;  %v7112_v62 = vpack.c.bf16 %v1279_v32, %v1275_v55  ;;  %v7114_v1 = vpack.c.bf16 %v1281_v35, %v1277_v39 }
 0x2ef   :  { %v1105_v56 = vpop.f32.mrf.mxu0  ;;  %v1218_v57 = vpop.f32.mrf.mxu1  ;;  %v1104_v9 = vadd.f32 %v1103_v36, %v6995_v53  ;;  %v1217_v10 = vadd.f32 %v1216_v43, %v6998_v54 }
 0x2f0   :  { %v7108_v58 = vpack.c.bf16 %v1280_v49, %v1276_v44  ;;  %v7110_v61 = vpack.c.bf16 %v1282_v50, %v1278_v48  ;;  %v1106_v2 = vadd.f32 %v1105_v56, %v6990_v51  ;;  %v1219_v5 = vadd.f32 %v1218_v57, %v6992_v52 }
 0x2f1   :  { %v1107_v3 = vpop.f32.mrf.mxu0  ;;  %v1220_v4 = vpop.f32.mrf.mxu1  ;;  %v1283_v32 = vmax.f32 %v1104_v9, 0.0  ;;  %v1285_v35 = vmax.f32 %v1217_v10, 0.0 }
 0x2f2   :  { %v1108_v6 = vadd.f32 %v1107_v3, %v6995_v53  ;;  %v1221_v8 = vadd.f32 %v1220_v4, %v6998_v54  ;;  %2070 = vmatprep.mubr.bf16.mxu0 %v7108_v58  ;;  %2183 = vmatprep.mubr.bf16.mxu1 %v7110_v61  ;;  %v1284_v46 = vmax.f32 %v1106_v2, 0.0  ;;  %v1286_v30 = vmax.f32 %v1219_v5, 0.0 }
 0x2f3   :  { %v1109_v15 = vpop.f32.mrf.mxu0  ;;  %v1222_v16 = vpop.f32.mrf.mxu1  ;;  %2071 = vmatmul.mubr.bf16.gmra.mxu0 %v7112_v62  ;;  %2184 = vmatmul.mubr.bf16.gmra.mxu1 %v7114_v1 }
 0x2f4   :  { %v1110_v19 = vadd.f32 %v1109_v15, %v6990_v51  ;;  %v1223_v20 = vadd.f32 %v1222_v16, %v6992_v52  ;;  %v1287_v23 = vmax.f32 %v1108_v6, 0.0  ;;  %v1289_v26 = vmax.f32 %v1221_v8, 0.0 }
 0x2f5   :  { %v1113_v27 = vpop.f32.mrf.mxu0  ;;  %v1226_v7 = vpop.f32.mrf.mxu1 }
 0x2f6   :  { %v1288_v45 = vmax.f32 %v1110_v19, 0.0  ;;  %v1290_v31 = vmax.f32 %v1223_v20, 0.0  ;;  %v1323_v49 = vpack.c.bf16 %v1287_v23, %v1283_v32  ;;  %v1325_v50 = vpack.c.bf16 %v1289_v26, %v1285_v35 }
 0x2f7   :  { %v1115_v36 = vpop.f32.mrf.mxu0  ;;  %v1228_v43 = vpop.f32.mrf.mxu1  ;;  %v1114_v4 = vadd.f32 %v1113_v27, %v6995_v53  ;;  %v1227_v5 = vadd.f32 %v1226_v7, %v6998_v54 }
 0x2f8   :  { %v1324_v44 = vpack.c.bf16 %v1288_v45, %v1284_v46  ;;  %v1326_v48 = vpack.c.bf16 %v1290_v31, %v1286_v30  ;;  %v1116_v55 = vadd.f32 %v1115_v36, %v6990_v51  ;;  %v1229_v57 = vadd.f32 %v1228_v43, %v6992_v52 }
 0x2f9   :  { %v1117_v39 = vpop.f32.mrf.mxu0  ;;  %v1230_v56 = vpop.f32.mrf.mxu1  ;;  %v1291_v46 = vmax.f32 %v1114_v4, 0.0  ;;  %v1293_v30 = vmax.f32 %v1227_v5, 0.0 }
 0x2fa   :  { %v1118_v3 = vadd.f32 %v1117_v39, %v6995_v53  ;;  %v1231_v2 = vadd.f32 %v1230_v56, %v6998_v54  ;;  %2080 = vmatprep.mubr.bf16.mxu0 %v1324_v44  ;;  %2193 = vmatprep.mubr.bf16.mxu1 %v1326_v48  ;;  %v1292_v19 = vmax.f32 %v1116_v55, 0.0  ;;  %v1294_v20 = vmax.f32 %v1229_v57, 0.0 }
 0x2fb   :  { %v1119_v6 = vpop.f32.mrf.mxu0  ;;  %v1232_v8 = vpop.f32.mrf.mxu1  ;;  %2081 = vmatmul.mubr.bf16.gmra.mxu0 %v1323_v49  ;;  %2194 = vmatmul.mubr.bf16.gmra.mxu1 %v1325_v50 }
 0x2fc   :  { %v1120_v9 = vadd.f32 %v1119_v6, %v6990_v51  ;;  %v1233_v10 = vadd.f32 %v1232_v8, %v6992_v52  ;;  %v1295_v15 = vmax.f32 %v1118_v3, 0.0  ;;  %v1297_v16 = vmax.f32 %v1231_v2, 0.0  ;;  %v5656_v51 = vld [vmem:[#allocation10 + $0xac] ss:$12 sps:$4 sm:$0xff]   ;;  %v5654_v52 = vld [vmem:[#allocation10 + $0xa8] ss:$12 sps:$4 sm:$0xff]  }
 0x2fd   :  { %2849 = vmatprep.subr.bf16.mxu0 %v5656_v51 }
 0x2fe   :  { %v1296_v23 = vmax.f32 %v1120_v9, 0.0  ;;  %v1298_v26 = vmax.f32 %v1233_v10, 0.0  ;;  %v1327_v27 = vpack.c.bf16 %v1295_v15, %v1291_v46  ;;  %v1329_v54 = vpack.c.bf16 %v1297_v16, %v1293_v30 }
 0x300   :  { %v1328_v45 = vpack.c.bf16 %v1296_v23, %v1292_v19  ;;  %v1330_v53 = vpack.c.bf16 %v1298_v26, %v1294_v20 }
 0x302   :  { %2090 = vmatprep.mubr.bf16.mxu0 %v1328_v45  ;;  %2203 = vmatprep.mubr.bf16.mxu1 %v1330_v53 }
 0x303   :  { %2091 = vmatmul.mubr.bf16.gmra.mxu0 %v1327_v27  ;;  %2204 = vmatmul.mubr.bf16.gmra.mxu1 %v1329_v54 }
 0x304   :  { %2246 = vmatprep.mubr.bf16.mxu0 %v7008_v17  ;;  %2343 = vmatprep.mubr.bf16.mxu1 %v7010_v18  ;;  %v5659_v17 = vld [vmem:[#allocation10 + $0x94] ss:$12 sps:$4 sm:$0xff]   ;;  %v5657_v18 = vld [vmem:[#allocation10 + $0x90] ss:$12 sps:$4 sm:$0xff]  }
 0x30b   :  { %2247 = vmatmul.mubr.bf16.vlgmr.msra.gmra.mxu0 %v7012_v21  ;;  %2344 = vmatmul.mubr.bf16.vlgmr.msra.gmra.mxu1 %v7014_v22  ;;  %v5660_v21 = vld [vmem:[#allocation10 + $0xb0] ss:$12 sps:$4 sm:$0xff]  }
 0x30c   :  { %2254 = vmatprep.mubr.bf16.mxu0 %v7028_v59  ;;  %2351 = vmatprep.mubr.bf16.mxu1 %v7030_v60  ;;  %v5663_v22 = vld [vmem:[#allocation10 + $0x7c] ss:$12 sps:$4 sm:$0xff]   ;;  %v5661_v59 = vld [vmem:[#allocation10 + $0x78] ss:$12 sps:$4 sm:$0xff]  }
 0x30d   :  { %2850 = vmatpush1.bf16.msra.mxu0 %v5654_v52  ;;  %5275 = vmatprep.subr.bf16.mxu1 %v5660_v21  ;;  %v5664_v60 = vld [vmem:[#allocation10 + $0x98] ss:$12 sps:$4 sm:$0xff]  }
 0x30e   :  { %2851 = vmatprep.subr.bf16.mxu0 %v5659_v17  ;;  %5276 = vmatpush3.bf16.msra.mxu1 %v5660_v21 }
 0x30f   :  { %5277 = vmatprep.subr.bf16.mxu1 %v5664_v60 }
 0x311   :  { %2852 = vmatpush1.bf16.msra.mxu0 %v5657_v18 }
 0x312   :  { %2853 = vmatprep.subr.bf16.mxu0 %v5663_v22  ;;  %5278 = vmatpush3.bf16.msra.mxu1 %v5664_v60 }
 0x313   :  { %2255 = vmatmul.mubr.bf16.gmra.mxu0 %v7032_v63  ;;  %2352 = vmatmul.mubr.bf16.gmra.mxu1 %v7034_v0  ;;  %v5667_v63 = vld [vmem:[#allocation10 + $0x64] ss:$12 sps:$4 sm:$0xff]   ;;  %v5665_v0 = vld [vmem:[#allocation10 + $0x60] ss:$12 sps:$4 sm:$0xff]  }
 0x314   :  { %2262 = vmatprep.mubr.bf16.mxu0 %v7048_v33  ;;  %2359 = vmatprep.mubr.bf16.mxu1 %v7050_v34  ;;  %v5668_v33 = vld [vmem:[#allocation10 + $0x80] ss:$12 sps:$4 sm:$0xff]  }
 0x315   :  { %2854 = vmatpush1.bf16.msra.mxu0 %v5661_v59  ;;  %v5671_v34 = vld [vmem:[#allocation10 + $0x4c] ss:$12 sps:$4 sm:$0xff]   ;;  %5279 = vmatprep.subr.bf16.mxu1 %v5668_v33 }
 0x316   :  { %2855 = vmatprep.subr.bf16.mxu0 %v5667_v63  ;;  %5280 = vmatpush3.bf16.msra.mxu1 %v5668_v33 }
 0x319   :  { %2856 = vmatpush1.bf16.msra.mxu0 %v5665_v0 }
 0x31a   :  { %2857 = vmatprep.subr.bf16.mxu0 %v5671_v34 }
 0x31b   :  { %2263 = vmatmul.mubr.bf16.gmra.mxu0 %v7052_v37  ;;  %2360 = vmatmul.mubr.bf16.gmra.mxu1 %v7054_v38  ;;  %v5669_v37 = vld [vmem:[#allocation10 + $0x48] ss:$12 sps:$4 sm:$0xff]  }
 0x31c   :  { %2270 = vmatprep.mubr.bf16.mxu0 %v7068_v24  ;;  %2367 = vmatprep.mubr.bf16.mxu1 %v7070_v25  ;;  %v5672_v38 = vld [vmem:[#allocation10 + $0x68] ss:$12 sps:$4 sm:$0xff]   ;;  %v5673_v25 = vld [vmem:[#allocation10 + $0x30] ss:$12 sps:$4 sm:$0xff]  }
 0x31d   :  { %2858 = vmatpush1.bf16.msra.mxu0 %v5669_v37  ;;  %v5675_v24 = vld [vmem:[#allocation10 + $0x34] ss:$12 sps:$4 sm:$0xff]   ;;  %5281 = vmatprep.subr.bf16.mxu1 %v5672_v38 }
 0x31e   :  { %2859 = vmatprep.subr.bf16.mxu0 %v5675_v24  ;;  %5282 = vmatpush3.bf16.msra.mxu1 %v5672_v38 }
 0x321   :  { %2860 = vmatpush1.bf16.msra.mxu0 %v5673_v25 }
 0x323   :  { %2271 = vmatmul.mubr.bf16.gmra.mxu0 %v7072_v28  ;;  %2368 = vmatmul.mubr.bf16.gmra.mxu1 %v7074_v29  ;;  %v5676_v28 = vld [vmem:[#allocation10 + $0x50] ss:$12 sps:$4 sm:$0xff]  }
 0x324   :  { %2278 = vmatprep.mubr.bf16.mxu0 %v7088_v11  ;;  %2375 = vmatprep.mubr.bf16.mxu1 %v7090_v12  ;;  %v5679_v29 = vld [vmem:[#allocation10 + $0x1c] ss:$12 sps:$4 sm:$0xff]   ;;  %v5677_v11 = vld [vmem:[#allocation10 + $0x18] ss:$12 sps:$4 sm:$0xff]  }
 0x325   :  { %5283 = vmatprep.subr.bf16.mxu1 %v5676_v28  ;;  %2861 = vmatprep.subr.bf16.mxu0 %v5679_v29  ;;  %v5680_v12 = vld [vmem:[#allocation10 + $0x38] ss:$12 sps:$4 sm:$0xff]  }
 0x326   :  { %5284 = vmatpush3.bf16.msra.mxu1 %v5676_v28  ;;  %2862 = vmatpush1.bf16.msra.mxu0 %v5677_v11 }
 0x327   :  { %5285 = vmatprep.subr.bf16.mxu1 %v5680_v12 }
 0x32a   :  { %5286 = vmatpush3.bf16.msra.mxu1 %v5680_v12 }
 0x32b   :  { %2279 = vmatmul.mubr.bf16.gmra.mxu0 %v7092_v13  ;;  %2376 = vmatmul.mubr.bf16.gmra.mxu1 %v7094_v14  ;;  %v5683_v13 = vld [vmem:[#allocation10 + $0x4] ss:$12 sps:$4 sm:$0xff]   ;;  %v5681_v14 = vld [vmem:[#allocation10] ss:$12 sps:$4 sm:$0xff]  }
 0x32c   :  { %2286 = vmatprep.mubr.bf16.mxu0 %v7108_v58  ;;  %2383 = vmatprep.mubr.bf16.mxu1 %v7110_v61  ;;  %v5684_v58 = vld [vmem:[#allocation10 + $0x20] ss:$12 sps:$4 sm:$0xff]   ;;  %v5685_v61 = vld [vmem:[#allocation10 + $0x8] ss:$12 sps:$4 sm:$0xff]  }
 0x32d   :  { %2863 = vmatprep.subr.bf16.mxu0 %v5683_v13  ;;  %5287 = vmatprep.subr.bf16.mxu1 %v5684_v58 }
 0x32e   :  { %2864 = vmatpush1.bf16.msra.mxu0 %v5681_v14  ;;  %5288 = vmatpush3.bf16.msra.mxu1 %v5684_v58 }
 0x32f   :  { %5289 = vmatprep.subr.bf16.mxu1 %v5685_v61 }
 0x332   :  { %5290 = vmatpush3.bf16.msra.mxu1 %v5685_v61 }
 0x333   :  { %2287 = vmatmul.mubr.bf16.gmra.mxu0 %v7112_v62  ;;  %2384 = vmatmul.mubr.bf16.gmra.mxu1 %v7114_v1  ;;  %v7164_v62 = vld [vmem:[%s7758_s8] sm:$0x7] }
 0x334   :  { %2294 = vmatprep.mubr.bf16.mxu0 %v1324_v44  ;;  %2391 = vmatprep.mubr.bf16.mxu1 %v1326_v48  ;;  %v7168_v1 = vrot.slane %v7164_v62, %v6939_v40  ;;  %v7173_v48 = vrot.slane %v7164_v62, %v6942_v42 }
 0x33b   :  { %2295 = vmatmul.mubr.bf16.gmra.mxu0 %v1323_v49  ;;  %2392 = vmatmul.mubr.bf16.gmra.mxu1 %v1325_v50 }
 0x33c   :  { %2302 = vmatprep.mubr.bf16.mxu0 %v1328_v45  ;;  %2399 = vmatprep.mubr.bf16.mxu1 %v1330_v53 }
 0x343   :  { %2303 = vmatmul.mubr.bf16.gmra.mxu0 %v1327_v27  ;;  %2400 = vmatmul.mubr.bf16.gmra.mxu1 %v1329_v54 }
 0x344   :  { %2881 = vmatprep.mubr.bf16.mxu0 %v6677_v41 }
 0x38b   :  { %v2022_v7 = vpop.f32.mrf.mxu0  ;;  %v2135_v31 = vpop.f32.mrf.mxu1 }
 0x38c   :  { %v2023_v57 = vadd.f32 %v2022_v7, %v7173_v48 }
 0x38d   :  { %v2024_v32 = vpop.f32.mrf.mxu0  ;;  %v2137_v35 = vpop.f32.mrf.mxu1 }
 0x38e   :  { %v2025_v36 = vadd.f32 %v2024_v32, %v7168_v1  ;;  %v2136_v8 = vadd.f32 %v2135_v31, %v2023_v57 }
 0x38f   :  { %v2026_v43 = vpop.f32.mrf.mxu0  ;;  %v2139_v44 = vpop.f32.mrf.mxu1 }
 0x390   :  { %v7175_v49 = vadd.f32 %v2137_v35, %v2025_v36  ;;  %v2027_v10 = vadd.f32 %v2026_v43, %v7173_v48  ;;  %v4863_v23 = vmul.f32 -1.442695, %v2136_v8 }
 0x391   :  { %v7177_v50 = vpop.f32.mrf.mxu0  ;;  %v7179_v55 = vpop.f32.mrf.mxu1 }
 0x392   :  { %v2140_v26 = vadd.f32 %v2139_v44, %v2027_v10  ;;  %5750 = vpow2.f32 %v4863_v23 }
 0x393   :  { %v2032_v39 = vpop.f32.mrf.mxu0  ;;  %v2145_v56 = vpop.f32.mrf.mxu1 }
 0x394   :  { %v2033_v46 = vadd.f32 %v2032_v39, %v7173_v48  ;;  %v4864_v52 = vmul.f32 -1.442695, %v2140_v26 }
 0x395   :  { %v2034_v3 = vpop.f32.mrf.mxu0  ;;  %v2147_v2 = vpop.f32.mrf.mxu1 }
 0x396   :  { %v2035_v4 = vadd.f32 %v2034_v3, %v7168_v1  ;;  %v2146_v17 = vadd.f32 %v2145_v56, %v2033_v46  ;;  %5752 = vpow2.f32 %v4864_v52 }
 0x397   :  { %v2036_v5 = vpop.f32.mrf.mxu0  ;;  %v2149_v6 = vpop.f32.mrf.mxu1 }
 0x398   :  { %v7183_v9 = vadd.f32 %v2147_v2, %v2035_v4  ;;  %v2037_v18 = vadd.f32 %v2036_v5, %v7173_v48  ;;  %v4865_v63 = vmul.f32 -1.442695, %v2146_v17 }
 0x399   :  { %v7186_v15 = vpop.f32.mrf.mxu0  ;;  %v7188_v16 = vpop.f32.mrf.mxu1 }
 0x39a   :  { %v2150_v0 = vadd.f32 %v2149_v6, %v2037_v18  ;;  %5754 = vpow2.f32 %v4865_v63  ;;  %v2029_v6 = vadd.f32 %v7177_v50, %v7168_v1 }
 0x39b   :  { %v2042_v19 = vpop.f32.mrf.mxu0  ;;  %v2155_v20 = vpop.f32.mrf.mxu1 }
 0x39c   :  { %v4866_v28 = vmul.f32 -1.442695, %v2150_v0  ;;  %v2043_v29 = vadd.f32 %v2042_v19, %v7173_v48  ;;  %v2142_v50 = vadd.f32 %v7179_v55, %v2029_v6 }
 0x39d   :  { %v2044_v30 = vpop.f32.mrf.mxu0  ;;  %v2157_v45 = vpop.f32.mrf.mxu1 }
 0x39e   :  { %v2045_v53 = vadd.f32 %v2044_v30, %v7168_v1  ;;  %5756 = vpow2.f32 %v4866_v28  ;;  %v2156_v61 = vadd.f32 %v2155_v20, %v2043_v29 }
 0x39f   :  { %v2046_v27 = vpop.f32.mrf.mxu0  ;;  %v2159_v54 = vpop.f32.mrf.mxu1 }
 0x3a0   :  { %v7192_v51 = vadd.f32 %v2157_v45, %v2045_v53  ;;  %v5751_v58 = vpop.eup %5750  ;;  %v2047_v32 = vadd.f32 %v2046_v27, %v7173_v48  ;;  %v4867_v56 = vmul.f32 -1.442695, %v2156_v61 }
 0x3a1   :  { %v7195_v21 = vpop.f32.mrf.mxu0  ;;  %v7197_v22 = vpop.f32.mrf.mxu1  ;;  %v2456_v44 = vadd.f32 1.0, %v5751_v58 }
 0x3a2   :  { %v2160_v4 = vadd.f32 %v2159_v54, %v2047_v32  ;;  %v2049_v28 = vadd.f32 %v7195_v21, %v7168_v1 }
 0x3a3   :  { %v2052_v59 = vpop.f32.mrf.mxu0  ;;  %v2165_v60 = vpop.f32.mrf.mxu1  ;;  %5758 = vrcp.f32 %v2456_v44 }
 0x3a4   :  { %v5753_v2 = vpop.eup %5752  ;;  %v2053_v5 = vadd.f32 %v2052_v59, %v7173_v48  ;;  %5760 = vpow2.f32 %v4867_v56  ;;  %v4868_v46 = vmul.f32 -1.442695, %v2160_v4 }
 0x3a5   :  { %v2054_v33 = vpop.f32.mrf.mxu0  ;;  %v2167_v34 = vpop.f32.mrf.mxu1  ;;  %v2457_v19 = vadd.f32 1.0, %v5753_v2  ;;  %5762 = vtanh.f32 %v7175_v49  ;;  %v2039_v49 = vadd.f32 %v7186_v15, %v7168_v1 }
 0x3a6   :  { %v2055_v37 = vadd.f32 %v2054_v33, %v7168_v1  ;;  %v2166_v30 = vadd.f32 %v2165_v60, %v2053_v5 }
 0x3a7   :  { %v2056_v38 = vpop.f32.mrf.mxu0  ;;  %v2169_v24 = vpop.f32.mrf.mxu1  ;;  %5764 = vrcp.f32 %v2457_v19 }
 0x3a8   :  { %v7200_v25 = vadd.f32 %v2167_v34, %v2055_v37  ;;  %v5755_v26 = vpop.eup %5754  ;;  %v2057_v45 = vadd.f32 %v2056_v38, %v7173_v48  ;;  %5766 = vpow2.f32 %v4868_v46  ;;  %v4869_v63 = vmul.f32 -1.442695, %v2166_v30 }
 0x3a9   :  { %v7203_v11 = vpop.f32.mrf.mxu0  ;;  %v7205_v12 = vpop.f32.mrf.mxu1  ;;  %v2458_v17 = vadd.f32 1.0, %v5755_v26  ;;  %5768 = vtanh.f32 %v2142_v50 }
 0x3aa   :  { %v2170_v0 = vadd.f32 %v2169_v24, %v2057_v45  ;;  %v2152_v24 = vadd.f32 %v7188_v16, %v2039_v49  ;;  %v2162_v16 = vadd.f32 %v7197_v22, %v2049_v28  ;;  %v7298_v28 = vrot.slane %v7164_v62, %v6984_v47 }
 0x3ab   :  { %v2062_v13 = vpop.f32.mrf.mxu0  ;;  %v7207_v14 = vpop.f32.mrf.mxu1  ;;  %5770 = vrcp.f32 %v2458_v17 }
 0x3ac   :  { %v5757_v60 = vpop.eup %5756  ;;  %5772 = vpow2.f32 %v4869_v63  ;;  %v4870_v29 = vmul.f32 -1.442695, %v2170_v0  ;;  %v2063_v15 = vadd.f32 %v2062_v13, %v7173_v48 }
 0x3ad   :  { %v2064_v7 = vpop.f32.mrf.mxu0  ;;  %v2177_v31 = vpop.f32.mrf.mxu1  ;;  %v2459_v34 = vadd.f32 1.0, %v5757_v60  ;;  %5774 = vtanh.f32 %v7183_v9 }
 0x3ae   :  { %v2065_v35 = vadd.f32 %v2064_v7, %v7168_v1  ;;  %v2176_v13 = vadd.f32 %v7207_v14, %v2063_v15 }
 0x3af   :  { %v7211_v36 = vpop.f32.mrf.mxu0  ;;  %v7213_v43 = vpop.f32.mrf.mxu1  ;;  %5776 = vrcp.f32 %v2459_v34 }
 0x3b0   :  { %v7215_v39 = vadd.f32 %v2177_v31, %v2065_v35  ;;  %v2059_v31 = vadd.f32 %v7203_v11, %v7168_v1  ;;  %v5759_v21 = vpop.eup %5758  ;;  %5778 = vpow2.f32 %v4870_v29  ;;  %v2067_v56 = vadd.f32 %v7211_v36, %v7173_v48 }
 0x3b1   :  { %v7217_v57 = vpop.f32.mrf.mxu0  ;;  %v7219_v3 = vpop.f32.mrf.mxu1  ;;  %5780 = vtanh.f32 %v2152_v24  ;;  %v4871_v36 = vmul.f32 -1.442695, %v2176_v13 }
 0x3b2   :  { %v5761_v9 = vpop.eup %5760  ;;  %v2172_v5 = vadd.f32 %v7205_v12, %v2059_v31  ;;  %5782 = vtanh.f32 %v7192_v51  ;;  %v2180_v46 = vadd.f32 %v7213_v43, %v2067_v56 }
 0x3b3   :  { %v7224_v8 = vpop.f32.mrf.mxu0  ;;  %v7226_v10 = vpop.f32.mrf.mxu1  ;;  %5784 = vtanh.f32 %v2162_v16 }
 0x3b4   :  { %v5763_v4 = vpop.eup %5762  ;;  %5786 = vtanh.f32 %v7200_v25  ;;  %v2073_v30 = vadd.f32 %v7224_v8, %v7173_v48  ;;  %v4872_v0 = vmul.f32 -1.442695, %v2180_v46 }
 0x3b5   :  { %v2074_v20 = vpop.f32.mrf.mxu0  ;;  %v2187_v23 = vpop.f32.mrf.mxu1  ;;  %v2616_v6 = vmul.f32 %v5763_v4, %v5759_v21  ;;  %5788 = vtanh.f32 %v2172_v5 }
 0x3b6   :  { %v2075_v53 = vadd.f32 %v2074_v20, %v7168_v1  ;;  %v5765_v22 = vpop.eup %5764  ;;  %v2186_v49 = vadd.f32 %v7226_v10, %v2073_v30 }
 0x3b7   :  { %v7232_v27 = vpop.f32.mrf.mxu0  ;;  %v7234_v54 = vpop.f32.mrf.mxu1  ;;  %5790 = vtanh.f32 %v2616_v6 }
 0x3b8   :  { %v7236_v52 = vadd.f32 %v2187_v23, %v2075_v53  ;;  %v2460_v23 = vadd.f32 1.0, %v5761_v9  ;;  %v5767_v26 = vpop.eup %5766  ;;  %v2069_v53 = vadd.f32 %v7217_v57, %v7168_v1 }
 0x3b9   :  { %v7238_v18 = vpop.f32.mrf.mxu0  ;;  %v7240_v59 = vpop.f32.mrf.mxu1  ;;  %v2461_v8 = vadd.f32 1.0, %v5767_v26 }
 0x3ba   :  { %v5769_v51 = vpop.eup %5768  ;;  %5792 = vrcp.f32 %v2460_v23  ;;  %v2182_v57 = vadd.f32 %v7219_v3, %v2069_v53  ;;  %v2079_v5 = vadd.f32 %v7238_v18, %v7168_v1 }
 0x3bb   :  { %v7244_v55 = vpop.f32.mrf.mxu0  ;;  %v7246_v33 = vpop.f32.mrf.mxu1  ;;  %v2617_v17 = vmul.f32 %v5769_v51, %v5765_v22  ;;  %5794 = vpow2.f32 %v4871_v36 }
 0x3bc   :  { %v5771_v43 = vpop.eup %5770  ;;  %5796 = vtanh.f32 %v7215_v39  ;;  %v4873_v39 = vmul.f32 -1.442695, %v2186_v49 }
 0x3bd   :  { %v2084_v37 = vpop.f32.mrf.mxu0  ;;  %v2197_v38 = vpop.f32.mrf.mxu1  ;;  %5798 = vtanh.f32 %v2617_v17 }
 0x3be   :  { %v2085_v58 = vadd.f32 %v2084_v37, %v7168_v1  ;;  %v5773_v63 = vpop.eup %5772  ;;  %5800 = vrcp.f32 %v2461_v8 }
 0x3bf   :  { %v7254_v61 = vpop.f32.mrf.mxu0  ;;  %v7256_v7 = vpop.f32.mrf.mxu1  ;;  %v2462_v10 = vadd.f32 1.0, %v5773_v63  ;;  %5802 = vpow2.f32 %v4872_v0  ;;  %v2192_v0 = vadd.f32 %v7240_v59, %v2079_v5 }
 0x3c0   :  { %v7260_v32 = vadd.f32 %v2197_v38, %v2085_v58  ;;  %v5775_v38 = vpop.eup %5774  ;;  %v2077_v58 = vadd.f32 %v7232_v27, %v7173_v48  ;;  %5804 = vtanh.f32 %v2182_v57 }
 0x3c1   :  { %v7262_v35 = vpop.f32.mrf.mxu0  ;;  %v7264_v44 = vpop.f32.mrf.mxu1  ;;  %v2618_v29 = vmul.f32 %v5775_v38, %v5771_v43 }
 0x3c2   :  { %v5777_v31 = vpop.eup %5776  ;;  %v2190_v27 = vadd.f32 %v7234_v54, %v2077_v58  ;;  %v2087_v58 = vadd.f32 %v7254_v61, %v7173_v48 }
 0x3c3   :  { %v7270_v2 = vpop.f32.mrf.mxu0  ;;  %v7272_v11 = vpop.f32.mrf.mxu1  ;;  %5806 = vtanh.f32 %v2618_v29 }
 0x3c4   :  { %v5779_v9 = vpop.eup %5778  ;;  %5808 = vrcp.f32 %v2462_v10  ;;  %v4874_v17 = vmul.f32 -1.442695, %v2190_v27 }
 0x3c5   :  { %v2094_v19 = vpop.f32.mrf.mxu0  ;;  %v2207_v20 = vpop.f32.mrf.mxu1  ;;  %v2463_v22 = vadd.f32 1.0, %v5779_v9  ;;  %5810 = vpow2.f32 %v4873_v39 }
 0x3c6   :  { %v2095_v14 = vadd.f32 %v2094_v19, %v7168_v1  ;;  %v5781_v13 = vpop.eup %5780  ;;  %5812 = vtanh.f32 %v7236_v52  ;;  %v2083_v52 = vadd.f32 %v7244_v55, %v7173_v48 }
 0x3c7   :  { %v7281_v12 = vpop.f32.mrf.mxu0  ;;  %v7283_v45 = vpop.f32.mrf.mxu1  ;;  %v2619_v4 = vmul.f32 %v5781_v13, %v5777_v31 }
 0x3c8   :  { %v7287_v50 = vadd.f32 %v2207_v20, %v2095_v14  ;;  %v5783_v20 = vpop.eup %5782  ;;  %v2196_v13 = vadd.f32 %v7246_v33, %v2083_v52  ;;  %v2093_v33 = vadd.f32 %v7270_v2, %v7173_v48 }
 0x3c9   :  { %v7289_v25 = vpop.f32.mrf.mxu0  ;;  %v7291_v60 = vpop.f32.mrf.mxu1  ;;  %5814 = vtanh.f32 %v2619_v4  ;;  %v2200_v4 = vadd.f32 %v7256_v7, %v2087_v58 }
 0x3ca   :  { %v7306_v26 = vpop.eup %5784  ;;  %5816 = vrcp.f32 %v2463_v22 }
 0x3cb   :  { %v5088_v34 = vpop.f32.mrf.mxu0  ;;  %v5152_v37 = vpop.f32.mrf.mxu1 }
 0x3cc   :  { %v7308_v30 = vpop.eup %5786 }
 0x3cd   :  { %v5089_v24 = vpop.f32.mrf.mxu0  ;;  %v5153_v15 = vpop.f32.mrf.mxu1 }
 0x3ce   :  { %v5090_v21 = vadd.f32 %v5089_v24, %v5088_v34  ;;  %v5154_v56 = vadd.f32 %v5153_v15, %v5152_v37  ;;  %v7312_v53 = vpop.eup %5788 }
 0x3cf   :  { %v5091_v16 = vpop.f32.mrf.mxu0  ;;  %v5155_v3 = vpop.f32.mrf.mxu1 }
 0x3d0   :  { %v2249_v62 = vadd.f32 %v5090_v21, %v7298_v28  ;;  %v7314_v63 = vpop.eup %5790 }
 0x3d1   :  { %v5092_v6 = vpop.f32.mrf.mxu0  ;;  %v5156_v19 = vpop.f32.mrf.mxu1 }
 0x3d2   :  { %v2346_v23 = vadd.f32 %v5154_v56, %v2249_v62  ;;  %v5093_v14 = vadd.f32 %v5092_v6, %v5091_v16  ;;  %v5157_v18 = vadd.f32 %v5156_v19, %v5155_v3  ;;  %v5793_v37 = vpop.eup %5792 }
 0x3d3   :  { %v5094_v36 = vpop.f32.mrf.mxu0  ;;  %v5158_v46 = vpop.f32.mrf.mxu1  ;;  %v2620_v39 = vmul.f32 %v5793_v37, %v5783_v20 }
 0x3d4   :  { %v4879_v54 = vmul.f32 -1.442695, %v2346_v23  ;;  %v2252_v51 = vadd.f32 %v5093_v14, %v7298_v28  ;;  %v5795_v29 = vpop.eup %5794 }
 0x3d5   :  { %v5095_v43 = vpop.f32.mrf.mxu0  ;;  %v5159_v8 = vpop.f32.mrf.mxu1  ;;  %v2464_v22 = vadd.f32 1.0, %v5795_v29 }
 0x3d6   :  { %v2349_v49 = vadd.f32 %v5157_v18, %v2252_v51  ;;  %v5096_v34 = vadd.f32 %v5095_v43, %v5094_v36  ;;  %5818 = vpow2.f32 %v4879_v54  ;;  %v5160_v31 = vadd.f32 %v5159_v8, %v5158_v46  ;;  %v7322_v10 = vpop.eup %5796 }
 0x3d7   :  { %v5097_v38 = vpop.f32.mrf.mxu0  ;;  %v5161_v57 = vpop.f32.mrf.mxu1  ;;  %5820 = vpow2.f32 %v4874_v17  ;;  %v4875_v54 = vmul.f32 -1.442695, %v2196_v13  ;;  %v2089_v51 = vadd.f32 %v7262_v35, %v7168_v1  ;;  %v2206_v35 = vadd.f32 %v7272_v11, %v2093_v33 }
 0x3d8   :  { %v4880_v24 = vmul.f32 -1.442695, %v2349_v49  ;;  %v2257_v15 = vadd.f32 %v5096_v34, %v7298_v28  ;;  %v7324_v9 = vpop.eup %5798  ;;  %5822 = vtanh.f32 %v2192_v0 }
 0x3d9   :  { %v5098_v59 = vpop.f32.mrf.mxu0  ;;  %v5162_v21 = vpop.f32.mrf.mxu1 }
 0x3da   :  { %v2354_v55 = vadd.f32 %v5160_v31, %v2257_v15  ;;  %v5099_v16 = vadd.f32 %v5098_v59, %v5097_v38  ;;  %v5801_v3 = vpop.eup %5800  ;;  %5824 = vpow2.f32 %v4880_v24  ;;  %v5163_v6 = vadd.f32 %v5162_v21, %v5161_v57 }
 0x3db   :  { %v5100_v61 = vpop.f32.mrf.mxu0  ;;  %v5164_v62 = vpop.f32.mrf.mxu1  ;;  %5826 = vtanh.f32 %v7260_v32  ;;  %v4876_v32 = vmul.f32 -1.442695, %v2200_v4  ;;  %v2621_v2 = vmul.f32 %v5801_v3, %v7306_v26  ;;  %v2202_v15 = vadd.f32 %v7264_v44, %v2089_v51 }
 0x3dc   :  { %v5803_v56 = vpop.eup %5802  ;;  %v4881_v27 = vmul.f32 -1.442695, %v2354_v55  ;;  %v2260_v5 = vadd.f32 %v5099_v16, %v7298_v28  ;;  %5828 = vtanh.f32 %v2620_v39  ;;  %v2097_v44 = vadd.f32 %v7281_v12, %v7173_v48 }
 0x3dd   :  { %v7329_v19 = vpop.eup %5804  ;;  %v5101_v20 = vpop.f32.mrf.mxu0  ;;  %v2465_v37 = vadd.f32 1.0, %v5803_v56 }
 0x3de   :  { %v5165_v23 = vpop.f32.mrf.mxu1  ;;  %v7332_v14 = vpop.eup %5806  ;;  %v2357_v36 = vadd.f32 %v5163_v6, %v2260_v5  ;;  %v5102_v46 = vadd.f32 %v5101_v20, %v5100_v61  ;;  %5830 = vpow2.f32 %v4881_v27  ;;  %v4877_v61 = vmul.f32 -1.442695, %v2206_v35 }
 0x3df   :  { %v5809_v7 = vpop.eup %5808  ;;  %v5103_v18 = vpop.f32.mrf.mxu0  ;;  %v5166_v49 = vadd.f32 %v5165_v23, %v5164_v62  ;;  %5832 = vrcp.f32 %v2464_v22 }
 0x3e0   :  { %v5167_v17 = vpop.f32.mrf.mxu1  ;;  %v5811_v43 = vpop.eup %5810  ;;  %v4882_v8 = vmul.f32 -1.442695, %v2357_v36  ;;  %v2265_v0 = vadd.f32 %v5102_v46, %v7298_v28  ;;  %v2622_v33 = vmul.f32 %v5809_v7, %v7308_v30 }
 0x3e1   :  { %v7339_v34 = vpop.eup %5812  ;;  %v5104_v52 = vpop.f32.mrf.mxu0 }
 0x3e2   :  { %v5168_v38 = vpop.f32.mrf.mxu1  ;;  %v7342_v57 = vpop.eup %5814  ;;  %5834 = vpow2.f32 %v4882_v8  ;;  %v2362_v29 = vadd.f32 %v5166_v49, %v2265_v0  ;;  %v5105_v58 = vadd.f32 %v5104_v52, %v5103_v18  ;;  %v2466_v18 = vadd.f32 1.0, %v5811_v43 }
 0x3e3   :  { %v7345_v24 = vpop.eup %5816  ;;  %5836 = vpow2.f32 %v4875_v54  ;;  %v5106_v31 = vpop.f32.mrf.mxu0  ;;  %v5169_v55 = vadd.f32 %v5168_v38, %v5167_v17 }
 0x3e4   :  { %v5170_v59 = vpop.f32.mrf.mxu1  ;;  %v5819_v21 = vpop.eup %5818  ;;  %5838 = vpow2.f32 %v4876_v32  ;;  %v4883_v26 = vmul.f32 -1.442695, %v2362_v29  ;;  %v2268_v39 = vadd.f32 %v5105_v58, %v7298_v28  ;;  %v2210_v32 = vadd.f32 %v7283_v45, %v2097_v44 }
 0x3e5   :  { %5840 = vtanh.f32 %v2621_v2  ;;  %v2568_v16 = vadd.f32 1.0, %v5819_v21  ;;  %v5107_v3 = vpop.f32.mrf.mxu0  ;;  %v7349_v13 = vpop.eup %5820 }
 0x3e6   :  { %v5171_v11 = vpop.f32.mrf.mxu1  ;;  %5842 = vrcp.f32 %v2465_v37  ;;  %v2365_v62 = vadd.f32 %v5169_v55, %v2268_v39  ;;  %v5108_v56 = vadd.f32 %v5107_v3, %v5106_v31  ;;  %v7351_v4 = vpop.eup %5822  ;;  %v4878_v45 = vmul.f32 -1.442695, %v2210_v32 }
 0x3e7   :  { %5844 = vtanh.f32 %v2202_v15  ;;  %v5109_v27 = vpop.f32.mrf.mxu0  ;;  %v5825_v6 = vpop.eup %5824  ;;  %v5172_v23 = vadd.f32 %v5171_v11, %v5170_v59  ;;  %v2099_v15 = vadd.f32 %v7289_v25, %v7168_v1  ;;  %v2623_v11 = vmul.f32 %v7345_v24, %v7312_v53 }
 0x3e8   :  { %v5173_v5 = vpop.f32.mrf.mxu1  ;;  %5846 = vpow2.f32 %v4883_v26  ;;  %v4884_v22 = vmul.f32 -1.442695, %v2365_v62  ;;  %v2273_v20 = vadd.f32 %v5108_v56, %v7298_v28  ;;  %v2569_v36 = vadd.f32 1.0, %v5825_v6  ;;  %v7357_v51 = vpop.eup %5826 }
 0x3e9   :  { %5848 = vrcp.f32 %v2568_v16  ;;  %v5110_v46 = vpop.f32.mrf.mxu0  ;;  %v7359_v12 = vpop.eup %5828  ;;  %v2467_v44 = vadd.f32 1.0, %v7349_v13 }
 0x3ea   :  { %v5174_v54 = vpop.f32.mrf.mxu1  ;;  %5850 = vpow2.f32 %v4877_v61  ;;  %v2370_v17 = vadd.f32 %v5172_v23, %v2273_v20  ;;  %v5111_v48 = vadd.f32 %v5110_v46, %v5109_v27  ;;  %v2212_v27 = vadd.f32 %v7291_v60, %v2099_v15 }
 0x3eb   :  { %5852 = vrcp.f32 %v2569_v36  ;;  %v5112_v8 = vpop.f32.mrf.mxu0  ;;  %v5831_v49 = vpop.eup %5830  ;;  %v5175_v2 = vadd.f32 %v5174_v54, %v5173_v5 }
 0x3ec   :  { %v5176_v0 = vpop.f32.mrf.mxu1  ;;  %5854 = vpow2.f32 %v4884_v22  ;;  %v4885_v30 = vmul.f32 -1.442695, %v2370_v17  ;;  %v2276_v7 = vadd.f32 %v5111_v48, %v7298_v28  ;;  %v2570_v37 = vadd.f32 1.0, %v5831_v49  ;;  %v5833_v38 = vpop.eup %5832 }
 0x3ed   :  { %5856 = vtanh.f32 %v2622_v33  ;;  %v5113_v52 = vpop.f32.mrf.mxu0  ;;  %v2624_v33 = vmul.f32 %v5833_v38, %v7322_v10 }
 0x3ee   :  { %v5177_v43 = vpop.f32.mrf.mxu1  ;;  %5858 = vrcp.f32 %v2466_v18  ;;  %v2373_v35 = vadd.f32 %v5175_v2, %v2276_v7  ;;  %v5114_v29 = vadd.f32 %v5113_v52, %v5112_v8 }
 0x3ef   :  { %v5835_v58 = vpop.eup %5834  ;;  %5860 = vtanh.f32 %v7287_v50  ;;  %v5178_v31 = vadd.f32 %v5177_v43, %v5176_v0  ;;  %v5115_v59 = vpop.f32.mrf.mxu0 }
 0x3f0   :  { %v5179_v21 = vpop.f32.mrf.mxu1  ;;  %v5837_v26 = vpop.eup %5836  ;;  %v2571_v39 = vadd.f32 1.0, %v5835_v58  ;;  %5862 = vpow2.f32 %v4885_v30  ;;  %v4886_v55 = vmul.f32 -1.442695, %v2373_v35  ;;  %v2281_v16 = vadd.f32 %v5114_v29, %v7298_v28 }
 0x3f1   :  { %v5839_v3 = vpop.eup %5838  ;;  %5864 = vrcp.f32 %v2570_v37  ;;  %v5116_v61 = vpop.f32.mrf.mxu0  ;;  %v2468_v10 = vadd.f32 1.0, %v5837_v26 }
 0x3f2   :  { %v5180_v50 = vpop.f32.mrf.mxu1  ;;  %v7369_v62 = vpop.eup %5840  ;;  %5866 = vrcp.f32 %v2571_v39  ;;  %v2378_v1 = vadd.f32 %v5178_v31, %v2281_v16  ;;  %v5117_v25 = vadd.f32 %v5116_v61, %v5115_v59  ;;  %v2469_v15 = vadd.f32 1.0, %v5839_v3 }
 0x3f3   :  { %v7371_v56 = vpop.eup %5842  ;;  %5868 = vpow2.f32 %v4886_v55  ;;  %v5118_v5 = vpop.f32.mrf.mxu0  ;;  %v5181_v20 = vadd.f32 %v5180_v50, %v5179_v21 }
 0x3f4   :  { %v5182_v6 = vpop.f32.mrf.mxu1  ;;  %v7375_v22 = vpop.eup %5844  ;;  %5870 = vpow2.f32 %v4878_v45  ;;  %v4887_v53 = vmul.f32 -1.442695, %v2378_v1  ;;  %v2284_v24 = vadd.f32 %v5117_v25, %v7298_v28 }
 0x3f5   :  { %v5847_v23 = vpop.eup %5846  ;;  %5872 = vtanh.f32 %v2623_v11  ;;  %v5119_v36 = vpop.f32.mrf.mxu0 }
 0x3f6   :  { %v5183_v46 = vpop.f32.mrf.mxu1  ;;  %v5849_v54 = vpop.eup %5848  ;;  %5874 = vpow2.f32 %v4887_v53  ;;  %v2381_v13 = vadd.f32 %v5181_v20, %v2284_v24  ;;  %v5120_v60 = vadd.f32 %v5119_v36, %v5118_v5  ;;  %v2572_v17 = vadd.f32 1.0, %v5847_v23 }
 0x3f7   :  { %v7379_v18 = vpop.eup %5850  ;;  %5876 = vrcp.f32 %v2467_v44  ;;  %v5121_v48 = vpop.f32.mrf.mxu0  ;;  %v5184_v30 = vadd.f32 %v5183_v46, %v5182_v6  ;;  %v2648_v52 = vmul.f32 %v5849_v54, %v7314_v63 }
 0x3f8   :  { %v5185_v32 = vpop.f32.mrf.mxu1  ;;  %v5853_v8 = vpop.eup %5852  ;;  %5878 = vtanh.f32 %v2212_v27  ;;  %v4888_v0 = vmul.f32 -1.442695, %v2381_v13  ;;  %v2289_v49 = vadd.f32 %v5120_v60, %v7298_v28 }
 0x3f9   :  { %v5855_v7 = vpop.eup %5854  ;;  %5880 = vtanh.f32 %v2624_v33  ;;  %v5122_v2 = vpop.f32.mrf.mxu0  ;;  %v2649_v43 = vmul.f32 %v5853_v8, %v7324_v9  ;;  %v2625_v33 = vmul.f32 %v7371_v56, %v7329_v19 }
 0x3fa   :  { %v5186_v37 = vpop.f32.mrf.mxu1  ;;  %v7384_v38 = vpop.eup %5856  ;;  %v2573_v35 = vadd.f32 1.0, %v5855_v7  ;;  %5882 = vpow2.f32 %v4888_v0  ;;  %v2386_v29 = vadd.f32 %v5184_v30, %v2289_v49  ;;  %v5123_v58 = vadd.f32 %v5122_v2, %v5121_v48 }
 0x3fb   :  { %v7386_v45 = vpop.eup %5858  ;;  %5884 = vrcp.f32 %v2572_v17  ;;  %v5124_v31 = vpop.f32.mrf.mxu0  ;;  %v2664_v21 = vpack.c.bf16 %v2649_v43, %v2648_v52  ;;  %v5187_v9 = vadd.f32 %v5186_v37, %v5185_v32 }
 0x3fc   :  { %v5188_v59 = vpop.f32.mrf.mxu1  ;;  %v7388_v26 = vpop.eup %5860  ;;  %5886 = vrcp.f32 %v2573_v35  ;;  %v4889_v39 = vmul.f32 -1.442695, %v2386_v29  ;;  %v2292_v63 = vadd.f32 %v5123_v58, %v7298_v28 }
 0x3fd   :  { %v5863_v55 = vpop.eup %5862  ;;  %5888 = vrcp.f32 %v2468_v10  ;;  %2882 = vmatmul.mubr.bf16.vlgmr.msra.gmra.mxu0 %v2664_v21  ;;  %5291 = vmatprep.mubr.bf16.mxu1 %v2664_v21  ;;  %v5125_v16 = vpop.f32.mrf.mxu0 }
 0x3fe   :  { %v5189_v11 = vpop.f32.mrf.mxu1  ;;  %v5865_v61 = vpop.eup %5864  ;;  %v2574_v50 = vadd.f32 1.0, %v5863_v55  ;;  %5890 = vpow2.f32 %v4889_v39  ;;  %v2389_v3 = vadd.f32 %v5187_v9, %v2292_v63  ;;  %v5126_v1 = vadd.f32 %v5125_v16, %v5124_v31  ;;  %2891 = vmatprep.mubr.bf16.mxu0 %v6677_v41 }
 0x3ff   :  { %v5867_v25 = vpop.eup %5866  ;;  %5892 = vrcp.f32 %v2469_v15  ;;  %v5127_v44 = vpop.f32.mrf.mxu0  ;;  %v5190_v24 = vadd.f32 %v5189_v11, %v5188_v59  ;;  %v2650_v13 = vmul.f32 %v5865_v61, %v7332_v14  ;;  %v2470_v14 = vadd.f32 1.0, %v7379_v18 }
 0x400   :  { %v5191_v27 = vpop.f32.mrf.mxu1  ;;  %v5869_v5 = vpop.eup %5868  ;;  %v4890_v6 = vmul.f32 -1.442695, %v2389_v3  ;;  %v2297_v53 = vadd.f32 %v5126_v1, %v7298_v28  ;;  %v2651_v20 = vmul.f32 %v5867_v25, %v7342_v57  ;;  %5894 = vrcp.f32 %v2574_v50 }
 0x401   :  { %v5871_v23 = vpop.eup %5870  ;;  %v2575_v36 = vadd.f32 1.0, %v5869_v5  ;;  %v5128_v46 = vpop.f32.mrf.mxu0  ;;  %v2626_v9 = vmul.f32 %v7386_v45, %v7339_v34 }
 0x402   :  { %v5192_v54 = vpop.f32.mrf.mxu1  ;;  %v7397_v60 = vpop.eup %5872  ;;  %5896 = vpow2.f32 %v4890_v6  ;;  %v2394_v17 = vadd.f32 %v5190_v24, %v2297_v53  ;;  %v5129_v48 = vadd.f32 %v5128_v46, %v5127_v44  ;;  %v2665_v57 = vpack.c.bf16 %v2651_v20, %v2650_v13 }
 0x403   :  { %v5875_v32 = vpop.eup %5874  ;;  %5898 = vrcp.f32 %v2575_v36  ;;  %v5130_v8 = vpop.f32.mrf.mxu0  ;;  %v5193_v56 = vadd.f32 %v5192_v54, %v5191_v27  ;;  %v2471_v61 = vadd.f32 1.0, %v5871_v23 }
 0x404   :  { %v5194_v0 = vpop.f32.mrf.mxu1  ;;  %v5877_v49 = vpop.eup %5876  ;;  %v2576_v30 = vadd.f32 1.0, %v5875_v32  ;;  %v4891_v7 = vmul.f32 -1.442695, %v2394_v17  ;;  %v2300_v19 = vadd.f32 %v5129_v48, %v7298_v28  ;;  %5900 = vtanh.f32 %v2625_v33  ;;  %5292 = vmatmul.mubr.bf16.vlgmr.msra.gmra.mxu1 %v2665_v57 }
 0x405   :  { %v7400_v10 = vpop.eup %5878  ;;  %2892 = vmatmul.mubr.bf16.gmra.mxu0 %v2665_v57  ;;  %v5131_v2 = vpop.f32.mrf.mxu0  ;;  %v2627_v45 = vmul.f32 %v5877_v49, %v7351_v4 }
 0x406   :  { %v5195_v37 = vpop.f32.mrf.mxu1  ;;  %v7403_v52 = vpop.eup %5880  ;;  %5902 = vrcp.f32 %v2576_v30  ;;  %v2397_v43 = vadd.f32 %v5193_v56, %v2300_v19  ;;  %v5132_v35 = vadd.f32 %v5131_v2, %v5130_v8  ;;  %2901 = vmatprep.mubr.bf16.mxu0 %v6677_v41 }
 0x407   :  { %v5883_v29 = vpop.eup %5882  ;;  %5904 = vpow2.f32 %v4891_v7  ;;  %v5133_v58 = vpop.f32.mrf.mxu0  ;;  %v5196_v39 = vadd.f32 %v5195_v37, %v5194_v0 }
 0x408   :  { %v5197_v15 = vpop.f32.mrf.mxu1  ;;  %v5885_v31 = vpop.eup %5884  ;;  %v2577_v59 = vadd.f32 1.0, %v5883_v29  ;;  %v4892_v21 = vmul.f32 -1.442695, %v2397_v43  ;;  %v2305_v18 = vadd.f32 %v5132_v35, %v7298_v28  ;;  %5906 = vrcp.f32 %v2470_v14 }
 0x409   :  { %v5887_v63 = vpop.eup %5886  ;;  %v5134_v55 = vpop.f32.mrf.mxu0  ;;  %v2652_v25 = vmul.f32 %v5885_v31, %v7359_v12 }
 0x40a   :  { %v5198_v16 = vpop.f32.mrf.mxu1  ;;  %v5889_v11 = vpop.eup %5888  ;;  %5908 = vrcp.f32 %v2577_v59  ;;  %v2402_v50 = vadd.f32 %v5196_v39, %v2305_v18  ;;  %v5135_v3 = vadd.f32 %v5134_v55, %v5133_v58  ;;  %v2653_v44 = vmul.f32 %v5887_v63, %v7369_v62 }
 0x40b   :  { %v5891_v1 = vpop.eup %5890  ;;  %5910 = vpow2.f32 %v4892_v21  ;;  %v5199_v34 = vadd.f32 %v5198_v16, %v5197_v15  ;;  %v2628_v48 = vmul.f32 %v5889_v11, %v7357_v51 }
 0x40c   :  { %v5893_v27 = vpop.eup %5892  ;;  %v2578_v5 = vadd.f32 1.0, %v5891_v1  ;;  %v4893_v6 = vmul.f32 -1.442695, %v2402_v50  ;;  %v2308_v53 = vadd.f32 %v5135_v3, %v7298_v28  ;;  %5912 = vtanh.f32 %v2626_v9  ;;  %v5691_v1 = vld [vmem:[#allocation11 + $0xac] ss:$12 sps:$4 sm:$0xff]  }
 0x40d   :  { %v2666_v24 = vpack.c.bf16 %v2653_v44, %v2652_v25  ;;  %v5895_v20 = vpop.eup %5894  ;;  %5914 = vrcp.f32 %v2471_v61  ;;  %v2629_v0 = vmul.f32 %v5893_v27, %v7375_v22  ;;  %v5686_v25 = vld [vmem:[#allocation11 + $0xb0] ss:$12 sps:$4 sm:$0xff]   ;;  %v5689_v44 = vld [vmem:[#allocation11 + $0xa8] ss:$12 sps:$4 sm:$0xff]   ;;  %3500 = vmatprep.subr.bf16.mxu1 %v5691_v1  ;;  %v5687_v27 = vld [vmem:[#allocation11 + $0x98] ss:$12 sps:$4 sm:$0xff]  }
 0x40e   :  { %v2405_v23 = vadd.f32 %v5199_v34, %v2308_v53  ;;  %5916 = vpow2.f32 %v4893_v6  ;;  %v2654_v28 = vmul.f32 %v5895_v20, %v7384_v38  ;;  %5307 = vmatprep.subr.bf16.mxu0 %v5686_v25  ;;  %3501 = vmatpush1.bf16.msra.mxu1 %v5689_v44  ;;  %v5692_v6 = vld [vmem:[#allocation11 + $0x90] ss:$12 sps:$4 sm:$0xff]   ;;  %v5688_v53 = vld [vmem:[#allocation11 + $0x80] ss:$12 sps:$4 sm:$0xff]  }
 0x40f   :  { %v5897_v33 = vpop.eup %5896  ;;  %2902 = vmatmul.mubr.bf16.gmra.mxu0 %v2666_v24  ;;  %5295 = vmatprep.mubr.bf16.mxu1 %v2666_v24  ;;  %5918 = vrcp.f32 %v2578_v5  ;;  %v5694_v5 = vld [vmem:[#allocation11 + $0x94] ss:$12 sps:$4 sm:$0xff]   ;;  %v5698_v34 = vld [vmem:[#allocation11 + $0x7c] ss:$12 sps:$4 sm:$0xff]   ;;  %v5701_v24 = vld [vmem:[#allocation11 + $0x64] ss:$12 sps:$4 sm:$0xff]  }
 0x410   :  { %v5899_v12 = vpop.eup %5898  ;;  %v2579_v62 = vadd.f32 1.0, %v5897_v33  ;;  %v4894_v36 = vmul.f32 -1.442695, %v2405_v23  ;;  %2911 = vmatprep.mubr.bf16.mxu0 %v6677_v41  ;;  %5920 = vtanh.f32 %v2627_v45  ;;  %5308 = vmatpush3.bf16.msra.mxu0 %v5686_v25  ;;  %v5696_v45 = vld [vmem:[#allocation11 + $0x78] ss:$12 sps:$4 sm:$0xff]  }
 0x411   :  { %v2655_v46 = vmul.f32 %v5899_v12, %v7397_v60  ;;  %v5901_v4 = vpop.eup %5900  ;;  %5309 = vmatprep.subr.bf16.mxu0 %v5687_v27  ;;  %3502 = vmatprep.subr.bf16.mxu1 %v5694_v5  ;;  %v5699_v20 = vld [vmem:[#allocation11 + $0x60] ss:$12 sps:$4 sm:$0xff]   ;;  %v5695_v23 = vld [vmem:[#allocation11 + $0x68] ss:$12 sps:$4 sm:$0xff]  }
 0x412   :  { %5922 = vrcp.f32 %v2579_v62  ;;  %3503 = vmatpush1.bf16.msra.mxu1 %v5692_v6  ;;  %v5705_v33 = vld [vmem:[#allocation11 + $0x4c] ss:$12 sps:$4 sm:$0xff]   ;;  %v5703_v12 = vld [vmem:[#allocation11 + $0x48] ss:$12 sps:$4 sm:$0xff]   ;;  %v5702_v62 = vld [vmem:[#allocation11 + $0x50] ss:$12 sps:$4 sm:$0xff]  }
 0x413   :  { %v5903_v54 = vpop.eup %5902  ;;  %5924 = vpow2.f32 %v4894_v36  ;;  %v2667_v13 = vpack.c.bf16 %v2655_v46, %v2654_v28  ;;  %3504 = vmatprep.subr.bf16.mxu1 %v5698_v34  ;;  %v5708_v36 = vld [vmem:[#allocation11 + $0x34] ss:$12 sps:$4 sm:$0xff]   ;;  %v5706_v28 = vld [vmem:[#allocation11 + $0x30] ss:$12 sps:$4 sm:$0xff]  }
 0x414   :  { %v5905_v17 = vpop.eup %5904  ;;  %5926 = vtanh.f32 %v2628_v48  ;;  %v2656_v38 = vmul.f32 %v5903_v54, %v7403_v52  ;;  %5310 = vmatpush3.bf16.msra.mxu0 %v5687_v27  ;;  %v5712_v46 = vld [vmem:[#allocation11 + $0x1c] ss:$12 sps:$4 sm:$0xff]   ;;  %v5709_v54 = vld [vmem:[#allocation11 + $0x38] ss:$12 sps:$4 sm:$0xff]   ;;  %v5716_v48 = vld [vmem:[#allocation11 + $0x20] ss:$12 sps:$4 sm:$0xff]  }
 0x415   :  { %v2580_v32 = vadd.f32 1.0, %v5905_v17  ;;  %5296 = vmatmul.mubr.bf16.gmra.mxu1 %v2667_v13  ;;  %v5907_v8 = vpop.eup %5906  ;;  %5311 = vmatprep.subr.bf16.mxu0 %v5688_v53  ;;  %v5713_v17 = vld [vmem:[#allocation11] ss:$12 sps:$4 sm:$0xff]  }
 0x416   :  { %v2630_v14 = vmul.f32 %v5907_v8, %v7388_v26  ;;  %3505 = vmatpush1.bf16.msra.mxu1 %v5696_v45  ;;  %v2704_v8 = vld [vmem:[%s7760_s10] sm:$0x7] }
 0x417   :  { %v5909_v57 = vpop.eup %5908  ;;  %2912 = vmatmul.mubr.bf16.gmra.mxu0 %v2667_v13  ;;  %5928 = vrcp.f32 %v2580_v32  ;;  %3506 = vmatprep.subr.bf16.mxu1 %v5701_v24  ;;  %v5715_v13 = vld [vmem:[#allocation11 + $0x4] ss:$12 sps:$4 sm:$0xff]   ;;  %v5717_v32 = vld [vmem:[#allocation11 + $0x8] ss:$12 sps:$4 sm:$0xff]  }
 0x418   :  { %v5911_v49 = vpop.eup %5910  ;;  %2921 = vmatprep.mubr.bf16.mxu0 %v6677_v41  ;;  %v2657_v60 = vmul.f32 %v5909_v57, %v5901_v4  ;;  %5930 = vtanh.f32 %v2629_v0  ;;  %5312 = vmatpush3.bf16.msra.mxu0 %v5688_v53  ;;  %v5710_v4 = vld [vmem:[#allocation11 + $0x18] ss:$12 sps:$4 sm:$0xff]   ;;  %v7430_v0 = vrot.slane %v2704_v8, %v6942_v42 }
 0x419   :  { %v2581_v30 = vadd.f32 1.0, %v5911_v49  ;;  %v5913_v7 = vpop.eup %5912  ;;  %5313 = vmatprep.subr.bf16.mxu0 %v5695_v23 }
 0x41a   :  { %v2668_v19 = vpack.c.bf16 %v2657_v60, %v2656_v38  ;;  %v5915_v51 = vpop.eup %5914  ;;  %3507 = vmatpush1.bf16.msra.mxu1 %v5699_v20 }
 0x41b   :  { %5932 = vrcp.f32 %v2581_v30  ;;  %v5917_v56 = vpop.eup %5916  ;;  %v2631_v43 = vmul.f32 %v5915_v51, %v7400_v10  ;;  %3508 = vmatprep.subr.bf16.mxu1 %v5705_v33 }
 0x41c   :  { %5299 = vmatprep.mubr.bf16.mxu1 %v2668_v19  ;;  %v5919_v22 = vpop.eup %5918  ;;  %v2582_v2 = vadd.f32 1.0, %v5917_v56  ;;  %5934 = vtanh.f32 %v2630_v14  ;;  %5314 = vmatpush3.bf16.msra.mxu0 %v5695_v23 }
 0x41d   :  { %v5921_v37 = vpop.eup %5920  ;;  %v2658_v29 = vmul.f32 %v5919_v22, %v5913_v7  ;;  %5315 = vmatprep.subr.bf16.mxu0 %v5702_v62 }
 0x41e   :  { %5936 = vrcp.f32 %v2582_v2  ;;  %3509 = vmatpush1.bf16.msra.mxu1 %v5703_v12 }
 0x41f   :  { %v5923_v35 = vpop.eup %5922  ;;  %2922 = vmatmul.mubr.bf16.gmra.mxu0 %v2668_v19  ;;  %5938 = vtanh.f32 %v2631_v43  ;;  %3510 = vmatprep.subr.bf16.mxu1 %v5708_v36  ;;  %v7435_v19 = vrot.slane %v2704_v8, %v6984_v47 }
 0x420   :  { %v5925_v52 = vpop.eup %5924  ;;  %2931 = vmatprep.mubr.bf16.mxu0 %v6677_v41  ;;  %v2659_v58 = vmul.f32 %v5923_v35, %v5921_v37  ;;  %5316 = vmatpush3.bf16.msra.mxu0 %v5702_v62 }
 0x421   :  { %v2583_v15 = vadd.f32 1.0, %v5925_v52  ;;  %v5927_v26 = vpop.eup %5926  ;;  %5317 = vmatprep.subr.bf16.mxu0 %v5709_v54  ;;  %v7440_v52 = vrot.slane %v2704_v8, %v6939_v40 }
 0x422   :  { %v2669_v31 = vpack.c.bf16 %v2659_v58, %v2658_v29  ;;  %3511 = vmatpush1.bf16.msra.mxu1 %v5706_v28 }
 0x423   :  { %5940 = vrcp.f32 %v2583_v15  ;;  %3512 = vmatprep.subr.bf16.mxu1 %v5712_v46 }
 0x424   :  { %5300 = vmatmul.mubr.bf16.gmra.mxu1 %v2669_v31  ;;  %v5929_v59 = vpop.eup %5928  ;;  %5318 = vmatpush3.bf16.msra.mxu0 %v5709_v54 }
 0x425   :  { %v5931_v21 = vpop.eup %5930  ;;  %v2660_v10 = vmul.f32 %v5929_v59, %v5927_v26  ;;  %5319 = vmatprep.subr.bf16.mxu0 %v5716_v48 }
 0x426   :  { %3513 = vmatpush1.bf16.msra.mxu1 %v5710_v4 }
 0x427   :  { %2932 = vmatmul.mubr.bf16.gmra.mxu0 %v2669_v31  ;;  %3514 = vmatprep.subr.bf16.mxu1 %v5715_v13 }
 0x428   :  { %v5933_v18 = vpop.eup %5932  ;;  %2941 = vmatprep.mubr.bf16.mxu0 %v6677_v41  ;;  %5320 = vmatpush3.bf16.msra.mxu0 %v5716_v48 }
 0x429   :  { %v2661_v39 = vmul.f32 %v5933_v18, %v5931_v21  ;;  %v5935_v9 = vpop.eup %5934  ;;  %5321 = vmatprep.subr.bf16.mxu0 %v5717_v32 }
 0x42a   :  { %3515 = vmatpush1.bf16.msra.mxu1 %v5713_v17 }
 0x42b   :  { %v2670_v63 = vpack.c.bf16 %v2661_v39, %v2660_v10  ;;  %v5937_v55 = vpop.eup %5936 }
 0x42c   :  { %v5939_v16 = vpop.eup %5938  ;;  %v2662_v61 = vmul.f32 %v5937_v55, %v5935_v9  ;;  %5322 = vmatpush3.bf16.msra.mxu0 %v5717_v32 }
 0x42d   :  { %5303 = vmatprep.mubr.bf16.mxu1 %v2670_v63 }
 0x42f   :  { %2942 = vmatmul.mubr.bf16.gmra.mxu0 %v2670_v63 }
 0x430   :  { %v5941_v11 = vpop.eup %5940  ;;  %2951 = vmatprep.mubr.bf16.mxu0 %v6677_v41 }
 0x431   :  { %v2663_v50 = vmul.f32 %v5941_v11, %v5939_v16 }
 0x433   :  { %v2671_v3 = vpack.c.bf16 %v2663_v50, %v2662_v61 }
 0x435   :  { %5304 = vmatmul.mubr.bf16.gmra.mxu1 %v2671_v3 }
 0x436   :  { %3532 = vmatprep.mubr.bf16.mxu1 %v6677_v41 }
 0x437   :  { %2952 = vmatmul.mubr.bf16.gmra.mxu0 %v2671_v3 }
 0x4bd   :  { %v2883_v57 = vpop.f32.mrf.mxu0 }
 0x4be   :  { %v2884_v49 = vadd.f32 %v2883_v57, %v7430_v0 }
 0x4bf   :  { %v2885_v38 = vpop.f32.mrf.mxu0 }
 0x4c0   :  { %v4919_v60 = vmul.f32 -1.442695, %v2884_v49  ;;  %v2886_v39 = vadd.f32 %v2885_v38, %v7440_v52 }
 0x4c1   :  { %v2887_v30 = vpop.f32.mrf.mxu0 }
 0x4c2   :  { %5942 = vpow2.f32 %v4919_v60  ;;  %v2888_v7 = vadd.f32 %v2887_v30, %v7430_v0 }
 0x4c3   :  { %v2889_v51 = vpop.f32.mrf.mxu0 }
 0x4c4   :  { %v4920_v56 = vmul.f32 -1.442695, %v2888_v7  ;;  %v5293_v22 = vpop.f32.mrf.mxu1  ;;  %v2890_v11 = vadd.f32 %v2889_v51, %v7440_v52 }
 0x4c5   :  { %v2893_v14 = vpop.f32.mrf.mxu0  ;;  %v3005_v37 = vadd.f32 %v5293_v22, %v7435_v19 }
 0x4c6   :  { %5944 = vpow2.f32 %v4920_v56  ;;  %v2894_v2 = vadd.f32 %v2893_v14, %v7430_v0  ;;  %v2996_v35 = vpop.f32.mrf.mxu1 }
 0x4c7   :  { %v2895_v43 = vpop.f32.mrf.mxu0  ;;  %v4937_v58 = vmul.f32 -1.442695, %v3005_v37  ;;  %v2997_v15 = vadd.f32 %v2996_v35, %v7435_v19 }
 0x4c8   :  { %v4921_v29 = vmul.f32 -1.442695, %v2894_v2  ;;  %v5294_v26 = vpop.f32.mrf.mxu1  ;;  %v2896_v6 = vadd.f32 %v2895_v43, %v7440_v52 }
 0x4c9   :  { %v2897_v31 = vpop.f32.mrf.mxu0  ;;  %v4935_v59 = vmul.f32 -1.442695, %v2997_v15  ;;  %v3008_v9 = vadd.f32 %v5294_v26, %v7435_v19 }
 0x4ca   :  { %5946 = vpow2.f32 %v4921_v29  ;;  %v2898_v21 = vadd.f32 %v2897_v31, %v7430_v0  ;;  %v2999_v10 = vpop.f32.mrf.mxu1 }
 0x4cb   :  { %5948 = vpow2.f32 %v4937_v58  ;;  %v2899_v18 = vpop.f32.mrf.mxu0  ;;  %v3000_v55 = vadd.f32 %v2999_v10, %v7435_v19  ;;  %v4938_v25 = vmul.f32 -1.442695, %v3008_v9 }
 0x4cc   :  { %v4922_v63 = vmul.f32 -1.442695, %v2898_v21  ;;  %5950 = vpow2.f32 %v4935_v59  ;;  %v2900_v24 = vadd.f32 %v2899_v18, %v7440_v52 }
 0x4cd   :  { %v4936_v61 = vmul.f32 -1.442695, %v3000_v55 }
 0x4ce   :  { %5952 = vpow2.f32 %v4922_v63 }
 0x4cf   :  { %v5943_v16 = vpop.eup %5942  ;;  %v2903_v50 = vpop.f32.mrf.mxu0  ;;  %5954 = vtanh.f32 %v2886_v39 }
 0x4d0   :  { %v3107_v3 = vadd.f32 1.0, %v5943_v16  ;;  %v2904_v1 = vadd.f32 %v2903_v50, %v7430_v0  ;;  %5956 = vpow2.f32 %v4936_v61 }
 0x4d1   :  { %v2905_v44 = vpop.f32.mrf.mxu0 }
 0x4d2   :  { %5958 = vrcp.f32 %v3107_v3  ;;  %v4923_v27 = vmul.f32 -1.442695, %v2904_v1  ;;  %v2906_v62 = vadd.f32 %v2905_v44, %v7440_v52 }
 0x4d3   :  { %v5945_v5 = vpop.eup %5944  ;;  %5960 = vtanh.f32 %v2890_v11  ;;  %v2907_v53 = vpop.f32.mrf.mxu0 }
 0x4d4   :  { %v3108_v34 = vadd.f32 1.0, %v5945_v5  ;;  %5962 = vpow2.f32 %v4923_v27  ;;  %v2908_v45 = vadd.f32 %v2907_v53, %v7430_v0 }
 0x4d5   :  { %5964 = vpow2.f32 %v4938_v25  ;;  %v2909_v20 = vpop.f32.mrf.mxu0  ;;  %v5297_v33 = vpop.f32.mrf.mxu1 }
 0x4d6   :  { %5966 = vrcp.f32 %v3108_v34  ;;  %v4924_v23 = vmul.f32 -1.442695, %v2908_v45  ;;  %v2910_v54 = vadd.f32 %v2909_v20, %v7440_v52  ;;  %v3021_v13 = vadd.f32 %v5297_v33, %v7435_v19 }
 0x4d7   :  { %v5947_v12 = vpop.eup %5946  ;;  %5968 = vtanh.f32 %v2896_v6  ;;  %v2913_v36 = vpop.f32.mrf.mxu0 }
 0x4d8   :  { %v5949_v28 = vpop.eup %5948  ;;  %v3109_v46 = vadd.f32 1.0, %v5947_v12  ;;  %5970 = vpow2.f32 %v4924_v23  ;;  %v2914_v4 = vadd.f32 %v2913_v36, %v7430_v0  ;;  %v3012_v8 = vpop.f32.mrf.mxu1  ;;  %v4941_v51 = vmul.f32 -1.442695, %v3021_v13 }
 0x4d9   :  { %5972 = vtanh.f32 %v2900_v24  ;;  %v7456_v17 = vpop.f32.mrf.mxu0  ;;  %v5951_v48 = vpop.eup %5950  ;;  %v3221_v49 = vadd.f32 1.0, %v5949_v28  ;;  %v3013_v56 = vadd.f32 %v3012_v8, %v7435_v19 }
 0x4da   :  { %5974 = vrcp.f32 %v3109_v46  ;;  %v4925_v32 = vmul.f32 -1.442695, %v2914_v4  ;;  %v3219_v60 = vadd.f32 1.0, %v5951_v48  ;;  %v5298_v2 = vpop.f32.mrf.mxu1 }
 0x4db   :  { %v5953_v57 = vpop.eup %5952  ;;  %5976 = vtanh.f32 %v2906_v62  ;;  %v2917_v38 = vpop.f32.mrf.mxu0  ;;  %v4939_v26 = vmul.f32 -1.442695, %v3013_v56  ;;  %v3024_v10 = vadd.f32 %v5298_v2, %v7435_v19 }
 0x4dc   :  { %v3110_v30 = vadd.f32 1.0, %v5953_v57  ;;  %5978 = vpow2.f32 %v4925_v32  ;;  %v5955_v7 = vpop.eup %5954  ;;  %v2918_v35 = vadd.f32 %v2917_v38, %v7430_v0  ;;  %v3015_v39 = vpop.f32.mrf.mxu1  ;;  %v2916_v32 = vadd.f32 %v7456_v17, %v7440_v52 }
 0x4dd   :  { %5980 = vtanh.f32 %v2910_v54  ;;  %v7459_v14 = vpop.f32.mrf.mxu0  ;;  %v5957_v22 = vpop.eup %5956  ;;  %v3016_v3 = vadd.f32 %v3015_v39, %v7435_v19  ;;  %v4942_v27 = vmul.f32 -1.442695, %v3024_v10 }
 0x4de   :  { %5982 = vrcp.f32 %v3110_v30  ;;  %v3220_v43 = vadd.f32 1.0, %v5957_v22  ;;  %v4926_v9 = vmul.f32 -1.442695, %v2918_v35 }
 0x4df   :  { %v5959_v37 = vpop.eup %5958  ;;  %5984 = vrcp.f32 %v3221_v49  ;;  %v2923_v29 = vpop.f32.mrf.mxu0  ;;  %v4940_v20 = vmul.f32 -1.442695, %v3016_v3 }
 0x4e0   :  { %v5961_v58 = vpop.eup %5960  ;;  %v3267_v15 = vmul.f32 %v5959_v37, %v5955_v7  ;;  %5986 = vrcp.f32 %v3219_v60  ;;  %v2924_v6 = vadd.f32 %v2923_v29, %v7430_v0  ;;  %v2920_v7 = vadd.f32 %v7459_v14, %v7440_v52 }
 0x4e1   :  { %v5963_v31 = vpop.eup %5962  ;;  %5988 = vpow2.f32 %v4941_v51  ;;  %v7462_v59 = vpop.f32.mrf.mxu0 }
 0x4e2   :  { %v5965_v21 = vpop.eup %5964  ;;  %5990 = vrcp.f32 %v3220_v43  ;;  %v3111_v18 = vadd.f32 1.0, %v5963_v31  ;;  %v4927_v28 = vmul.f32 -1.442695, %v2924_v6  ;;  %v2926_v29 = vadd.f32 %v7462_v59, %v7440_v52 }
 0x4e3   :  { %v5967_v63 = vpop.eup %5966  ;;  %5992 = vtanh.f32 %v3267_v15  ;;  %v2927_v55 = vpop.f32.mrf.mxu0  ;;  %v3222_v50 = vadd.f32 1.0, %v5965_v21 }
 0x4e4   :  { %v5969_v16 = vpop.eup %5968  ;;  %v3268_v11 = vmul.f32 %v5967_v63, %v5961_v58  ;;  %5994 = vrcp.f32 %v3111_v18  ;;  %v2928_v62 = vadd.f32 %v2927_v55, %v7430_v0  ;;  %v7472_v13 = vpop.f32.mrf.mxu1 }
 0x4e5   :  { %v5971_v61 = vpop.eup %5970  ;;  %5996 = vpow2.f32 %v4939_v26  ;;  %v2929_v1 = vpop.f32.mrf.mxu0 }
 0x4e6   :  { %v5973_v25 = vpop.eup %5972  ;;  %5998 = vtanh.f32 %v3268_v11  ;;  %v3112_v44 = vadd.f32 1.0, %v5971_v61  ;;  %v4928_v49 = vmul.f32 -1.442695, %v2928_v62  ;;  %v3028_v51 = vpop.f32.mrf.mxu1  ;;  %v2930_v26 = vadd.f32 %v2929_v1, %v7440_v52 }
 0x4e7   :  { %v5975_v5 = vpop.eup %5974  ;;  %6000 = vpow2.f32 %v4926_v9  ;;  %v2933_v53 = vpop.f32.mrf.mxu0  ;;  %v3029_v63 = vadd.f32 %v3028_v51, %v7435_v19 }
 0x4e8   :  { %v5977_v34 = vpop.eup %5976  ;;  %v3269_v45 = vmul.f32 %v5975_v5, %v5969_v16  ;;  %6002 = vrcp.f32 %v3112_v44  ;;  %v2934_v38 = vadd.f32 %v2933_v53, %v7430_v0  ;;  %v7483_v58 = vpop.f32.mrf.mxu1 }
 0x4e9   :  { %v5979_v24 = vpop.eup %5978  ;;  %6004 = vrcp.f32 %v3222_v50  ;;  %v7467_v23 = vpop.f32.mrf.mxu0  ;;  %v4943_v44 = vmul.f32 -1.442695, %v3029_v63  ;;  %v3040_v51 = vadd.f32 %v7483_v58, %v7435_v19 }
 0x4ea   :  { %v5981_v33 = vpop.eup %5980  ;;  %v3113_v12 = vadd.f32 1.0, %v5979_v24  ;;  %6006 = vpow2.f32 %v4942_v27  ;;  %v4929_v37 = vmul.f32 -1.442695, %v2934_v38  ;;  %v3031_v50 = vpop.f32.mrf.mxu1 }
 0x4eb   :  { %v5983_v36 = vpop.eup %5982  ;;  %6008 = vtanh.f32 %v3269_v45  ;;  %v2937_v46 = vpop.f32.mrf.mxu0  ;;  %v3032_v6 = vadd.f32 %v3031_v50, %v7435_v19 }
 0x4ec   :  { %v7470_v4 = vpop.eup %5984  ;;  %v3270_v54 = vmul.f32 %v5983_v36, %v5973_v25  ;;  %6010 = vrcp.f32 %v3113_v12  ;;  %v2938_v61 = vadd.f32 %v2937_v46, %v7430_v0 }
 0x4ed   :  { %v5987_v48 = vpop.eup %5986  ;;  %6012 = vpow2.f32 %v4940_v20  ;;  %v7476_v8 = vpop.f32.mrf.mxu0 }
 0x4ee   :  { %v5989_v57 = vpop.eup %5988  ;;  %6014 = vtanh.f32 %v3270_v54 }
 0x4ef   :  { %v5991_v60 = vpop.eup %5990  ;;  %6016 = vpow2.f32 %v4927_v28  ;;  %v3225_v22 = vadd.f32 1.0, %v5989_v57  ;;  %v2943_v2 = vpop.f32.mrf.mxu0  ;;  %v3037_v28 = vadd.f32 %v7472_v13, %v7435_v19  ;;  %v4944_v57 = vmul.f32 -1.442695, %v3032_v6 }
 0x4f0   :  { %v5993_v30 = vpop.eup %5992  ;;  %6018 = vtanh.f32 %v2916_v32  ;;  %v2944_v45 = vadd.f32 %v2943_v2, %v7430_v0 }
 0x4f1   :  { %v5995_v56 = vpop.eup %5994  ;;  %6020 = vpow2.f32 %v4928_v49  ;;  %v7486_v21 = vpop.f32.mrf.mxu0  ;;  %v3299_v18 = vmul.f32 %v5993_v30, %v5987_v48  ;;  %v4945_v13 = vmul.f32 -1.442695, %v3037_v28 }
 0x4f2   :  { %v5997_v17 = vpop.eup %5996  ;;  %6022 = vtanh.f32 %v2920_v7  ;;  %v3271_v39 = vmul.f32 %v5995_v56, %v5977_v34  ;;  %v4930_v34 = vmul.f32 -1.442695, %v2938_v61  ;;  %v4931_v38 = vmul.f32 -1.442695, %v2944_v45 }
 0x4f3   :  { %v5999_v43 = vpop.eup %5998  ;;  %6024 = vrcp.f32 %v3225_v22  ;;  %v3223_v11 = vadd.f32 1.0, %v5997_v17  ;;  %v2947_v1 = vpop.f32.mrf.mxu0 }
 0x4f4   :  { %v6001_v35 = vpop.eup %6000  ;;  %v3300_v15 = vmul.f32 %v5999_v43, %v5991_v60  ;;  %6026 = vpow2.f32 %v4929_v37  ;;  %v2948_v60 = vadd.f32 %v2947_v1, %v7430_v0 }
 0x4f5   :  { %v6003_v31 = vpop.eup %6002  ;;  %v3114_v14 = vadd.f32 1.0, %v6001_v35  ;;  %v2949_v12 = vpop.f32.mrf.mxu0 }
 0x4f6   :  { %v6005_v10 = vpop.eup %6004  ;;  %v3272_v55 = vmul.f32 %v6003_v31, %v5981_v33  ;;  %v3315_v59 = vpack.c.bf16 %v3300_v15, %v3299_v18  ;;  %v4932_v43 = vmul.f32 -1.442695, %v2948_v60  ;;  %v4946_v31 = vmul.f32 -1.442695, %v3040_v51 }
 0x4f7   :  { %v6007_v9 = vpop.eup %6006  ;;  %6028 = vrcp.f32 %v3114_v14  ;;  %v2953_v30 = vpop.f32.mrf.mxu0 }
 0x4f8   :  { %v6009_v16 = vpop.eup %6008  ;;  %6030 = vtanh.f32 %v2926_v29  ;;  %3533 = vmatmul.mubr.bf16.vlgmr.msra.gmra.mxu1 %v3315_v59  ;;  %5323 = vmatprep.mubr.bf16.mxu0 %v3315_v59  ;;  %v3226_v20 = vadd.f32 1.0, %v6007_v9  ;;  %v2954_v2 = vadd.f32 %v2953_v30, %v7430_v0  ;;  %v2936_v29 = vadd.f32 %v7467_v23, %v7440_v52  ;;  %v5305_v14 = vpop.f32.mrf.mxu1 }
 0x4f9   :  { %v6011_v3 = vpop.eup %6010  ;;  %6032 = vtanh.f32 %v2930_v26  ;;  %3542 = vmatprep.mubr.bf16.mxu1 %v6677_v41  ;;  %v3301_v62 = vmul.f32 %v6009_v16, %v7470_v4  ;;  %v2946_v9 = vadd.f32 %v7486_v21, %v7440_v52  ;;  %v2950_v23 = vadd.f32 %v2949_v12, %v7440_v52 }
 0x4fa   :  { %v6013_v25 = vpop.eup %6012  ;;  %6034 = vtanh.f32 %v3271_v39  ;;  %v4933_v58 = vmul.f32 -1.442695, %v2954_v2  ;;  %v2955_v39 = vpop.f32.mrf.mxu0 }
 0x4fb   :  { %v6015_v27 = vpop.eup %6014  ;;  %6036 = vtanh.f32 %v3272_v55  ;;  %v3224_v5 = vadd.f32 1.0, %v6013_v25  ;;  %v3044_v59 = vpop.f32.mrf.mxu1  ;;  %v2956_v51 = vadd.f32 %v2955_v39, %v7440_v52 }
 0x4fc   :  { %v6017_v53 = vpop.eup %6016  ;;  %6038 = vrcp.f32 %v3223_v11  ;;  %v3302_v24 = vmul.f32 %v6015_v27, %v6005_v10  ;;  %v2940_v10 = vadd.f32 %v7476_v8, %v7440_v52  ;;  %v2957_v8 = vpop.f32.mrf.mxu0  ;;  %v3053_v27 = vadd.f32 %v5305_v14, %v7435_v19 }
 0x4fd   :  { %6040 = vrcp.f32 %v3224_v5  ;;  %v3115_v33 = vadd.f32 1.0, %v6017_v53  ;;  %v6019_v36 = vpop.eup %6018  ;;  %v3045_v6 = vadd.f32 %v3044_v59, %v7435_v19  ;;  %v5306_v53 = vpop.f32.mrf.mxu1 }
 0x4fe   :  { %6042 = vpow2.f32 %v4943_v44  ;;  %v6021_v46 = vpop.eup %6020  ;;  %v3273_v54 = vmul.f32 %v6019_v36, %v6011_v3  ;;  %v3316_v48 = vpack.c.bf16 %v3302_v24, %v3301_v62  ;;  %v2958_v24 = vadd.f32 %v2957_v8, %v7430_v0  ;;  %v2959_v39 = vpop.f32.mrf.mxu0 }
 0x4ff   :  { %6044 = vrcp.f32 %v3115_v33  ;;  %v3116_v32 = vadd.f32 1.0, %v6021_v46  ;;  %v6023_v49 = vpop.eup %6022  ;;  %v4949_v62 = vmul.f32 -1.442695, %v3053_v27  ;;  %v4947_v46 = vmul.f32 -1.442695, %v3045_v6 }
 0x500   :  { %6046 = vpow2.f32 %v4930_v34  ;;  %3543 = vmatmul.mubr.bf16.gmra.mxu1 %v3316_v48  ;;  %5324 = vmatmul.mubr.bf16.vlgmr.msra.gmra.mxu0 %v3316_v48  ;;  %v7497_v4 = vpop.eup %6024 }
 0x501   :  { %6048 = vrcp.f32 %v3226_v20  ;;  %3552 = vmatprep.mubr.bf16.mxu1 %v6677_v41  ;;  %v6027_v7 = vpop.eup %6026 }
 0x502   :  { %6050 = vrcp.f32 %v3116_v32  ;;  %v3117_v22 = vadd.f32 1.0, %v6027_v7  ;;  %v4934_v32 = vmul.f32 -1.442695, %v2958_v24 }
 0x503   :  { %6052 = vtanh.f32 %v3273_v54  ;;  %v3047_v54 = vpop.f32.mrf.mxu1 }
 0x504   :  { %v6029_v56 = vpop.eup %6028  ;;  %6054 = vpow2.f32 %v4944_v57  ;;  %v3048_v30 = vadd.f32 %v3047_v54, %v7435_v19 }
 0x505   :  { %v6031_v17 = vpop.eup %6030  ;;  %v3274_v37 = vmul.f32 %v6029_v56, %v6023_v49  ;;  %6056 = vpow2.f32 %v4931_v38 }
 0x506   :  { %v6033_v35 = vpop.eup %6032  ;;  %6058 = vpow2.f32 %v4945_v13 }
 0x507   :  { %v6035_v15 = vpop.eup %6034  ;;  %6060 = vtanh.f32 %v3274_v37 }
 0x508   :  { %v6037_v26 = vpop.eup %6036  ;;  %6062 = vrcp.f32 %v3117_v22 }
 0x509   :  { %v6039_v18 = vpop.eup %6038  ;;  %6064 = vpow2.f32 %v4932_v43  ;;  %v4948_v43 = vmul.f32 -1.442695, %v3048_v30 }
 0x50a   :  { %v6041_v63 = vpop.eup %6040  ;;  %6066 = vtanh.f32 %v2936_v29  ;;  %v3303_v16 = vmul.f32 %v6039_v18, %v6035_v15  ;;  %v3056_v15 = vadd.f32 %v5306_v53, %v7435_v19 }
 0x50b   :  { %v6043_v55 = vpop.eup %6042  ;;  %6068 = vpow2.f32 %v4946_v31  ;;  %v3304_v11 = vmul.f32 %v6041_v63, %v6037_v26 }
 0x50c   :  { %v6045_v61 = vpop.eup %6044  ;;  %6070 = vpow2.f32 %v4933_v58  ;;  %v3227_v5 = vadd.f32 1.0, %v6043_v55 }
 0x50d   :  { %v6047_v50 = vpop.eup %6046  ;;  %v3275_v3 = vmul.f32 %v6045_v61, %v6031_v17  ;;  %6072 = vtanh.f32 %v2940_v10  ;;  %v3317_v1 = vpack.c.bf16 %v3304_v11, %v3303_v16  ;;  %v4950_v10 = vmul.f32 -1.442695, %v3056_v15  ;;  %v5727_v15 = vld [vmem:[#allocation13 + $0xb0] ss:$12 sps:$4 sm:$0xff]  }
 0x50e   :  { %v6049_v25 = vpop.eup %6048  ;;  %v3118_v44 = vadd.f32 1.0, %v6047_v50  ;;  %6074 = vtanh.f32 %v2946_v9  ;;  %5339 = vmatprep.subr.bf16.mxu1 %v5727_v15 }
 0x50f   :  { %v6051_v21 = vpop.eup %6050  ;;  %6076 = vtanh.f32 %v2950_v23  ;;  %3553 = vmatmul.mubr.bf16.gmra.mxu1 %v3317_v1  ;;  %5327 = vmatprep.mubr.bf16.mxu0 %v3317_v1  ;;  %v2960_v23 = vadd.f32 %v2959_v39, %v7440_v52  ;;  %v5732_v39 = vld [vmem:[#allocation13 + $0x48] ss:$12 sps:$4 sm:$0xff]  }
 0x510   :  { %v6053_v34 = vpop.eup %6052  ;;  %v3276_v45 = vmul.f32 %v6051_v21, %v6033_v35  ;;  %6078 = vrcp.f32 %v3118_v44  ;;  %3562 = vmatprep.mubr.bf16.mxu1 %v6677_v41  ;;  %5340 = vmatpush3.bf16.msra.mxu1 %v5727_v15 }
 0x511   :  { %v6055_v20 = vpop.eup %6054  ;;  %6080 = vtanh.f32 %v3275_v3  ;;  %v3305_v0 = vmul.f32 %v6053_v34, %v7497_v4 }
 0x512   :  { %v6057_v33 = vpop.eup %6056  ;;  %6082 = vtanh.f32 %v3276_v45  ;;  %v3228_v12 = vadd.f32 1.0, %v6055_v20 }
 0x513   :  { %v6059_v36 = vpop.eup %6058  ;;  %6084 = vrcp.f32 %v3227_v5  ;;  %v3119_v28 = vadd.f32 1.0, %v6057_v33 }
 0x514   :  { %v6061_v48 = vpop.eup %6060  ;;  %6086 = vrcp.f32 %v3228_v12  ;;  %v3229_v60 = vadd.f32 1.0, %v6059_v36 }
 0x515   :  { %v6063_v57 = vpop.eup %6062  ;;  %6088 = vrcp.f32 %v3119_v28  ;;  %v3306_v49 = vmul.f32 %v6061_v48, %v6049_v25 }
 0x516   :  { %v6065_v38 = vpop.eup %6064  ;;  %6090 = vpow2.f32 %v4949_v62 }
 0x517   :  { %v6067_v13 = vpop.eup %6066  ;;  %v3120_v7 = vadd.f32 1.0, %v6065_v38  ;;  %6092 = vpow2.f32 %v4947_v46  ;;  %v3318_v56 = vpack.c.bf16 %v3306_v49, %v3305_v0 }
 0x518   :  { %v6069_v22 = vpop.eup %6068  ;;  %6094 = vpow2.f32 %v4934_v32  ;;  %v3277_v17 = vmul.f32 %v6067_v13, %v6063_v57 }
 0x519   :  { %v6071_v2 = vpop.eup %6070  ;;  %6096 = vrcp.f32 %v3120_v7  ;;  %3563 = vmatmul.mubr.bf16.gmra.mxu1 %v3318_v56  ;;  %5328 = vmatmul.mubr.bf16.gmra.mxu0 %v3318_v56  ;;  %v3230_v29 = vadd.f32 1.0, %v6069_v22 }
 0x51a   :  { %v6073_v4 = vpop.eup %6072  ;;  %6098 = vrcp.f32 %v3229_v60  ;;  %v3121_v37 = vadd.f32 1.0, %v6071_v2  ;;  %3572 = vmatprep.mubr.bf16.mxu1 %v6677_v41 }
 0x51b   :  { %v6075_v35 = vpop.eup %6074  ;;  %6100 = vtanh.f32 %v2956_v51 }
 0x51c   :  { %v6077_v31 = vpop.eup %6076  ;;  %6102 = vrcp.f32 %v3121_v37  ;;  %v5718_v37 = vld [vmem:[#allocation13 + $0xa8] ss:$12 sps:$4 sm:$0xff]  }
 0x51d   :  { %v6079_v14 = vpop.eup %6078  ;;  %6104 = vtanh.f32 %v3277_v17 }
 0x51e   :  { %v6081_v26 = vpop.eup %6080  ;;  %v3278_v58 = vmul.f32 %v6079_v14, %v6073_v4  ;;  %6106 = vpow2.f32 %v4948_v43  ;;  %v5720_v4 = vld [vmem:[#allocation13 + $0xac] ss:$12 sps:$4 sm:$0xff]   ;;  %v5723_v43 = vld [vmem:[#allocation13 + $0x94] ss:$12 sps:$4 sm:$0xff]   ;;  %v5730_v14 = vld [vmem:[#allocation13 + $0x64] ss:$12 sps:$4 sm:$0xff]  }
 0x51f   :  { %v6083_v18 = vpop.eup %6082  ;;  %6108 = vrcp.f32 %v3230_v29  ;;  %4151 = vmatprep.subr.bf16.mxu0 %v5720_v4  ;;  %v5726_v29 = vld [vmem:[#allocation13 + $0x7c] ss:$12 sps:$4 sm:$0xff]  }
 0x520   :  { %v6085_v63 = vpop.eup %6084  ;;  %6110 = vtanh.f32 %v3278_v58  ;;  %4152 = vmatpush1.bf16.msra.mxu0 %v5718_v37  ;;  %v5728_v58 = vld [vmem:[#allocation13 + $0x60] ss:$12 sps:$4 sm:$0xff]  }
 0x521   :  { %v6087_v9 = vpop.eup %6086  ;;  %v3307_v59 = vmul.f32 %v6085_v63, %v6081_v26  ;;  %6112 = vpow2.f32 %v4950_v10  ;;  %4153 = vmatprep.subr.bf16.mxu0 %v5723_v43  ;;  %v5731_v26 = vld [vmem:[#allocation13 + $0x98] ss:$12 sps:$4 sm:$0xff]   ;;  %v5735_v10 = vld [vmem:[#allocation13 + $0x80] ss:$12 sps:$4 sm:$0xff]  }
 0x522   :  { %v6089_v55 = vpop.eup %6088  ;;  %v3308_v16 = vmul.f32 %v6087_v9, %v6083_v18  ;;  %5341 = vmatprep.subr.bf16.mxu1 %v5731_v26  ;;  %v5734_v18 = vld [vmem:[#allocation13 + $0x4c] ss:$12 sps:$4 sm:$0xff]   ;;  %v5738_v63 = vld [vmem:[#allocation13 + $0x34] ss:$12 sps:$4 sm:$0xff]  }
 0x523   :  { %v6091_v19 = vpop.eup %6090  ;;  %v3279_v11 = vmul.f32 %v6089_v55, %v6075_v35  ;;  %v5721_v35 = vld [vmem:[#allocation13 + $0x90] ss:$12 sps:$4 sm:$0xff]   ;;  %5342 = vmatpush3.bf16.msra.mxu1 %v5731_v26  ;;  %v5739_v9 = vld [vmem:[#allocation13 + $0x68] ss:$12 sps:$4 sm:$0xff]  }
 0x524   :  { %v6093_v61 = vpop.eup %6092  ;;  %v3319_v50 = vpack.c.bf16 %v3308_v16, %v3307_v59  ;;  %v3233_v25 = vadd.f32 1.0, %v6091_v19  ;;  %4154 = vmatpush1.bf16.msra.mxu0 %v5721_v35  ;;  %5343 = vmatprep.subr.bf16.mxu1 %v5735_v10  ;;  %v5736_v55 = vld [vmem:[#allocation13 + $0x30] ss:$12 sps:$4 sm:$0xff]   ;;  %v5740_v16 = vld [vmem:[#allocation13 + $0x18] ss:$12 sps:$4 sm:$0xff]  }
 0x525   :  { %v6095_v3 = vpop.eup %6094  ;;  %6114 = vtanh.f32 %v3279_v11  ;;  %v3231_v8 = vadd.f32 1.0, %v6093_v61  ;;  %4155 = vmatprep.subr.bf16.mxu0 %v5726_v29  ;;  %v5743_v59 = vld [vmem:[#allocation13 + $0x50] ss:$12 sps:$4 sm:$0xff]   ;;  %v5747_v11 = vld [vmem:[#allocation13 + $0x38] ss:$12 sps:$4 sm:$0xff]  }
 0x526   :  { %v6097_v1 = vpop.eup %6096  ;;  %v3122_v44 = vadd.f32 1.0, %v6095_v3  ;;  %6116 = vtanh.f32 %v2960_v23  ;;  %3573 = vmatmul.mubr.bf16.gmra.mxu1 %v3319_v50  ;;  %5331 = vmatprep.mubr.bf16.mxu0 %v3319_v50  ;;  %v5742_v23 = vld [vmem:[#allocation13 + $0x1c] ss:$12 sps:$4 sm:$0xff]   ;;  %v5746_v19 = vld [vmem:[#allocation13 + $0x4] ss:$12 sps:$4 sm:$0xff]  }
 0x527   :  { %v6099_v27 = vpop.eup %6098  ;;  %v3280_v21 = vmul.f32 %v6097_v1, %v6077_v31  ;;  %6118 = vrcp.f32 %v3231_v8  ;;  %3582 = vmatprep.mubr.bf16.mxu1 %v6677_v41  ;;  %v5724_v31 = vld [vmem:[#allocation13 + $0x78] ss:$12 sps:$4 sm:$0xff]   ;;  %5344 = vmatpush3.bf16.msra.mxu1 %v5735_v10  ;;  %v5744_v61 = vld [vmem:[#allocation13] ss:$12 sps:$4 sm:$0xff]   ;;  %v5749_v3 = vld [vmem:[#allocation13 + $0x8] ss:$12 sps:$4 sm:$0xff]  }
 0x528   :  { %v6101_v52 = vpop.eup %6100  ;;  %6120 = vrcp.f32 %v3122_v44  ;;  %4156 = vmatpush1.bf16.msra.mxu0 %v5724_v31  ;;  %5345 = vmatprep.subr.bf16.mxu1 %v5739_v9  ;;  %v5748_v50 = vld [vmem:[#allocation13 + $0x20] ss:$12 sps:$4 sm:$0xff]   ;;  %v3355_v8 = vld [vmem:[%s7762_s12] sm:$0x7] }
 0x529   :  { %v6103_v5 = vpop.eup %6102  ;;  %6122 = vrcp.f32 %v3233_v25  ;;  %4157 = vmatprep.subr.bf16.mxu0 %v5730_v14  ;;  %v7528_v1 = vrot.slane %v3355_v8, %v6942_v42 }
 0x52a   :  { %v6105_v6 = vpop.eup %6104  ;;  %v3281_v53 = vmul.f32 %v6103_v5, %v6101_v52  ;;  %6124 = vtanh.f32 %v3280_v21 }
 0x52b   :  { %v6107_v34 = vpop.eup %6106  ;;  %v3309_v33 = vmul.f32 %v6105_v6, %v6099_v27  ;;  %5346 = vmatpush3.bf16.msra.mxu1 %v5739_v9  ;;  %v7533_v6 = vrot.slane %v3355_v8, %v6984_v47 }
 0x52c   :  { %v6109_v45 = vpop.eup %6108  ;;  %6126 = vtanh.f32 %v3281_v53  ;;  %v3232_v24 = vadd.f32 1.0, %v6107_v34  ;;  %4158 = vmatpush1.bf16.msra.mxu0 %v5728_v58  ;;  %5347 = vmatprep.subr.bf16.mxu1 %v5743_v59 }
 0x52d   :  { %v6111_v20 = vpop.eup %6110  ;;  %4159 = vmatprep.subr.bf16.mxu0 %v5734_v18 }
 0x52e   :  { %6128 = vrcp.f32 %v3232_v24  ;;  %v3310_v12 = vmul.f32 %v6111_v20, %v6109_v45  ;;  %v6113_v62 = vpop.eup %6112 }
 0x52f   :  { %v3234_v54 = vadd.f32 1.0, %v6113_v62  ;;  %5348 = vmatpush3.bf16.msra.mxu1 %v5743_v59 }
 0x530   :  { %v3320_v36 = vpack.c.bf16 %v3310_v12, %v3309_v33  ;;  %4160 = vmatpush1.bf16.msra.mxu0 %v5732_v39  ;;  %5349 = vmatprep.subr.bf16.mxu1 %v5747_v11 }
 0x531   :  { %6130 = vrcp.f32 %v3234_v54  ;;  %4161 = vmatprep.subr.bf16.mxu0 %v5738_v63 }
 0x532   :  { %v6115_v28 = vpop.eup %6114  ;;  %3583 = vmatmul.mubr.bf16.gmra.mxu1 %v3320_v36  ;;  %5332 = vmatmul.mubr.bf16.gmra.mxu0 %v3320_v36  ;;  %v7538_v36 = vrot.slane %v3355_v8, %v6939_v40 }
 0x533   :  { %v6117_v46 = vpop.eup %6116  ;;  %3592 = vmatprep.mubr.bf16.mxu1 %v6677_v41  ;;  %5350 = vmatpush3.bf16.msra.mxu1 %v5747_v11 }
 0x534   :  { %v6119_v48 = vpop.eup %6118  ;;  %4162 = vmatpush1.bf16.msra.mxu0 %v5736_v55  ;;  %5351 = vmatprep.subr.bf16.mxu1 %v5748_v50 }
 0x535   :  { %v6121_v32 = vpop.eup %6120  ;;  %v3311_v57 = vmul.f32 %v6119_v48, %v6115_v28  ;;  %4163 = vmatprep.subr.bf16.mxu0 %v5742_v23 }
 0x536   :  { %v3282_v0 = vmul.f32 %v6121_v32, %v6117_v46  ;;  %v6123_v49 = vpop.eup %6122 }
 0x537   :  { %v6125_v38 = vpop.eup %6124  ;;  %5352 = vmatpush3.bf16.msra.mxu1 %v5748_v50 }
 0x538   :  { %6132 = vtanh.f32 %v3282_v0  ;;  %4164 = vmatpush1.bf16.msra.mxu0 %v5740_v16  ;;  %5353 = vmatprep.subr.bf16.mxu1 %v5749_v3 }
 0x539   :  { %v6127_v60 = vpop.eup %6126  ;;  %4165 = vmatprep.subr.bf16.mxu0 %v5746_v19 }
 0x53a   :  { %v3313_v30 = vmul.f32 %v6127_v60, %v6123_v49 }
 0x53b   :  { %v6129_v13 = vpop.eup %6128  ;;  %5354 = vmatpush3.bf16.msra.mxu1 %v5749_v3 }
 0x53c   :  { %v3312_v7 = vmul.f32 %v6129_v13, %v6125_v38  ;;  %4166 = vmatpush1.bf16.msra.mxu0 %v5744_v61 }
 0x53e   :  { %v3321_v51 = vpack.c.bf16 %v3312_v7, %v3311_v57  ;;  %v6131_v56 = vpop.eup %6130 }
 0x540   :  { %3593 = vmatmul.mubr.bf16.gmra.mxu1 %v3321_v51  ;;  %5335 = vmatprep.mubr.bf16.mxu0 %v3321_v51 }
 0x541   :  { %3602 = vmatprep.mubr.bf16.mxu1 %v6677_v41 }
 0x545   :  { %v6133_v22 = vpop.eup %6132 }
 0x546   :  { %v3314_v2 = vmul.f32 %v6133_v22, %v6131_v56 }
 0x548   :  { %v3322_v17 = vpack.c.bf16 %v3314_v2, %v3313_v30 }
 0x54a   :  { %3603 = vmatmul.mubr.bf16.gmra.mxu1 %v3322_v17  ;;  %5336 = vmatmul.mubr.bf16.gmra.mxu0 %v3322_v17 }
 0x54b   :  { %4183 = vmatprep.mubr.bf16.mxu0 %v6677_v41 }
 0x5b8   :  { %v3534_v25 = vpop.f32.mrf.mxu1 }
 0x5b9   :  { %v3535_v44 = vadd.f32 %v3534_v25, %v7528_v1 }
 0x5ba   :  { %v3536_v27 = vpop.f32.mrf.mxu1 }
 0x5bb   :  { %v4975_v21 = vmul.f32 -1.442695, %v3535_v44  ;;  %v3537_v60 = vadd.f32 %v3536_v27, %v7538_v36 }
 0x5bc   :  { %v3538_v52 = vpop.f32.mrf.mxu1 }
 0x5bd   :  { %6134 = vpow2.f32 %v4975_v21  ;;  %v3539_v5 = vadd.f32 %v3538_v52, %v7528_v1 }
 0x5be   :  { %v3540_v53 = vpop.f32.mrf.mxu1 }
 0x5bf   :  { %v4976_v34 = vmul.f32 -1.442695, %v3539_v5  ;;  %v3541_v17 = vadd.f32 %v3540_v53, %v7538_v36 }
 0x5c0   :  { %v3544_v45 = vpop.f32.mrf.mxu1  ;;  %v5325_v24 = vpop.f32.mrf.mxu0 }
 0x5c1   :  { %6136 = vpow2.f32 %v4976_v34  ;;  %v3545_v20 = vadd.f32 %v3544_v45, %v7528_v1  ;;  %v3656_v33 = vadd.f32 %v5325_v24, %v7533_v6 }
 0x5c2   :  { %v3546_v12 = vpop.f32.mrf.mxu1  ;;  %v3647_v62 = vpop.f32.mrf.mxu0 }
 0x5c3   :  { %v4977_v28 = vmul.f32 -1.442695, %v3545_v20  ;;  %v4993_v46 = vmul.f32 -1.442695, %v3656_v33  ;;  %v3648_v54 = vadd.f32 %v3647_v62, %v7533_v6  ;;  %v3547_v14 = vadd.f32 %v3546_v12, %v7538_v36 }
 0x5c4   :  { %v3548_v48 = vpop.f32.mrf.mxu1  ;;  %v5326_v32 = vpop.f32.mrf.mxu0 }
 0x5c5   :  { %6138 = vpow2.f32 %v4977_v28  ;;  %v4991_v57 = vmul.f32 -1.442695, %v3648_v54  ;;  %v3549_v0 = vadd.f32 %v3548_v48, %v7528_v1  ;;  %v3659_v49 = vadd.f32 %v5326_v32, %v7533_v6 }
 0x5c6   :  { %v3650_v38 = vpop.f32.mrf.mxu0  ;;  %6140 = vpow2.f32 %v4993_v46  ;;  %v3550_v56 = vpop.f32.mrf.mxu1 }
 0x5c7   :  { %v4978_v30 = vmul.f32 -1.442695, %v3549_v0  ;;  %v4994_v13 = vmul.f32 -1.442695, %v3659_v49  ;;  %6142 = vpow2.f32 %v4991_v57  ;;  %v3651_v7 = vadd.f32 %v3650_v38, %v7533_v6 }
 0x5c8   :  { %v3551_v39 = vadd.f32 %v3550_v56, %v7538_v36 }
 0x5c9   :  { %6144 = vpow2.f32 %v4978_v30  ;;  %v4992_v22 = vmul.f32 -1.442695, %v3651_v7 }
 0x5ca   :  { %v6135_v51 = vpop.eup %6134  ;;  %6146 = vpow2.f32 %v4994_v13 }
 0x5cb   :  { %v3758_v2 = vadd.f32 1.0, %v6135_v51  ;;  %6148 = vtanh.f32 %v3537_v60 }
 0x5cc   :  { %6150 = vpow2.f32 %v4992_v22 }
 0x5cd   :  { %6152 = vrcp.f32 %v3758_v2 }
 0x5ce   :  { %v6137_v4 = vpop.eup %6136  ;;  %6154 = vtanh.f32 %v3541_v17 }
 0x5cf   :  { %v3554_v37 = vpop.f32.mrf.mxu1  ;;  %v3759_v43 = vadd.f32 1.0, %v6137_v4 }
 0x5d0   :  { %v3555_v35 = vadd.f32 %v3554_v37, %v7528_v1 }
 0x5d1   :  { %v3556_v29 = vpop.f32.mrf.mxu1  ;;  %6156 = vrcp.f32 %v3759_v43 }
 0x5d2   :  { %v4979_v15 = vmul.f32 -1.442695, %v3555_v35  ;;  %v6139_v31 = vpop.eup %6138  ;;  %v3557_v59 = vadd.f32 %v3556_v29, %v7538_v36 }
 0x5d3   :  { %v3558_v26 = vpop.f32.mrf.mxu1  ;;  %v3760_v58 = vadd.f32 1.0, %v6139_v31  ;;  %v6141_v10 = vpop.eup %6140 }
 0x5d4   :  { %6158 = vpow2.f32 %v4979_v15  ;;  %v3559_v18 = vadd.f32 %v3558_v26, %v7528_v1  ;;  %v6143_v9 = vpop.eup %6142  ;;  %v3872_v19 = vadd.f32 1.0, %v6141_v10 }
 0x5d5   :  { %v3560_v63 = vpop.f32.mrf.mxu1  ;;  %6160 = vrcp.f32 %v3760_v58  ;;  %v3870_v50 = vadd.f32 1.0, %v6143_v9 }
 0x5d6   :  { %v4980_v55 = vmul.f32 -1.442695, %v3559_v18  ;;  %v6145_v23 = vpop.eup %6144  ;;  %6162 = vtanh.f32 %v3547_v14  ;;  %v3561_v46 = vadd.f32 %v3560_v63, %v7538_v36 }
 0x5d7   :  { %v6147_v16 = vpop.eup %6146  ;;  %v3761_v11 = vadd.f32 1.0, %v6145_v23 }
 0x5d8   :  { %6164 = vpow2.f32 %v4980_v55  ;;  %v6149_v61 = vpop.eup %6148  ;;  %v3873_v44 = vadd.f32 1.0, %v6147_v16 }
 0x5d9   :  { %6166 = vtanh.f32 %v3551_v39  ;;  %v3564_v3 = vpop.f32.mrf.mxu1  ;;  %v5329_v8 = vpop.f32.mrf.mxu0 }
 0x5da   :  { %v6151_v25 = vpop.eup %6150  ;;  %6168 = vrcp.f32 %v3761_v11  ;;  %v3565_v27 = vadd.f32 %v3564_v3, %v7528_v1  ;;  %v3672_v54 = vadd.f32 %v5329_v8, %v7533_v6 }
 0x5db   :  { %v6153_v21 = vpop.eup %6152  ;;  %6170 = vtanh.f32 %v3557_v59  ;;  %v3566_v52 = vpop.f32.mrf.mxu1  ;;  %v3871_v45 = vadd.f32 1.0, %v6151_v25 }
 0x5dc   :  { %v3663_v5 = vpop.f32.mrf.mxu0  ;;  %v3918_v53 = vmul.f32 %v6153_v21, %v6149_v61  ;;  %6172 = vrcp.f32 %v3872_v19  ;;  %v4981_v34 = vmul.f32 -1.442695, %v3565_v27  ;;  %v6155_v33 = vpop.eup %6154  ;;  %v4997_v13 = vmul.f32 -1.442695, %v3672_v54 }
 0x5dd   :  { %6174 = vrcp.f32 %v3870_v50  ;;  %v3568_v24 = vpop.f32.mrf.mxu1  ;;  %v3664_v12 = vadd.f32 %v3663_v5, %v7533_v6  ;;  %v3567_v23 = vadd.f32 %v3566_v52, %v7538_v36 }
 0x5de   :  { %v5330_v20 = vpop.f32.mrf.mxu0  ;;  %6176 = vrcp.f32 %v3873_v44  ;;  %v3569_v62 = vadd.f32 %v3568_v24, %v7528_v1  ;;  %v6157_v28 = vpop.eup %6156 }
 0x5df   :  { %6178 = vpow2.f32 %v4981_v34  ;;  %v3919_v48 = vmul.f32 %v6157_v28, %v6155_v33  ;;  %v4995_v38 = vmul.f32 -1.442695, %v3664_v12  ;;  %v3570_v60 = vpop.f32.mrf.mxu1  ;;  %v3675_v4 = vadd.f32 %v5330_v20, %v7533_v6 }
 0x5e0   :  { %6180 = vtanh.f32 %v3918_v53  ;;  %v3666_v32 = vpop.f32.mrf.mxu0  ;;  %v4982_v0 = vmul.f32 -1.442695, %v3569_v62  ;;  %v3571_v8 = vadd.f32 %v3570_v60, %v7538_v36 }
 0x5e1   :  { %v6159_v57 = vpop.eup %6158  ;;  %6182 = vrcp.f32 %v3871_v45  ;;  %v3667_v7 = vadd.f32 %v3666_v32, %v7533_v6  ;;  %v4998_v10 = vmul.f32 -1.442695, %v3675_v4 }
 0x5e2   :  { %6184 = vtanh.f32 %v3919_v48  ;;  %v3762_v49 = vadd.f32 1.0, %v6159_v57  ;;  %v6161_v30 = vpop.eup %6160 }
 0x5e3   :  { %6186 = vtanh.f32 %v3561_v46  ;;  %v6163_v51 = vpop.eup %6162  ;;  %v4996_v35 = vmul.f32 -1.442695, %v3667_v7 }
 0x5e4   :  { %6188 = vrcp.f32 %v3762_v49  ;;  %v3920_v22 = vmul.f32 %v6163_v51, %v6161_v30 }
 0x5e5   :  { %v6165_v56 = vpop.eup %6164  ;;  %6190 = vpow2.f32 %v4982_v0 }
 0x5e6   :  { %v6167_v2 = vpop.eup %6166  ;;  %v3763_v17 = vadd.f32 1.0, %v6165_v56  ;;  %6192 = vpow2.f32 %v4995_v38  ;;  %v3574_v37 = vpop.f32.mrf.mxu1 }
 0x5e7   :  { %v6169_v43 = vpop.eup %6168  ;;  %6194 = vpow2.f32 %v4997_v13  ;;  %v3575_v29 = vadd.f32 %v3574_v37, %v7528_v1 }
 0x5e8   :  { %v6171_v15 = vpop.eup %6170  ;;  %v3921_v31 = vmul.f32 %v6169_v43, %v6167_v2  ;;  %6196 = vrcp.f32 %v3763_v17  ;;  %v3576_v14 = vpop.f32.mrf.mxu1 }
 0x5e9   :  { %v7559_v26 = vpop.eup %6172  ;;  %6198 = vtanh.f32 %v3920_v22  ;;  %v4983_v58 = vmul.f32 -1.442695, %v3575_v29  ;;  %v3577_v52 = vadd.f32 %v3576_v14, %v7538_v36 }
 0x5ea   :  { %v6175_v18 = vpop.eup %6174  ;;  %6200 = vtanh.f32 %v3921_v31  ;;  %v3578_v39 = vpop.f32.mrf.mxu1 }
 0x5eb   :  { %v6177_v63 = vpop.eup %6176  ;;  %6202 = vpow2.f32 %v4996_v35  ;;  %v3579_v9 = vadd.f32 %v3578_v39, %v7528_v1 }
 0x5ec   :  { %v6179_v55 = vpop.eup %6178  ;;  %6204 = vpow2.f32 %v4983_v58  ;;  %v3580_v61 = vpop.f32.mrf.mxu1 }
 0x5ed   :  { %v6181_v59 = vpop.eup %6180  ;;  %v3764_v16 = vadd.f32 1.0, %v6179_v55  ;;  %v4984_v19 = vmul.f32 -1.442695, %v3579_v9  ;;  %6206 = vpow2.f32 %v4998_v10  ;;  %v3581_v37 = vadd.f32 %v3580_v61, %v7538_v36 }
 0x5ee   :  { %v6183_v11 = vpop.eup %6182  ;;  %v3950_v25 = vmul.f32 %v6181_v59, %v6175_v18 }
 0x5ef   :  { %v6185_v50 = vpop.eup %6184  ;;  %6208 = vrcp.f32 %v3764_v16 }
 0x5f0   :  { %v6187_v3 = vpop.eup %6186  ;;  %6210 = vtanh.f32 %v3567_v23  ;;  %v3951_v44 = vmul.f32 %v6185_v50, %v6183_v11 }
 0x5f1   :  { %v6189_v27 = vpop.eup %6188  ;;  %6212 = vpow2.f32 %v4984_v19 }
 0x5f2   :  { %v6191_v21 = vpop.eup %6190  ;;  %v3584_v5 = vpop.f32.mrf.mxu1  ;;  %v3966_v34 = vpack.c.bf16 %v3951_v44, %v3950_v25  ;;  %v3922_v24 = vmul.f32 %v6189_v27, %v6171_v15  ;;  %6214 = vtanh.f32 %v3571_v8 }
 0x5f3   :  { %v5333_v53 = vpop.f32.mrf.mxu0  ;;  %v6193_v45 = vpop.eup %6192  ;;  %v3765_v20 = vadd.f32 1.0, %v6191_v21  ;;  %v3585_v33 = vadd.f32 %v3584_v5, %v7528_v1 }
 0x5f4   :  { %v6195_v12 = vpop.eup %6194  ;;  %v7566_v62 = vpop.f32.mrf.mxu1  ;;  %4184 = vmatmul.mubr.bf16.vlgmr.msra.gmra.mxu0 %v3966_v34  ;;  %5355 = vmatprep.mubr.bf16.mxu1 %v3966_v34  ;;  %v3874_v57 = vadd.f32 1.0, %v6193_v45  ;;  %v3688_v9 = vadd.f32 %v5333_v53, %v7533_v6 }
 0x5f5   :  { %v3679_v28 = vpop.f32.mrf.mxu0  ;;  %v6197_v46 = vpop.eup %6196  ;;  %6216 = vrcp.f32 %v3765_v20  ;;  %v4985_v54 = vmul.f32 -1.442695, %v3585_v33  ;;  %4193 = vmatprep.mubr.bf16.mxu0 %v6677_v41  ;;  %v3876_v13 = vadd.f32 1.0, %v6195_v12  ;;  %v3587_v12 = vadd.f32 %v7566_v62, %v7538_v36 }
 0x5f6   :  { %v6199_v48 = vpop.eup %6198  ;;  %v3923_v32 = vmul.f32 %v6197_v46, %v6187_v3  ;;  %6218 = vtanh.f32 %v3577_v52  ;;  %v3588_v0 = vpop.f32.mrf.mxu1  ;;  %v3680_v60 = vadd.f32 %v3679_v28, %v7533_v6  ;;  %v5001_v44 = vmul.f32 -1.442695, %v3688_v9 }
 0x5f7   :  { %v5334_v49 = vpop.f32.mrf.mxu0  ;;  %v6201_v38 = vpop.eup %6200  ;;  %6220 = vtanh.f32 %v3922_v24  ;;  %v3589_v7 = vadd.f32 %v3588_v0, %v7528_v1  ;;  %v3952_v17 = vmul.f32 %v6199_v48, %v7559_v26 }
 0x5f8   :  { %v6203_v30 = vpop.eup %6202  ;;  %6222 = vtanh.f32 %v3923_v32  ;;  %v3953_v51 = vmul.f32 %v6201_v38, %v6177_v63  ;;  %v4999_v35 = vmul.f32 -1.442695, %v3680_v60  ;;  %v3590_v14 = vpop.f32.mrf.mxu1  ;;  %v3691_v16 = vadd.f32 %v5334_v49, %v7533_v6 }
 0x5f9   :  { %v6205_v56 = vpop.eup %6204  ;;  %v3875_v22 = vadd.f32 1.0, %v6203_v30  ;;  %6224 = vpow2.f32 %v4985_v54  ;;  %v3682_v2 = vpop.f32.mrf.mxu0  ;;  %v4986_v31 = vmul.f32 -1.442695, %v3589_v7  ;;  %v3591_v32 = vadd.f32 %v3590_v14, %v7538_v36 }
 0x5fa   :  { %6226 = vrcp.f32 %v3874_v57  ;;  %v3766_v4 = vadd.f32 1.0, %v6205_v56  ;;  %v6207_v43 = vpop.eup %6206  ;;  %v3967_v29 = vpack.c.bf16 %v3953_v51, %v3952_v17  ;;  %v3683_v58 = vadd.f32 %v3682_v2, %v7533_v6 }
 0x5fb   :  { %6228 = vrcp.f32 %v3875_v22  ;;  %v3877_v26 = vadd.f32 1.0, %v6207_v43  ;;  %v5002_v52 = vmul.f32 -1.442695, %v3691_v16 }
 0x5fc   :  { %v6209_v15 = vpop.eup %6208  ;;  %6230 = vrcp.f32 %v3876_v13  ;;  %4194 = vmatmul.mubr.bf16.gmra.mxu0 %v3967_v29  ;;  %5356 = vmatmul.mubr.bf16.vlgmr.msra.gmra.mxu1 %v3967_v29  ;;  %v5000_v55 = vmul.f32 -1.442695, %v3683_v58 }
 0x5fd   :  { %v6211_v18 = vpop.eup %6210  ;;  %6232 = vrcp.f32 %v3766_v4  ;;  %4203 = vmatprep.mubr.bf16.mxu0 %v6677_v41 }
 0x5fe   :  { %v6213_v10 = vpop.eup %6212  ;;  %6234 = vtanh.f32 %v3581_v37  ;;  %v3924_v39 = vmul.f32 %v6211_v18, %v6209_v15 }
 0x5ff   :  { %v3767_v63 = vadd.f32 1.0, %v6213_v10  ;;  %6236 = vpow2.f32 %v4999_v35  ;;  %v6215_v59 = vpop.eup %6214 }
 0x600   :  { %6238 = vpow2.f32 %v4986_v31  ;;  %v3594_v23 = vpop.f32.mrf.mxu1 }
 0x601   :  { %6240 = vrcp.f32 %v3767_v63  ;;  %v3595_v19 = vadd.f32 %v3594_v23, %v7528_v1 }
 0x602   :  { %v6217_v11 = vpop.eup %6216  ;;  %6242 = vrcp.f32 %v3877_v26  ;;  %v3596_v61 = vpop.f32.mrf.mxu1 }
 0x603   :  { %v6219_v50 = vpop.eup %6218  ;;  %6244 = vtanh.f32 %v3924_v39  ;;  %v3925_v3 = vmul.f32 %v6217_v11, %v6215_v59  ;;  %v4987_v8 = vmul.f32 -1.442695, %v3595_v19  ;;  %v3597_v58 = vadd.f32 %v3596_v61, %v7538_v36 }
 0x604   :  { %v6221_v25 = vpop.eup %6220  ;;  %6246 = vpow2.f32 %v5000_v55  ;;  %v3598_v27 = vpop.f32.mrf.mxu1 }
 0x605   :  { %v6223_v21 = vpop.eup %6222  ;;  %6248 = vtanh.f32 %v3925_v3  ;;  %v3599_v5 = vadd.f32 %v3598_v27, %v7528_v1 }
 0x606   :  { %v6225_v53 = vpop.eup %6224  ;;  %6250 = vpow2.f32 %v4987_v8  ;;  %v7579_v34 = vpop.f32.mrf.mxu1 }
 0x607   :  { %v6227_v45 = vpop.eup %6226  ;;  %v3768_v24 = vadd.f32 1.0, %v6225_v53  ;;  %v4988_v20 = vmul.f32 -1.442695, %v3599_v5  ;;  %6252 = vpow2.f32 %v5001_v44  ;;  %v3601_v61 = vadd.f32 %v7579_v34, %v7538_v36 }
 0x608   :  { %v6229_v33 = vpop.eup %6228  ;;  %6254 = vpow2.f32 %v5002_v52  ;;  %v3954_v46 = vmul.f32 %v6227_v45, %v6221_v25 }
 0x609   :  { %v6231_v28 = vpop.eup %6230  ;;  %v3955_v54 = vmul.f32 %v6229_v33, %v6223_v21  ;;  %6256 = vrcp.f32 %v3768_v24 }
 0x60a   :  { %v6233_v48 = vpop.eup %6232  ;;  %v3604_v57 = vpop.f32.mrf.mxu1  ;;  %6258 = vpow2.f32 %v4988_v20 }
 0x60b   :  { %v5337_v0 = vpop.f32.mrf.mxu0  ;;  %v6235_v49 = vpop.eup %6234  ;;  %v3605_v38 = vadd.f32 %v3604_v57, %v7528_v1  ;;  %v3968_v60 = vpack.c.bf16 %v3955_v54, %v3954_v46  ;;  %6260 = vtanh.f32 %v3587_v12  ;;  %v3926_v51 = vmul.f32 %v6233_v48, %v6219_v50 }
 0x60c   :  { %v6237_v30 = vpop.eup %6236  ;;  %v7585_v13 = vpop.f32.mrf.mxu1  ;;  %6262 = vtanh.f32 %v3591_v32  ;;  %v3704_v27 = vadd.f32 %v5337_v0, %v7533_v6 }
 0x60d   :  { %v3695_v62 = vpop.f32.mrf.mxu0  ;;  %v6239_v7 = vpop.eup %6238  ;;  %v4989_v56 = vmul.f32 -1.442695, %v3605_v38  ;;  %4204 = vmatmul.mubr.bf16.gmra.mxu0 %v3968_v60  ;;  %5359 = vmatprep.mubr.bf16.mxu1 %v3968_v60  ;;  %v3878_v35 = vadd.f32 1.0, %v6237_v30  ;;  %v3607_v32 = vadd.f32 %v7585_v13, %v7538_v36 }
 0x60e   :  { %v6241_v22 = vpop.eup %6240  ;;  %v3769_v2 = vadd.f32 1.0, %v6239_v7  ;;  %v3608_v17 = vpop.f32.mrf.mxu1  ;;  %4213 = vmatprep.mubr.bf16.mxu0 %v6677_v41  ;;  %v3696_v29 = vadd.f32 %v3695_v62, %v7533_v6  ;;  %v5005_v20 = vmul.f32 -1.442695, %v3704_v27 }
 0x60f   :  { %v5338_v4 = vpop.f32.mrf.mxu0  ;;  %v6243_v37 = vpop.eup %6242  ;;  %v3927_v43 = vmul.f32 %v6241_v22, %v6235_v49  ;;  %6264 = vpow2.f32 %v4989_v56  ;;  %v3609_v31 = vadd.f32 %v3608_v17, %v7528_v1 }
 0x610   :  { %v6245_v15 = vpop.eup %6244  ;;  %6266 = vrcp.f32 %v3769_v2  ;;  %v5003_v63 = vmul.f32 -1.442695, %v3696_v29  ;;  %v3707_v34 = vadd.f32 %v5338_v4, %v7533_v6  ;;  %v3610_v57 = vpop.f32.mrf.mxu1 }
 0x611   :  { %v6247_v14 = vpop.eup %6246  ;;  %6268 = vtanh.f32 %v3926_v51  ;;  %v3698_v26 = vpop.f32.mrf.mxu0  ;;  %v3956_v9 = vmul.f32 %v6245_v15, %v6231_v28  ;;  %v4990_v59 = vmul.f32 -1.442695, %v3609_v31  ;;  %v3611_v30 = vadd.f32 %v3610_v57, %v7538_v36 }
 0x612   :  { %v6249_v18 = vpop.eup %6248  ;;  %6270 = vtanh.f32 %v3927_v43  ;;  %v3879_v10 = vadd.f32 1.0, %v6247_v14  ;;  %v3699_v1 = vadd.f32 %v3698_v26, %v7533_v6  ;;  %v5006_v54 = vmul.f32 -1.442695, %v3707_v34  ;;  %v4006_v34 = vld [vmem:[%s7764_s14] sm:$0x7] }
 0x613   :  { %v6251_v39 = vpop.eup %6250  ;;  %6272 = vrcp.f32 %v3878_v35  ;;  %v3957_v55 = vmul.f32 %v6249_v18, %v6243_v37 }
 0x614   :  { %6274 = vrcp.f32 %v3879_v10  ;;  %v3770_v23 = vadd.f32 1.0, %v6251_v39  ;;  %v6253_v16 = vpop.eup %6252  ;;  %v5004_v21 = vmul.f32 -1.442695, %v3699_v1 }
 0x615   :  { %6276 = vtanh.f32 %v3597_v58  ;;  %v3969_v19 = vpack.c.bf16 %v3957_v55, %v3956_v9  ;;  %v6255_v11 = vpop.eup %6254  ;;  %v3880_v8 = vadd.f32 1.0, %v6253_v16 }
 0x616   :  { %6278 = vrcp.f32 %v3770_v23  ;;  %v6257_v50 = vpop.eup %6256  ;;  %v3881_v53 = vadd.f32 1.0, %v6255_v11 }
 0x617   :  { %6280 = vpow2.f32 %v5003_v63  ;;  %4214 = vmatmul.mubr.bf16.gmra.mxu0 %v3969_v19  ;;  %5360 = vmatmul.mubr.bf16.gmra.mxu1 %v3969_v19  ;;  %v6259_v3 = vpop.eup %6258 }
 0x618   :  { %6282 = vpow2.f32 %v4990_v59  ;;  %4223 = vmatprep.mubr.bf16.mxu0 %v6677_v41  ;;  %v6261_v25 = vpop.eup %6260  ;;  %v3771_v44 = vadd.f32 1.0, %v6259_v3 }
 0x619   :  { %v3928_v52 = vmul.f32 %v6261_v25, %v6257_v50  ;;  %6284 = vtanh.f32 %v3601_v61  ;;  %v6263_v5 = vpop.eup %6262 }
 0x61a   :  { %6286 = vrcp.f32 %v3771_v44 }
 0x61b   :  { %6288 = vrcp.f32 %v3880_v8 }
 0x61c   :  { %v6265_v45 = vpop.eup %6264  ;;  %6290 = vpow2.f32 %v5004_v21 }
 0x61d   :  { %v6267_v24 = vpop.eup %6266  ;;  %6292 = vtanh.f32 %v3928_v52  ;;  %v3772_v28 = vadd.f32 1.0, %v6265_v45  ;;  %v7607_v45 = vrot.slane %v4006_v34, %v6942_v42 }
 0x61e   :  { %v6269_v33 = vpop.eup %6268  ;;  %v3929_v12 = vmul.f32 %v6267_v24, %v6263_v5  ;;  %6294 = vrcp.f32 %v3881_v53 }
 0x61f   :  { %v6271_v46 = vpop.eup %6270 }
 0x620   :  { %v6273_v48 = vpop.eup %6272  ;;  %6296 = vtanh.f32 %v3929_v12 }
 0x621   :  { %v6275_v0 = vpop.eup %6274  ;;  %6298 = vpow2.f32 %v5005_v20  ;;  %v3958_v49 = vmul.f32 %v6273_v48, %v6269_v33  ;;  %v6678_v48 = vmov 0.0  }
 0x622   :  { %v6277_v6 = vpop.eup %6276  ;;  %6300 = vrcp.f32 %v3772_v28  ;;  %v3959_v38 = vmul.f32 %v6275_v0, %v6271_v46  ;;  %5371 = vmatprep.subr.bf16.mxu0 %v6678_v48  ;;  %v7614_v0 = vrot.slane %v4006_v34, %v6984_v47 }
 0x623   :  { %v6279_v60 = vpop.eup %6278  ;;  %6302 = vpow2.f32 %v5006_v54 }
 0x624   :  { %v6281_v62 = vpop.eup %6280  ;;  %6304 = vtanh.f32 %v3607_v32  ;;  %v3970_v7 = vpack.c.bf16 %v3959_v38, %v3958_v49  ;;  %v3930_v56 = vmul.f32 %v6279_v60, %v6277_v6  ;;  %v7617_v38 = vrot.slane %v4006_v34, %v6939_v40 }
 0x625   :  { %v6283_v51 = vpop.eup %6282  ;;  %6306 = vtanh.f32 %v3611_v30  ;;  %v3882_v17 = vadd.f32 1.0, %v6281_v62 }
 0x626   :  { %v3773_v22 = vadd.f32 1.0, %v6283_v51  ;;  %4224 = vmatmul.mubr.bf16.gmra.mxu0 %v3970_v7  ;;  %5363 = vmatprep.mubr.bf16.mxu1 %v3970_v7  ;;  %v6285_v13 = vpop.eup %6284 }
 0x627   :  { %4233 = vmatprep.mubr.bf16.mxu0 %v6677_v41  ;;  %v6287_v2 = vpop.eup %6286 }
 0x628   :  { %6308 = vrcp.f32 %v3773_v22  ;;  %v6289_v4 = vpop.eup %6288  ;;  %v3931_v37 = vmul.f32 %v6287_v2, %v6285_v13 }
 0x629   :  { %v6291_v43 = vpop.eup %6290  ;;  %6310 = vtanh.f32 %v3930_v56 }
 0x62a   :  { %v6293_v36 = vpop.eup %6292  ;;  %6312 = vtanh.f32 %v3931_v37  ;;  %v3883_v35 = vadd.f32 1.0, %v6291_v43 }
 0x62b   :  { %v6295_v29 = vpop.eup %6294  ;;  %6314 = vrcp.f32 %v3882_v17  ;;  %v3960_v14 = vmul.f32 %v6293_v36, %v6289_v4 }
 0x62c   :  { %6316 = vrcp.f32 %v3883_v35 }
 0x62d   :  { %v6297_v15 = vpop.eup %6296 }
 0x62e   :  { %v6299_v31 = vpop.eup %6298  ;;  %v3961_v58 = vmul.f32 %v6297_v15, %v6295_v29 }
 0x62f   :  { %v6301_v18 = vpop.eup %6300  ;;  %v3884_v63 = vadd.f32 1.0, %v6299_v31 }
 0x630   :  { %v6303_v10 = vpop.eup %6302  ;;  %v3971_v26 = vpack.c.bf16 %v3961_v58, %v3960_v14 }
 0x631   :  { %v6305_v39 = vpop.eup %6304  ;;  %v3885_v55 = vadd.f32 1.0, %v6303_v10  ;;  %6318 = vrcp.f32 %v3884_v63 }
 0x632   :  { %v3932_v9 = vmul.f32 %v6305_v39, %v6301_v18  ;;  %4234 = vmatmul.mubr.bf16.gmra.mxu0 %v3971_v26  ;;  %5364 = vmatmul.mubr.bf16.gmra.mxu1 %v3971_v26  ;;  %v6307_v23 = vpop.eup %6306 }
 0x633   :  { %4243 = vmatprep.mubr.bf16.mxu0 %v6677_v41 }
 0x634   :  { %6320 = vtanh.f32 %v3932_v9 }
 0x635   :  { %v6309_v59 = vpop.eup %6308  ;;  %6322 = vrcp.f32 %v3885_v55 }
 0x636   :  { %v3933_v16 = vmul.f32 %v6309_v59, %v6307_v23  ;;  %v6311_v1 = vpop.eup %6310 }
 0x637   :  { %v6313_v19 = vpop.eup %6312 }
 0x638   :  { %6324 = vtanh.f32 %v3933_v16  ;;  %v6315_v11 = vpop.eup %6314 }
 0x639   :  { %v6317_v61 = vpop.eup %6316  ;;  %v3962_v50 = vmul.f32 %v6315_v11, %v6311_v1 }
 0x63a   :  { %v3963_v3 = vmul.f32 %v6317_v61, %v6313_v19 }
 0x63c   :  { %v3972_v8 = vpack.c.bf16 %v3963_v3, %v3962_v50 }
 0x63e   :  { %4244 = vmatmul.mubr.bf16.gmra.mxu0 %v3972_v8  ;;  %5367 = vmatprep.mubr.bf16.mxu1 %v3972_v8  ;;  %v6319_v25 = vpop.eup %6318 }
 0x63f   :  { %4253 = vmatprep.mubr.bf16.mxu0 %v6677_v41 }
 0x641   :  { %v6321_v44 = vpop.eup %6320 }
 0x642   :  { %v6323_v27 = vpop.eup %6322  ;;  %v3964_v52 = vmul.f32 %v6321_v44, %v6319_v25 }
 0x645   :  { %v6325_v21 = vpop.eup %6324 }
 0x646   :  { %v3965_v5 = vmul.f32 %v6325_v21, %v6323_v27 }
 0x648   :  { %v3973_v53 = vpack.c.bf16 %v3965_v5, %v3964_v52 }
 0x64a   :  { %4254 = vmatmul.mubr.bf16.gmra.mxu0 %v3973_v53  ;;  %5368 = vmatmul.mubr.bf16.gmra.mxu1 %v3973_v53 }
 0x64b   :  { %5387 = vmatprep.mubr.msk.bf16.mxu0 %vm6679_vm1, %v6678_v48 }
 0x6b4   :  { %v4185_v24 = vpop.f32.mrf.mxu0 }
 0x6b5   :  { %v4186_v20 = vadd.f32 %v4185_v24, %v7607_v45 }
 0x6b6   :  { %v4187_v41 = vpop.f32.mrf.mxu0 }
 0x6b7   :  { %v5031_v33 = vmul.f32 -1.442695, %v4186_v20  ;;  %v4188_v47 = vadd.f32 %v4187_v41, %v7617_v38 }
 0x6b8   :  { %v4189_v12 = vpop.f32.mrf.mxu0 }
 0x6b9   :  { %6326 = vpow2.f32 %v5031_v33  ;;  %v4190_v28 = vadd.f32 %v4189_v12, %v7607_v45 }
 0x6ba   :  { %v4191_v46 = vpop.f32.mrf.mxu0 }
 0x6bb   :  { %v5032_v54 = vmul.f32 -1.442695, %v4190_v28  ;;  %v4192_v36 = vadd.f32 %v4191_v46, %v7617_v38 }
 0x6bc   :  { %v4195_v32 = vpop.f32.mrf.mxu0  ;;  %v5357_v57 = vpop.f32.mrf.mxu1 }
 0x6bd   :  { %6328 = vpow2.f32 %v5032_v54  ;;  %v4196_v42 = vadd.f32 %v4195_v32, %v7607_v45  ;;  %v4307_v22 = vadd.f32 %v5357_v57, %v7614_v0 }
 0x6be   :  { %v4197_v6 = vpop.f32.mrf.mxu0  ;;  %v4298_v49 = vpop.f32.mrf.mxu1 }
 0x6bf   :  { %v5033_v60 = vmul.f32 -1.442695, %v4196_v42  ;;  %v4299_v30 = vadd.f32 %v4298_v49, %v7614_v0  ;;  %v5049_v37 = vmul.f32 -1.442695, %v4307_v22  ;;  %v4198_v14 = vadd.f32 %v4197_v6, %v7617_v38 }
 0x6c0   :  { %v4199_v62 = vpop.f32.mrf.mxu0  ;;  %v5358_v7 = vpop.f32.mrf.mxu1 }
 0x6c1   :  { %6330 = vpow2.f32 %v5033_v60  ;;  %v5047_v51 = vmul.f32 -1.442695, %v4299_v30  ;;  %v4200_v56 = vadd.f32 %v4199_v62, %v7607_v45  ;;  %v4310_v35 = vadd.f32 %v5358_v7, %v7614_v0 }
 0x6c2   :  { %v4301_v13 = vpop.f32.mrf.mxu1  ;;  %v4201_v29 = vpop.f32.mrf.mxu0 }
 0x6c3   :  { %v5034_v2 = vmul.f32 -1.442695, %v4200_v56  ;;  %6332 = vpow2.f32 %v5047_v51  ;;  %v4302_v17 = vadd.f32 %v4301_v13, %v7614_v0  ;;  %v5050_v58 = vmul.f32 -1.442695, %v4310_v35 }
 0x6c4   :  { %v4202_v55 = vadd.f32 %v4201_v29, %v7617_v38 }
 0x6c5   :  { %6334 = vpow2.f32 %v5034_v2  ;;  %v5048_v43 = vmul.f32 -1.442695, %v4302_v17 }
 0x6c6   :  { %v6327_v40 = vpop.eup %6326  ;;  %6336 = vtanh.f32 %v4188_v47 }
 0x6c7   :  { %v4409_v4 = vadd.f32 1.0, %v6327_v40 }
 0x6c9   :  { %6338 = vrcp.f32 %v4409_v4 }
 0x6ca   :  { %v6329_v15 = vpop.eup %6328  ;;  %6340 = vpow2.f32 %v5048_v43 }
 0x6cb   :  { %v4410_v31 = vadd.f32 1.0, %v6329_v15  ;;  %6342 = vpow2.f32 %v5049_v37 }
 0x6cc   :  { %6344 = vtanh.f32 %v4192_v36 }
 0x6cd   :  { %6346 = vrcp.f32 %v4410_v31  ;;  %v4205_v18 = vpop.f32.mrf.mxu0 }
 0x6ce   :  { %v4206_v10 = vadd.f32 %v4205_v18, %v7607_v45  ;;  %v6331_v26 = vpop.eup %6330  ;;  %6348 = vtanh.f32 %v4198_v14 }
 0x6cf   :  { %v4207_v39 = vpop.f32.mrf.mxu0  ;;  %v4411_v63 = vadd.f32 1.0, %v6331_v26  ;;  %6350 = vpow2.f32 %v5050_v58 }
 0x6d0   :  { %v5035_v9 = vmul.f32 -1.442695, %v4206_v10  ;;  %v6333_v59 = vpop.eup %6332  ;;  %v4208_v57 = vadd.f32 %v4207_v39, %v7617_v38 }
 0x6d1   :  { %v4209_v23 = vpop.f32.mrf.mxu0  ;;  %6352 = vrcp.f32 %v4411_v63  ;;  %v4521_v11 = vadd.f32 1.0, %v6333_v59 }
 0x6d2   :  { %v6335_v16 = vpop.eup %6334  ;;  %v4210_v1 = vadd.f32 %v4209_v23, %v7607_v45  ;;  %6354 = vpow2.f32 %v5035_v9 }
 0x6d3   :  { %v4211_v19 = vpop.f32.mrf.mxu0  ;;  %v4412_v61 = vadd.f32 1.0, %v6335_v16  ;;  %v6337_v50 = vpop.eup %6336  ;;  %6356 = vtanh.f32 %v4202_v55 }
 0x6d4   :  { %v5036_v44 = vmul.f32 -1.442695, %v4210_v1  ;;  %v4212_v37 = vadd.f32 %v4211_v19, %v7617_v38 }
 0x6d5   :  { %6358 = vrcp.f32 %v4412_v61 }
 0x6d6   :  { %v6339_v3 = vpop.eup %6338  ;;  %6360 = vrcp.f32 %v4521_v11 }
 0x6d7   :  { %v6341_v8 = vpop.eup %6340  ;;  %v4569_v25 = vmul.f32 %v6339_v3, %v6337_v50  ;;  %v4215_v27 = vpop.f32.mrf.mxu0 }
 0x6d8   :  { %v5361_v21 = vpop.f32.mrf.mxu1  ;;  %v6343_v52 = vpop.eup %6342  ;;  %v4522_v5 = vadd.f32 1.0, %v6341_v8  ;;  %v4216_v53 = vadd.f32 %v4215_v27, %v7607_v45 }
 0x6d9   :  { %v6345_v34 = vpop.eup %6344  ;;  %6362 = vtanh.f32 %v4569_v25  ;;  %v4217_v24 = vpop.f32.mrf.mxu0  ;;  %v4523_v28 = vadd.f32 1.0, %v6343_v52  ;;  %v4323_v47 = vadd.f32 %v5361_v21, %v7614_v0 }
 0x6da   :  { %v4314_v20 = vpop.f32.mrf.mxu1  ;;  %v6347_v41 = vpop.eup %6346  ;;  %v5037_v33 = vmul.f32 -1.442695, %v4216_v53  ;;  %6364 = vpow2.f32 %v5036_v44  ;;  %v4218_v14 = vadd.f32 %v4217_v24, %v7617_v38 }
 0x6db   :  { %v4570_v12 = vmul.f32 %v6347_v41, %v6345_v34  ;;  %v4315_v46 = vadd.f32 %v4314_v20, %v7614_v0  ;;  %v4219_v54 = vpop.f32.mrf.mxu0  ;;  %6366 = vrcp.f32 %v4522_v5  ;;  %v6349_v6 = vpop.eup %6348  ;;  %v5053_v29 = vmul.f32 -1.442695, %v4323_v47 }
 0x6dc   :  { %v5362_v32 = vpop.f32.mrf.mxu1  ;;  %v4220_v42 = vadd.f32 %v4219_v54, %v7607_v45  ;;  %v6351_v30 = vpop.eup %6350 }
 0x6dd   :  { %6368 = vtanh.f32 %v4570_v12  ;;  %v5051_v49 = vmul.f32 -1.442695, %v4315_v46  ;;  %v4524_v13 = vadd.f32 1.0, %v6351_v30  ;;  %v4221_v40 = vpop.f32.mrf.mxu0  ;;  %v4326_v15 = vadd.f32 %v5362_v32, %v7614_v0 }
 0x6de   :  { %v4317_v60 = vpop.f32.mrf.mxu1  ;;  %6370 = vpow2.f32 %v5037_v33  ;;  %v6353_v62 = vpop.eup %6352  ;;  %v5038_v7 = vmul.f32 -1.442695, %v4220_v42  ;;  %v4222_v44 = vadd.f32 %v4221_v40, %v7617_v38 }
 0x6df   :  { %6372 = vrcp.f32 %v4523_v28  ;;  %v4571_v51 = vmul.f32 %v6353_v62, %v6349_v6  ;;  %v4318_v56 = vadd.f32 %v4317_v60, %v7614_v0  ;;  %v6355_v22 = vpop.eup %6354  ;;  %v5054_v55 = vmul.f32 -1.442695, %v4326_v15 }
 0x6e0   :  { %6374 = vtanh.f32 %v4208_v57  ;;  %v6357_v2 = vpop.eup %6356  ;;  %v4413_v17 = vadd.f32 1.0, %v6355_v22 }
 0x6e1   :  { %6376 = vpow2.f32 %v5051_v49  ;;  %v5052_v36 = vmul.f32 -1.442695, %v4318_v56 }
 0x6e2   :  { %6378 = vtanh.f32 %v4571_v51  ;;  %v6359_v4 = vpop.eup %6358 }
 0x6e3   :  { %6380 = vpow2.f32 %v5038_v7  ;;  %v4572_v43 = vmul.f32 %v6359_v4, %v6357_v2  ;;  %v6361_v35 = vpop.eup %6360 }
 0x6e4   :  { %6382 = vrcp.f32 %v4413_v17 }
 0x6e5   :  { %6384 = vrcp.f32 %v4524_v13 }
 0x6e6   :  { %v6363_v31 = vpop.eup %6362  ;;  %6386 = vtanh.f32 %v4572_v43  ;;  %v4225_v58 = vpop.f32.mrf.mxu0 }
 0x6e7   :  { %6388 = vtanh.f32 %v4212_v37  ;;  %v4226_v18 = vadd.f32 %v4225_v58, %v7607_v45  ;;  %v7640_v10 = vmul.f32 %v6363_v31, %v6361_v35  ;;  %v6365_v26 = vpop.eup %6364 }
 0x6e8   :  { %6390 = vpow2.f32 %v5052_v36  ;;  %v4227_v39 = vpop.f32.mrf.mxu0  ;;  %v6367_v63 = vpop.eup %6366  ;;  %v4414_v9 = vadd.f32 1.0, %v6365_v26 }
 0x6e9   :  { %6392 = vpow2.f32 %v5053_v29  ;;  %v5039_v23 = vmul.f32 -1.442695, %v4226_v18  ;;  %v4228_v46 = vadd.f32 %v4227_v39, %v7617_v38 }
 0x6ea   :  { %v6369_v59 = vpop.eup %6368  ;;  %6394 = vtanh.f32 %v4218_v14  ;;  %v4229_v16 = vpop.f32.mrf.mxu0 }
 0x6eb   :  { %v6371_v1 = vpop.eup %6370  ;;  %6396 = vrcp.f32 %v4414_v9  ;;  %v4230_v19 = vadd.f32 %v4229_v16, %v7607_v45  ;;  %v7643_v11 = vmul.f32 %v6369_v59, %v6367_v63 }
 0x6ec   :  { %v6373_v61 = vpop.eup %6372  ;;  %v4415_v50 = vadd.f32 1.0, %v6371_v1  ;;  %6398 = vpow2.f32 %v5039_v23  ;;  %v4231_v27 = vpop.f32.mrf.mxu0 }
 0x6ed   :  { %v6375_v3 = vpop.eup %6374  ;;  %6400 = vpow2.f32 %v5054_v55  ;;  %v5040_v8 = vmul.f32 -1.442695, %v4230_v19  ;;  %v4617_v21 = vpack.c.bf16 %v7643_v11, %v7640_v10  ;;  %v4232_v43 = vadd.f32 %v4231_v27, %v7617_v38 }
 0x6ee   :  { %v6377_v25 = vpop.eup %6376  ;;  %6402 = vrcp.f32 %v4415_v50 }
 0x6ef   :  { %v6379_v52 = vpop.eup %6378  ;;  %6404 = vpow2.f32 %v5040_v8  ;;  %v4525_v32 = vadd.f32 1.0, %v6377_v25 }
 0x6f0   :  { %v6381_v5 = vpop.eup %6380  ;;  %v7648_v53 = vmul.f32 %v6379_v52, %v6373_v61  ;;  %6406 = vtanh.f32 %v4222_v44 }
 0x6f1   :  { %v6383_v34 = vpop.eup %6382  ;;  %v4416_v24 = vadd.f32 1.0, %v6381_v5 }
 0x6f2   :  { %v6385_v20 = vpop.eup %6384  ;;  %v4573_v41 = vmul.f32 %v6383_v34, %v6375_v3  ;;  %v7650_v33 = vpop.f32.mrf.mxu0 }
 0x6f3   :  { %v7652_v12 = vpop.f32.mrf.mxu1  ;;  %v6387_v28 = vpop.eup %6386  ;;  %6408 = vrcp.f32 %v4416_v24 }
 0x6f4   :  { %v6389_v54 = vpop.eup %6388  ;;  %v7655_v57 = vpop.f32.mrf.mxu0  ;;  %v7657_v6 = vmul.f32 %v6387_v28, %v6385_v20  ;;  %6410 = vtanh.f32 %v4228_v46 }
 0x6f5   :  { %v4330_v42 = vpop.f32.mrf.mxu1  ;;  %v6391_v49 = vpop.eup %6390  ;;  %6412 = vrcp.f32 %v4525_v32 }
 0x6f6   :  { %v6393_v60 = vpop.eup %6392  ;;  %v4526_v30 = vadd.f32 1.0, %v6391_v49  ;;  %v4618_v7 = vpack.c.bf16 %v7657_v6, %v7648_v53  ;;  %v4331_v56 = vadd.f32 %v4330_v42, %v7614_v0  ;;  %v7664_v22 = vpop.f32.mrf.mxu0  ;;  %6414 = vtanh.f32 %v4573_v41 }
 0x6f7   :  { %v7659_v62 = vpop.f32.mrf.mxu1  ;;  %v6395_v51 = vpop.eup %6394  ;;  %v4527_v17 = vadd.f32 1.0, %v6393_v60 }
 0x6f8   :  { %v6397_v13 = vpop.eup %6396  ;;  %6416 = vrcp.f32 %v4526_v30  ;;  %v5055_v35 = vmul.f32 -1.442695, %v4331_v56  ;;  %v7667_v29 = vpop.f32.mrf.mxu0 }
 0x6f9   :  { %v6399_v47 = vpop.eup %6398  ;;  %v4574_v2 = vmul.f32 %v6397_v13, %v6389_v54  ;;  %v4333_v40 = vpop.f32.mrf.mxu1 }
 0x6fa   :  { %v6401_v4 = vpop.eup %6400  ;;  %v4417_v37 = vadd.f32 1.0, %v6399_v47  ;;  %v4334_v31 = vadd.f32 %v4333_v40, %v7614_v0 }
 0x6fb   :  { %v6403_v36 = vpop.eup %6402  ;;  %6418 = vtanh.f32 %v4574_v2  ;;  %v4528_v58 = vadd.f32 1.0, %v6401_v4 }
 0x6fc   :  { %v4575_v15 = vmul.f32 %v6403_v36, %v6395_v51  ;;  %6420 = vrcp.f32 %v4417_v37  ;;  %v6405_v14 = vpop.eup %6404  ;;  %v5056_v9 = vmul.f32 -1.442695, %v4334_v31 }
 0x6fd   :  { %6422 = vrcp.f32 %v4527_v17  ;;  %v4418_v18 = vadd.f32 1.0, %v6405_v14  ;;  %v6407_v26 = vpop.eup %6406 }
 0x6fe   :  { %6424 = vtanh.f32 %v4232_v43  ;;  %v4245_v39 = vpop.f32.mrf.mxu0 }
 0x6ff   :  { %6426 = vpow2.f32 %v5055_v35  ;;  %v4246_v56 = vadd.f32 %v4245_v39, %v7607_v45 }
 0x700   :  { %v6409_v63 = vpop.eup %6408  ;;  %6428 = vrcp.f32 %v4418_v18  ;;  %v7670_v23 = vpop.f32.mrf.mxu0 }
 0x701   :  { %6430 = vtanh.f32 %v4575_v15  ;;  %v4576_v55 = vmul.f32 %v6409_v63, %v6407_v26  ;;  %v6411_v16 = vpop.eup %6410  ;;  %v5043_v36 = vmul.f32 -1.442695, %v4246_v56  ;;  %v4240_v15 = vadd.f32 %v7664_v22, %v7607_v45 }
 0x702   :  { %6432 = vrcp.f32 %v4528_v58  ;;  %v4249_v59 = vpop.f32.mrf.mxu0  ;;  %v6413_v1 = vpop.eup %6412  ;;  %v4236_v58 = vadd.f32 %v7650_v33, %v7607_v45 }
 0x703   :  { %6434 = vtanh.f32 %v4576_v55  ;;  %v6415_v19 = vpop.eup %6414  ;;  %v4250_v3 = vadd.f32 %v4249_v59, %v7607_v45  ;;  %v5042_v18 = vmul.f32 -1.442695, %v4240_v15 }
 0x704   :  { %6436 = vpow2.f32 %v5056_v9  ;;  %v7673_v61 = vpop.f32.mrf.mxu0  ;;  %v7676_v44 = vmul.f32 %v6415_v19, %v6413_v1  ;;  %v5041_v9 = vmul.f32 -1.442695, %v4236_v58 }
 0x705   :  { %v6417_v50 = vpop.eup %6416  ;;  %v5044_v24 = vmul.f32 -1.442695, %v4250_v3 }
 0x707   :  { %6438 = vpow2.f32 %v5044_v24 }
 0x708   :  { %v6419_v8 = vpop.eup %6418 }
 0x709   :  { %v6421_v25 = vpop.eup %6420  ;;  %v7678_v27 = vmul.f32 %v6419_v8, %v6417_v50 }
 0x70a   :  { %v6423_v52 = vpop.eup %6422  ;;  %v4255_v5 = vpop.f32.mrf.mxu0  ;;  %v4577_v46 = vmul.f32 %v6421_v25, %v6411_v16 }
 0x70b   :  { %v6425_v34 = vpop.eup %6424  ;;  %v4256_v20 = vadd.f32 %v4255_v5, %v7607_v45  ;;  %v4619_v41 = vpack.c.bf16 %v7678_v27, %v7676_v44  ;;  %v5369_v4 = vpop.f32.mrf.mxu1  ;;  %v4627_v44 = vstv %s7766_s16 }
 0x70c   :  { %v6427_v28 = vpop.eup %6426  ;;  %v4257_v54 = vpop.f32.mrf.mxu0  ;;  %6440 = vtanh.f32 %v4577_v46  ;;  %v4355_v39 = vadd.f32 %v5369_v4, %v7614_v0 }
 0x70d   :  { %v6429_v32 = vpop.eup %6428  ;;  %v5045_v60 = vmul.f32 -1.442695, %v4256_v20  ;;  %v4529_v51 = vadd.f32 1.0, %v6427_v28  ;;  %v4346_v31 = vpop.f32.mrf.mxu1  ;;  %v4258_v33 = vadd.f32 %v4257_v54, %v7617_v38 }
 0x70e   :  { %v6431_v42 = vpop.eup %6430  ;;  %v4578_v49 = vmul.f32 %v6429_v32, %v6425_v34  ;;  %v4259_v13 = vpop.f32.mrf.mxu0  ;;  %v5061_v22 = vmul.f32 -1.442695, %v4355_v39  ;;  %v4252_v34 = vadd.f32 %v7673_v61, %v7617_v38  ;;  %v4347_v32 = vadd.f32 %v4346_v31, %v7614_v0 }
 0x70f   :  { %v6433_v30 = vpop.eup %6432  ;;  %v7684_v17 = vmul.f32 %v6431_v42, %v6423_v52  ;;  %v4260_v37 = vadd.f32 %v4259_v13, %v7607_v45  ;;  %v5370_v26 = vpop.f32.mrf.mxu1 }
 0x710   :  { %v6435_v47 = vpop.eup %6434  ;;  %6442 = vtanh.f32 %v4578_v49  ;;  %v4358_v59 = vadd.f32 %v5370_v26, %v7614_v0  ;;  %v4261_v25 = vpop.f32.mrf.mxu0  ;;  %v5059_v56 = vmul.f32 -1.442695, %v4347_v32 }
 0x711   :  { %v6437_v2 = vpop.eup %6436  ;;  %6444 = vpow2.f32 %v5045_v60  ;;  %v7687_v43 = vmul.f32 %v6435_v47, %v6433_v30  ;;  %v5046_v14 = vmul.f32 -1.442695, %v4260_v37  ;;  %v4349_v45 = vpop.f32.mrf.mxu1  ;;  %v4262_v54 = vadd.f32 %v4261_v25, %v7617_v38 }
 0x712   :  { %v4530_v40 = vadd.f32 1.0, %v6437_v2  ;;  %6446 = vrcp.f32 %v4529_v51  ;;  %v5062_v8 = vmul.f32 -1.442695, %v4358_v59  ;;  %v4350_v28 = vadd.f32 %v4349_v45, %v7614_v0 }
 0x713   :  { %v4620_v35 = vpack.c.bf16 %v7687_v43, %v7684_v17  ;;  %v4342_v30 = vadd.f32 %v7659_v62, %v7614_v0  ;;  %v4248_v51 = vadd.f32 %v7670_v23, %v7617_v38  ;;  %v4339_v2 = vadd.f32 %v7652_v12, %v7614_v0  ;;  %v4625_v17 = vld [vmem:[%s7765_s15] sm:$0x1] }
 0x714   :  { %6448 = vrcp.f32 %v4530_v40  ;;  %v6439_v63 = vpop.eup %6438  ;;  %v5060_v60 = vmul.f32 -1.442695, %v4350_v28  ;;  %v4242_v62 = vadd.f32 %v7667_v29, %v7617_v38 }
 0x715   :  { %6450 = vpow2.f32 %v5043_v36  ;;  %v4422_v20 = vadd.f32 1.0, %v6439_v63  ;;  %v5058_v40 = vmul.f32 -1.442695, %v4342_v30  ;;  %v5057_v15 = vmul.f32 -1.442695, %v4339_v2 }
 0x716   :  { %6452 = vpow2.f32 %v5046_v14  ;;  %v4238_v14 = vadd.f32 %v7655_v57, %v7617_v38 }
 0x717   :  { %6454 = vpow2.f32 %v5042_v18 }
 0x718   :  { %6456 = vpow2.f32 %v5041_v9 }
 0x719   :  { %v6441_v55 = vpop.eup %6440  ;;  %6458 = vpow2.f32 %v5061_v22 }
 0x71d   :  { %v6443_v16 = vpop.eup %6442 }
 0x71e   :  { %v6445_v1 = vpop.eup %6444 }
 0x71f   :  { %v6447_v19 = vpop.eup %6446  ;;  %v4423_v50 = vadd.f32 1.0, %v6445_v1 }
 0x720   :  { %v7698_v52 = vmul.f32 %v6447_v19, %v6441_v55 }
 0x721   :  { %v6449_v3 = vpop.eup %6448  ;;  %6460 = vrcp.f32 %v4423_v50 }
 0x722   :  { %v7700_v5 = vmul.f32 %v6449_v3, %v6443_v16  ;;  %v6451_v24 = vpop.eup %6450  ;;  %6462 = vpow2.f32 %v5062_v8 }
 0x723   :  { %6464 = vtanh.f32 %v4258_v33  ;;  %v6453_v42 = vpop.eup %6452  ;;  %v4421_v49 = vadd.f32 1.0, %v6451_v24 }
 0x724   :  { %v4621_v46 = vpack.c.bf16 %v7700_v5, %v7698_v52  ;;  %6466 = vtanh.f32 %v4252_v34  ;;  %v4424_v61 = vadd.f32 1.0, %v6453_v42  ;;  %v6455_v13 = vpop.eup %6454 }
 0x725   :  { %6468 = vrcp.f32 %v4422_v20  ;;  %v6457_v47 = vpop.eup %6456  ;;  %v4420_v4 = vadd.f32 1.0, %v6455_v13 }
 0x726   :  { %6470 = vtanh.f32 %v4262_v54  ;;  %v6459_v37 = vpop.eup %6458  ;;  %v4419_v36 = vadd.f32 1.0, %v6457_v47 }
 0x727   :  { %6472 = vrcp.f32 %v4424_v61  ;;  %v4535_v0 = vadd.f32 1.0, %v6459_v37 }
 0x728   :  { %6474 = vrcp.f32 %v4421_v49 }
 0x729   :  { %6476 = vpow2.f32 %v5060_v60 }
 0x72a   :  { %6478 = vtanh.f32 %v4248_v51 }
 0x72b   :  { %6480 = vpow2.f32 %v5059_v56 }
 0x72c   :  { %6482 = vpow2.f32 %v5058_v40 }
 0x72d   :  { %6484 = vrcp.f32 %v4420_v4 }
 0x72e   :  { %v6461_v23 = vpop.eup %6460  ;;  %6486 = vtanh.f32 %v4242_v62 }
 0x72f   :  { %v6463_v31 = vpop.eup %6462  ;;  %6488 = vrcp.f32 %v4419_v36 }
 0x730   :  { %v6465_v58 = vpop.eup %6464  ;;  %6490 = vpow2.f32 %v5057_v15  ;;  %v4536_v39 = vadd.f32 1.0, %v6463_v31 }
 0x731   :  { %v6467_v12 = vpop.eup %6466  ;;  %v4583_v18 = vmul.f32 %v6465_v58, %v6461_v23  ;;  %6492 = vtanh.f32 %v4238_v14 }
 0x732   :  { %v6469_v26 = vpop.eup %6468  ;;  %6494 = vrcp.f32 %v4535_v0 }
 0x733   :  { %v6471_v29 = vpop.eup %6470  ;;  %6496 = vtanh.f32 %v4583_v18  ;;  %v4582_v57 = vmul.f32 %v6469_v26, %v6467_v12 }
 0x734   :  { %v6473_v63 = vpop.eup %6472  ;;  %6498 = vrcp.f32 %v4536_v39 }
 0x735   :  { %v6475_v9 = vpop.eup %6474  ;;  %v4584_v55 = vmul.f32 %v6473_v63, %v6471_v29 }
 0x736   :  { %v6477_v59 = vpop.eup %6476 }
 0x737   :  { %v6479_v38 = vpop.eup %6478  ;;  %6500 = vtanh.f32 %v4584_v55  ;;  %v4534_v22 = vadd.f32 1.0, %v6477_v59 }
 0x738   :  { %v6481_v16 = vpop.eup %6480  ;;  %v4581_v1 = vmul.f32 %v6479_v38, %v6475_v9  ;;  %6502 = vtanh.f32 %v4582_v57 }
 0x739   :  { %v6483_v19 = vpop.eup %6482  ;;  %v4533_v50 = vadd.f32 1.0, %v6481_v16 }
 0x73a   :  { %v6485_v3 = vpop.eup %6484  ;;  %6504 = vtanh.f32 %v4581_v1  ;;  %v4532_v24 = vadd.f32 1.0, %v6483_v19 }
 0x73b   :  { %v6487_v8 = vpop.eup %6486  ;;  %6506 = vrcp.f32 %v4534_v22 }
 0x73c   :  { %v6489_v45 = vpop.eup %6488  ;;  %v4580_v25 = vmul.f32 %v6487_v8, %v6485_v3  ;;  %6508 = vrcp.f32 %v4533_v50 }
 0x73d   :  { %v6491_v33 = vpop.eup %6490 }
 0x73e   :  { %v6493_v34 = vpop.eup %6492  ;;  %v4531_v42 = vadd.f32 1.0, %v6491_v33  ;;  %6510 = vtanh.f32 %v4580_v25 }
 0x73f   :  { %v6495_v20 = vpop.eup %6494  ;;  %v4579_v28 = vmul.f32 %v6493_v34, %v6489_v45  ;;  %6512 = vrcp.f32 %v4532_v24 }
 0x740   :  { %v6497_v54 = vpop.eup %6496 }
 0x741   :  { %v6499_v32 = vpop.eup %6498  ;;  %6514 = vtanh.f32 %v4579_v28  ;;  %v4615_v61 = vmul.f32 %v6497_v54, %v6495_v20 }
 0x742   :  { %6516 = vrcp.f32 %v4531_v42 }
 0x744   :  { %v6501_v49 = vpop.eup %6500 }
 0x745   :  { %v4616_v60 = vmul.f32 %v6501_v49, %v6499_v32  ;;  %v6503_v51 = vpop.eup %6502 }
 0x747   :  { %v4624_v30 = vpack.c.bf16 %v4616_v60, %v4615_v61  ;;  %v6505_v56 = vpop.eup %6504 }
 0x748   :  { %v6507_v13 = vpop.eup %6506 }
 0x749   :  { %5372 = vmatpush3.bf16.xpose.msra.mxu0 %v4624_v30  ;;  %v4614_v47 = vmul.f32 %v6507_v13, %v6503_v51  ;;  %v6509_v2 = vpop.eup %6508 }
 0x74a   :  { %5373 = vmatprep.subr.bf16.mxu0 %v6678_v48  ;;  %v4613_v40 = vmul.f32 %v6509_v2, %v6505_v56 }
 0x74b   :  { %v6511_v62 = vpop.eup %6510 }
 0x74c   :  { %v4623_v4 = vpack.c.bf16 %v4614_v47, %v4613_v40  ;;  %v6513_v37 = vpop.eup %6512 }
 0x74d   :  { %v4612_v23 = vmul.f32 %v6513_v37, %v6511_v62 }
 0x74e   :  { %v6515_v36 = vpop.eup %6514 }
 0x74f   :  { %v6517_v15 = vpop.eup %6516 }
 0x750   :  { %v4611_v31 = vmul.f32 %v6517_v15, %v6515_v36 }
 0x751   :  { %5374 = vmatpush3.bf16.xpose.msra.mxu0 %v4623_v4 }
 0x752   :  { %5375 = vmatprep.subr.bf16.mxu0 %v6678_v48  ;;  %v4622_v14 = vpack.c.bf16 %v4612_v23, %v4611_v31 }
 0x759   :  { %5376 = vmatpush3.bf16.xpose.msra.mxu0 %v4622_v14 }
 0x75a   :  { %5377 = vmatprep.subr.bf16.mxu0 %v6678_v48 }
 0x761   :  { %5378 = vmatpush3.bf16.xpose.msra.mxu0 %v4621_v46 }
 0x762   :  { %5379 = vmatprep.subr.bf16.mxu0 %v6678_v48 }
 0x769   :  { %5380 = vmatpush3.bf16.xpose.msra.mxu0 %v4620_v35 }
 0x76a   :  { %5381 = vmatprep.subr.bf16.mxu0 %v6678_v48 }
 0x771   :  { %5382 = vmatpush3.bf16.xpose.msra.mxu0 %v4619_v41 }
 0x772   :  { %5383 = vmatprep.subr.bf16.mxu0 %v6678_v48 }
 0x779   :  { %5384 = vmatpush3.bf16.xpose.msra.mxu0 %v4618_v7 }
 0x77a   :  { %5385 = vmatprep.subr.bf16.mxu0 %v6678_v48 }
 0x781   :  { %5386 = vmatpush3.bf16.xpose.msra.mxu0 %v4617_v21 }
 0x788   :  { %5388 = vmatmul.mubr.bf16.vlgmr.msra.gmra.mxu0 %v4625_v17 }
 0x848   :  { %v4662_v27 = vpop.f32.mrf.mxu0 }
 0x849   :  { %v4663_v41 = vadd.f32 %v4662_v27, %v4627_v44 }
 0x84a   :  { %v5389_v43 = vpop.f32.mrf.mxu0 }
 0x84b   :  { %4668 = vst [vmem:[%s7767_s17] sm:$0x1] %v4663_v41 }
 0x84c   :  { %v4665_v48 = vpop.f32.mrf.mxu0 }
 0x84e   :  { %v5390_v53 = vpop.f32.mrf.mxu0 }
 0x84f   :  { %4673 = vsyncpa [#allocation4], 1 }
 0x850   :  { %4674 = vsyncpa [#allocation6], 1 }
 0x851   :  { %4675 = vsyncpa [#allocation9], 1 }
 0x852   :  { %4676 = vsyncpa [#allocation12], 1 }

</bundles_post_ra>
